<compile_context>
chip_gen: v6e
topology: v6e:2x2x1
jax: 0.10.0
libtpu: 0.0.40
codegen_flags: <defaults>
</compile_context>

<pallas_src>
from functools import partial

import jax
import jax.numpy as jnp
from jax.experimental import pallas as pl
from jax.experimental.pallas import tpu as pltpu


N_ACTIONS = 6
Q_HIDDEN = 128
Q_NUM_HIDDEN_LAYERS = 1      # args.q_num_hidden_layers; q_activation = ReLU


def _round_up(x, m):
    return (x + m - 1) // m * m


def _pad2d(x, mp, kp):
    m, k = x.shape
    if m == mp and k == kp:
        return x
    return jnp.pad(x, ((0, mp - m), (0, kp - k)))


# ----------------------------- Pallas kernels --------------------------------

def _mm_bias_act_kernel(x_ref, w_ref, b_ref, o_ref, *, act):
    """act(x @ w + b) for one M-tile.  bf16 operands, f32 accumulation."""
    acc = jnp.dot(x_ref[...], w_ref[...], preferred_element_type=jnp.float32)
    acc = acc + b_ref[...]                       # (1, Np) broadcasts over rows
    if act == "relu":
        acc = jnp.maximum(acc, 0.0)
    o_ref[...] = acc.astype(o_ref.dtype)


def _fused_mlp_kernel(*refs, acts):
    """Chain of Linear(+ReLU) layers fully resident in VMEM (single grid step).

    refs = (x_ref, w0, b0, w1, b1, ..., o_ref); acts[i] in {"relu", "none"}.
    """
    x_ref = refs[0]
    o_ref = refs[-1]
    wb = refs[1:-1]
    h = x_ref[...]
    n_layers = len(acts)
    for l, act in enumerate(acts):
        w = wb[2 * l][...]
        b = wb[2 * l + 1][...]
        acc = jnp.dot(h, w, preferred_element_type=jnp.float32) + b
        if act == "relu":
            acc = jnp.maximum(acc, 0.0)
        h = acc.astype(jnp.bfloat16) if l + 1 < n_layers else acc
    o_ref[...] = h.astype(o_ref.dtype)


# ------------------------------ Pallas wrappers -------------------------------

def matmul_bias_act(x, wp, bp, *, n_out, act="relu",
                    out_dtype=jnp.bfloat16, tm_cap=512):
    """y = act(x @ wp + bp) with pre-padded bf16 wp (Kp, Np) and f32 bp (1, Np).

    Only x gets padded per call (rows to the tile, cols to Kp with exact zeros).
    Returns the (M, n_out) slice.
    """
    M, K = x.shape
    Kp, Np = wp.shape
    tm = min(tm_cap, _round_up(M, 16))
    Mp = _round_up(M, tm)
    xp = _pad2d(x.astype(jnp.bfloat16), Mp, Kp)

    out = pl.pallas_call(
        partial(_mm_bias_act_kernel, act=act),
        out_shape=jax.ShapeDtypeStruct((Mp, Np), out_dtype),
        grid_spec=pltpu.PrefetchScalarGridSpec(
            num_scalar_prefetch=0,
            grid=(Mp // tm,),
            in_specs=[
                pl.BlockSpec((tm, Kp), lambda i: (i, 0)),
                pl.BlockSpec((Kp, Np), lambda i: (0, 0)),
                pl.BlockSpec((1, Np), lambda i: (0, 0)),
            ],
            out_specs=pl.BlockSpec((tm, Np), lambda i: (i, 0)),
        ),
        compiler_params=pltpu.CompilerParams(
            dimension_semantics=("parallel",)),
    )(xp, wp, bp)
    return out[:M, :n_out]


def fused_mlp(x, layers, *, n_out, out_dtype=jnp.float32):
    """One Pallas call for the whole MLP head.  layers: [(wp, bp, act), ...]."""
    M = x.shape[0]
    Mp = _round_up(max(M, 16), 16)
    K0p = layers[0][0].shape[0]
    Nfp = layers[-1][0].shape[1]
    xp = _pad2d(x.astype(jnp.bfloat16), Mp, K0p)

    in_specs = [pl.BlockSpec((Mp, K0p), lambda i: (0, 0))]
    operands = [xp]
    for wp, bp, _ in layers:
        in_specs.append(pl.BlockSpec(wp.shape, lambda i: (0, 0)))
        in_specs.append(pl.BlockSpec(bp.shape, lambda i: (0, 0)))
        operands.append(wp)
        operands.append(bp)
    acts = tuple(act for _, _, act in layers)

    out = pl.pallas_call(
        partial(_fused_mlp_kernel, acts=acts),
        out_shape=jax.ShapeDtypeStruct((Mp, Nfp), out_dtype),
        grid_spec=pltpu.PrefetchScalarGridSpec(
            num_scalar_prefetch=0,
            grid=(1,),
            in_specs=in_specs,
            out_specs=pl.BlockSpec((Mp, Nfp), lambda i: (0, 0)),
        ),
        compiler_params=pltpu.CompilerParams(
            dimension_semantics=("arbitrary",)),
    )(*operands)
    return out[:M, :n_out]


# -------------------------------- JAX glue ------------------------------------

def im2col_nhwc(x, kh, kw, stride):
    """x: (N, H, W, C) -> patches (N*OH*OW, kh*kw*C), patch order (kh, kw, C).

    Built by concatenating strided slices along the lane (channel) axis: no
    big transposes, no 6-D stack.
    """
    n, h, w, c = x.shape
    oh = (h - kh) // stride + 1
    ow = (w - kw) // stride + 1
    cols = []
    for i in range(kh):
        for j in range(kw):
            cols.append(x[:, i:i + stride * oh:stride, j:j + stride * ow:stride, :])
    p = jnp.concatenate(cols, axis=-1)           # (N, OH, OW, kh*kw*C)
    return p.reshape(n * oh * ow, kh * kw * c), oh, ow


def conv_layer(x_nhwc, wp, bp, n_out, kh, kw, stride):
    """NHWC conv via im2col + fused Pallas matmul; stays NHWC and bf16."""
    n = x_nhwc.shape[0]
    patches, oh, ow = im2col_nhwc(x_nhwc, kh, kw, stride)
    y = matmul_bias_act(patches, wp, bp, n_out=n_out, act="relu",
                        out_dtype=jnp.bfloat16)
    return y.reshape(n, oh, ow, n_out)


# -------------------------------- parameters ----------------------------------

def init_params(key):
    """Deterministic synthetic parameters in PyTorch layout (shapes match nn.Module)."""
    def lin(key, fan_in, fan_out):
        kw_, _ = jax.random.split(key)
        w = jax.random.normal(kw_, (fan_in, fan_out), jnp.float32) / jnp.sqrt(fan_in)
        b = jnp.zeros((fan_out,), jnp.float32)
        return w, b

    def conv(key, cout, cin, kh, kw):
        kw_, _ = jax.random.split(key)
        fan_in = cin * kh * kw
        w = jax.random.normal(kw_, (cout, cin, kh, kw), jnp.float32) / jnp.sqrt(fan_in)
        b = jnp.zeros((cout,), jnp.float32)
        return w, b

    keys = jax.random.split(key, 8 + Q_NUM_HIDDEN_LAYERS)
    p = {}
    p["c1_w"], p["c1_b"] = conv(keys[0], 32, 4, 8, 8)
    p["c2_w"], p["c2_b"] = conv(keys[1], 64, 32, 4, 4)
    p["c3_w"], p["c3_b"] = conv(keys[2], 64, 64, 3, 3)
    p["fc_w"], p["fc_b"] = lin(keys[3], 64 * 7 * 7, 512)
    p["q0_w"], p["q0_b"] = lin(keys[4], 512, Q_HIDDEN)
    for l in range(Q_NUM_HIDDEN_LAYERS):
        p[f"qh{l}_w"], p[f"qh{l}_b"] = lin(keys[5 + l], Q_HIDDEN, Q_HIDDEN)
    p["qo_w"], p["qo_b"] = lin(keys[5 + Q_NUM_HIDDEN_LAYERS], Q_HIDDEN, N_ACTIONS)
    return p


def prepare_params(p):
    """One-time relayout: transpose/permute, zero-pad K/N to 128-multiples, cast
    weights to bf16 (biases stay f32).  Done OUTSIDE jit, once."""
    def pad_w(w2d):
        k, n = w2d.shape
        return _pad2d(w2d.astype(jnp.bfloat16), _round_up(k, 128), _round_up(n, 128))

    def pad_b(b):
        n = b.shape[0]
        return _pad2d(b.astype(jnp.float32).reshape(1, n), 1, _round_up(n, 128))

    def conv_w(w):  # (Cout, Cin, kh, kw) -> (kh*kw*Cin, Cout), NHWC patch order
        cout, cin, kh, kw = w.shape
        return w.transpose(2, 3, 1, 0).reshape(kh * kw * cin, cout)

    pp = {}
    pp["c1_w"], pp["c1_b"] = pad_w(conv_w(p["c1_w"])), pad_b(p["c1_b"])
    pp["c2_w"], pp["c2_b"] = pad_w(conv_w(p["c2_w"])), pad_b(p["c2_b"])
    pp["c3_w"], pp["c3_b"] = pad_w(conv_w(p["c3_w"])), pad_b(p["c3_b"])
    # fc_w rows are indexed by PyTorch's NCHW flatten order (c, h, w);
    # permute once to the NHWC flatten order (h, w, c) used downstream.
    fc_w = p["fc_w"].reshape(64, 7, 7, 512).transpose(1, 2, 0, 3).reshape(64 * 7 * 7, 512)
    pp["fc_w"], pp["fc_b"] = pad_w(fc_w), pad_b(p["fc_b"])
    pp["q0_w"], pp["q0_b"] = pad_w(p["q0_w"]), pad_b(p["q0_b"])
    for l in range(Q_NUM_HIDDEN_LAYERS):
        pp[f"qh{l}_w"], pp[f"qh{l}_b"] = pad_w(p[f"qh{l}_w"]), pad_b(p[f"qh{l}_b"])
    pp["qo_w"], pp["qo_b"] = pad_w(p["qo_w"]), pad_b(p["qo_b"])
    return pp


# --------------------------------- forward ------------------------------------

def qreps_forward(x, pp):
    """x: (N, 4, 84, 84) f32 pixels in [0, 255] (NCHW, as PyTorch).  Q: (N, n_actions)."""
    n = x.shape[0]
    h = jnp.transpose(x, (0, 2, 3, 1))                  # NCHW -> NHWC once
    h = (h * (1.0 / 255.0)).astype(jnp.bfloat16)        # /255 in f32, then bf16
    h = conv_layer(h, pp["c1_w"], pp["c1_b"], 32, 8, 8, 4)   # (N, 20, 20, 32)
    h = conv_layer(h, pp["c2_w"], pp["c2_b"], 64, 4, 4, 2)   # (N,  9,  9, 64)
    h = conv_layer(h, pp["c3_w"], pp["c3_b"], 64, 3, 3, 1)   # (N,  7,  7, 64)
    h = h.reshape(n, -1)                                     # NHWC flatten (3136,)
    layers = [(pp["fc_w"], pp["fc_b"], "relu"),
              (pp["q0_w"], pp["q0_b"], "relu")]
    for l in range(Q_NUM_HIDDEN_LAYERS):
        layers.append((pp[f"qh{l}_w"], pp[f"qh{l}_b"], "relu"))
    layers.append((pp["qo_w"], pp["qo_b"], "none"))
    return fused_mlp(h, layers, n_out=N_ACTIONS, out_dtype=jnp.float32)


if __name__ == "__main__":
    key = jax.random.PRNGKey(0)
    kx, kp = jax.random.split(key)

    # Atari-style input: batch=2, 4 stacked 84x84 frames (NCHW), values in [0, 255].
    # (84x84 is required: the Linear(64*7*7, 512) fixes the conv output size.)
    x = jax.random.uniform(kx, (2, 4, 84, 84), jnp.float32, minval=0.0, maxval=255.0)

    params = init_params(kp)
    prepped = prepare_params(params)          # one-time weight relayout, outside jit

    fwd = jax.jit(qreps_forward)
    q = fwd(x, prepped)
    q = jax.block_until_ready(q)

    assert q.shape == (2, N_ACTIONS), q.shape
    assert bool(jnp.all(jnp.isfinite(q)))
    print("KERNEL_OK")
</pallas_src>

<mosaic_0001>
module attributes {stable_mosaic.version = 11 : i64} {
  func.func @_mm_bias_act_kernel(%arg0: i32, %arg1: memref<512x256xbf16, #tpu.memory_space<vmem>>, %arg2: memref<256x128xbf16, #tpu.memory_space<vmem>>, %arg3: memref<1x128xf32, #tpu.memory_space<vmem>>, %arg4: memref<512x128xbf16, #tpu.memory_space<vmem>>) attributes {dimension_semantics = [#tpu.dimension_semantics<parallel>], iteration_bounds = array<i64: 2>, scalar_prefetch = 0 : i64, scratch_operands = 0 : i64, tpu.core_type = #tpu.core_type<tc>, window_params = [{transform_indices = @transform_0, window_bounds = array<i64: 512, 256>}, {pipeline_mode = #tpu.pipeline_mode<synchronous>, transform_indices = @transform_1, window_bounds = array<i64: 256, 128>}, {pipeline_mode = #tpu.pipeline_mode<synchronous>, transform_indices = @transform_2, window_bounds = array<i64: 1, 128>}, {transform_indices = @transform_3, window_bounds = array<i64: 512, 128>}]} {
    %c0 = arith.constant 0 : index
    %c0_0 = arith.constant 0 : index
    %0 = vector.load %arg1[%c0, %c0_0] : memref<512x256xbf16, #tpu.memory_space<vmem>>, vector<512x256xbf16>
    %c0_1 = arith.constant 0 : index
    %c0_2 = arith.constant 0 : index
    %1 = vector.load %arg2[%c0_1, %c0_2] : memref<256x128xbf16, #tpu.memory_space<vmem>>, vector<256x128xbf16>
    %cst = arith.constant dense<0.000000e+00> : vector<512x128xf32>
    %2 = tpu.matmul %0, %1, %cst {dimension_numbers = #tpu.dot_dimension_numbers<[1], [0], [0], [1], [0, 0, 1, 1], [], []>} : vector<512x256xbf16>, vector<256x128xbf16>, vector<512x128xf32> -> vector<512x128xf32>
    %c0_3 = arith.constant 0 : index
    %c0_4 = arith.constant 0 : index
    %3 = vector.load %arg3[%c0_3, %c0_4] : memref<1x128xf32, #tpu.memory_space<vmem>>, vector<1x128xf32>
    %4 = vector.broadcast %3 : vector<1x128xf32> to vector<512x128xf32>
    %5 = arith.addf %2, %4 : vector<512x128xf32>
    %cst_5 = arith.constant 0.000000e+00 : f32
    %6 = vector.broadcast %cst_5 : f32 to vector<512x128xf32>
    %7 = arith.maximumf %5, %6 : vector<512x128xf32>
    %8 = arith.truncf %7 : vector<512x128xf32> to vector<512x128xbf16>
    %c0_6 = arith.constant 0 : index
    %c0_7 = arith.constant 0 : index
    %9 = vector.load %arg4[%c0_6, %c0_7] : memref<512x128xbf16, #tpu.memory_space<vmem>>, vector<512x128xbf16>
    tpu.vector_store %arg4[%c0_6, %c0_7], %8 {strides = array<i32>} : memref<512x128xbf16, #tpu.memory_space<vmem>>, vector<512x128xbf16>,
    return
  }
  func.func @transform_0(%arg0: i32) -> (i32, i32) {
    %c0_i32 = arith.constant 0 : i32
    %c0_i32_0 = arith.constant 0 : i32
    return %arg0, %c0_i32 : i32, i32
  }
  func.func @transform_1(%arg0: i32) -> (i32, i32) {
    %c0_i32 = arith.constant 0 : i32
    %c0_i32_0 = arith.constant 0 : i32
    %c0_i32_1 = arith.constant 0 : i32
    return %c0_i32, %c0_i32_0 : i32, i32
  }
  func.func @transform_2(%arg0: i32) -> (i32, i32) {
    %c0_i32 = arith.constant 0 : i32
    %c0_i32_0 = arith.constant 0 : i32
    %c0_i32_1 = arith.constant 0 : i32
    return %c0_i32, %c0_i32_0 : i32, i32
  }
  func.func @transform_3(%arg0: i32) -> (i32, i32) {
    %c0_i32 = arith.constant 0 : i32
    %c0_i32_0 = arith.constant 0 : i32
    return %arg0, %c0_i32 : i32, i32
  }
}

module attributes {stable_mosaic.version = 11 : i64} {
  func.func @_mm_bias_act_kernel(%arg0: i32, %arg1: memref<176x512xbf16, #tpu.memory_space<vmem>>, %arg2: memref<512x128xbf16, #tpu.memory_space<vmem>>, %arg3: memref<1x128xf32, #tpu.memory_space<vmem>>, %arg4: memref<176x128xbf16, #tpu.memory_space<vmem>>) attributes {dimension_semantics = [#tpu.dimension_semantics<parallel>], iteration_bounds = array<i64: 1>, scalar_prefetch = 0 : i64, scratch_operands = 0 : i64, tpu.core_type = #tpu.core_type<tc>, window_params = [{transform_indices = @transform_0, window_bounds = array<i64: 176, 512>}, {pipeline_mode = #tpu.pipeline_mode<synchronous>, transform_indices = @transform_1, window_bounds = array<i64: 512, 128>}, {pipeline_mode = #tpu.pipeline_mode<synchronous>, transform_indices = @transform_2, window_bounds = array<i64: 1, 128>}, {transform_indices = @transform_3, window_bounds = array<i64: 176, 128>}]} {
    %c0 = arith.constant 0 : index
    %c0_0 = arith.constant 0 : index
    %0 = vector.load %arg1[%c0, %c0_0] : memref<176x512xbf16, #tpu.memory_space<vmem>>, vector<176x512xbf16>
    %c0_1 = arith.constant 0 : index
    %c0_2 = arith.constant 0 : index
    %1 = vector.load %arg2[%c0_1, %c0_2] : memref<512x128xbf16, #tpu.memory_space<vmem>>, vector<512x128xbf16>
    %cst = arith.constant dense<0.000000e+00> : vector<176x128xf32>
    %2 = tpu.matmul %0, %1, %cst {dimension_numbers = #tpu.dot_dimension_numbers<[1], [0], [0], [1], [0, 0, 1, 1], [], []>} : vector<176x512xbf16>, vector<512x128xbf16>, vector<176x128xf32> -> vector<176x128xf32>
    %c0_3 = arith.constant 0 : index
    %c0_4 = arith.constant 0 : index
    %3 = vector.load %arg3[%c0_3, %c0_4] : memref<1x128xf32, #tpu.memory_space<vmem>>, vector<1x128xf32>
    %4 = vector.broadcast %3 : vector<1x128xf32> to vector<176x128xf32>
    %5 = arith.addf %2, %4 : vector<176x128xf32>
    %cst_5 = arith.constant 0.000000e+00 : f32
    %6 = vector.broadcast %cst_5 : f32 to vector<176x128xf32>
    %7 = arith.maximumf %5, %6 : vector<176x128xf32>
    %8 = arith.truncf %7 : vector<176x128xf32> to vector<176x128xbf16>
    %c0_6 = arith.constant 0 : index
    %c0_7 = arith.constant 0 : index
    %9 = vector.load %arg4[%c0_6, %c0_7] : memref<176x128xbf16, #tpu.memory_space<vmem>>, vector<176x128xbf16>
    tpu.vector_store %arg4[%c0_6, %c0_7], %8 {strides = array<i32>} : memref<176x128xbf16, #tpu.memory_space<vmem>>, vector<176x128xbf16>,
    return
  }
  func.func @transform_0(%arg0: i32) -> (i32, i32) {
    %c0_i32 = arith.constant 0 : i32
    %c0_i32_0 = arith.constant 0 : i32
    return %arg0, %c0_i32 : i32, i32
  }
  func.func @transform_1(%arg0: i32) -> (i32, i32) {
    %c0_i32 = arith.constant 0 : i32
    %c0_i32_0 = arith.constant 0 : i32
    %c0_i32_1 = arith.constant 0 : i32
    return %c0_i32, %c0_i32_0 : i32, i32
  }
  func.func @transform_2(%arg0: i32) -> (i32, i32) {
    %c0_i32 = arith.constant 0 : i32
    %c0_i32_0 = arith.constant 0 : i32
    %c0_i32_1 = arith.constant 0 : i32
    return %c0_i32, %c0_i32_0 : i32, i32
  }
  func.func @transform_3(%arg0: i32) -> (i32, i32) {
    %c0_i32 = arith.constant 0 : i32
    %c0_i32_0 = arith.constant 0 : i32
    return %arg0, %c0_i32 : i32, i32
  }
}

module attributes {stable_mosaic.version = 11 : i64} {
  func.func @_mm_bias_act_kernel(%arg0: i32, %arg1: memref<112x640xbf16, #tpu.memory_space<vmem>>, %arg2: memref<640x128xbf16, #tpu.memory_space<vmem>>, %arg3: memref<1x128xf32, #tpu.memory_space<vmem>>, %arg4: memref<112x128xbf16, #tpu.memory_space<vmem>>) attributes {dimension_semantics = [#tpu.dimension_semantics<parallel>], iteration_bounds = array<i64: 1>, scalar_prefetch = 0 : i64, scratch_operands = 0 : i64, tpu.core_type = #tpu.core_type<tc>, window_params = [{transform_indices = @transform_0, window_bounds = array<i64: 112, 640>}, {pipeline_mode = #tpu.pipeline_mode<synchronous>, transform_indices = @transform_1, window_bounds = array<i64: 640, 128>}, {pipeline_mode = #tpu.pipeline_mode<synchronous>, transform_indices = @transform_2, window_bounds = array<i64: 1, 128>}, {transform_indices = @transform_3, window_bounds = array<i64: 112, 128>}]} {
    %c0 = arith.constant 0 : index
    %c0_0 = arith.constant 0 : index
    %0 = vector.load %arg1[%c0, %c0_0] : memref<112x640xbf16, #tpu.memory_space<vmem>>, vector<112x640xbf16>
    %c0_1 = arith.constant 0 : index
    %c0_2 = arith.constant 0 : index
    %1 = vector.load %arg2[%c0_1, %c0_2] : memref<640x128xbf16, #tpu.memory_space<vmem>>, vector<640x128xbf16>
    %cst = arith.constant dense<0.000000e+00> : vector<112x128xf32>
    %2 = tpu.matmul %0, %1, %cst {dimension_numbers = #tpu.dot_dimension_numbers<[1], [0], [0], [1], [0, 0, 1, 1], [], []>} : vector<112x640xbf16>, vector<640x128xbf16>, vector<112x128xf32> -> vector<112x128xf32>
    %c0_3 = arith.constant 0 : index
    %c0_4 = arith.constant 0 : index
    %3 = vector.load %arg3[%c0_3, %c0_4] : memref<1x128xf32, #tpu.memory_space<vmem>>, vector<1x128xf32>
    %4 = vector.broadcast %3 : vector<1x128xf32> to vector<112x128xf32>
    %5 = arith.addf %2, %4 : vector<112x128xf32>
    %cst_5 = arith.constant 0.000000e+00 : f32
    %6 = vector.broadcast %cst_5 : f32 to vector<112x128xf32>
    %7 = arith.maximumf %5, %6 : vector<112x128xf32>
    %8 = arith.truncf %7 : vector<112x128xf32> to vector<112x128xbf16>
    %c0_6 = arith.constant 0 : index
    %c0_7 = arith.constant 0 : index
    %9 = vector.load %arg4[%c0_6, %c0_7] : memref<112x128xbf16, #tpu.memory_space<vmem>>, vector<112x128xbf16>
    tpu.vector_store %arg4[%c0_6, %c0_7], %8 {strides = array<i32>} : memref<112x128xbf16, #tpu.memory_space<vmem>>, vector<112x128xbf16>,
    return
  }
  func.func @transform_0(%arg0: i32) -> (i32, i32) {
    %c0_i32 = arith.constant 0 : i32
    %c0_i32_0 = arith.constant 0 : i32
    return %arg0, %c0_i32 : i32, i32
  }
  func.func @transform_1(%arg0: i32) -> (i32, i32) {
    %c0_i32 = arith.constant 0 : i32
    %c0_i32_0 = arith.constant 0 : i32
    %c0_i32_1 = arith.constant 0 : i32
    return %c0_i32, %c0_i32_0 : i32, i32
  }
  func.func @transform_2(%arg0: i32) -> (i32, i32) {
    %c0_i32 = arith.constant 0 : i32
    %c0_i32_0 = arith.constant 0 : i32
    %c0_i32_1 = arith.constant 0 : i32
    return %c0_i32, %c0_i32_0 : i32, i32
  }
  func.func @transform_3(%arg0: i32) -> (i32, i32) {
    %c0_i32 = arith.constant 0 : i32
    %c0_i32_0 = arith.constant 0 : i32
    return %arg0, %c0_i32 : i32, i32
  }
}

module attributes {stable_mosaic.version = 11 : i64} {
  func.func @_fused_mlp_kernel(%arg0: i32, %arg1: memref<16x3200xbf16, #tpu.memory_space<vmem>>, %arg2: memref<3200x512xbf16, #tpu.memory_space<vmem>>, %arg3: memref<1x512xf32, #tpu.memory_space<vmem>>, %arg4: memref<512x128xbf16, #tpu.memory_space<vmem>>, %arg5: memref<1x128xf32, #tpu.memory_space<vmem>>, %arg6: memref<128x128xbf16, #tpu.memory_space<vmem>>, %arg7: memref<1x128xf32, #tpu.memory_space<vmem>>, %arg8: memref<128x128xbf16, #tpu.memory_space<vmem>>, %arg9: memref<1x128xf32, #tpu.memory_space<vmem>>, %arg10: memref<16x128xf32, #tpu.memory_space<vmem>>) attributes {dimension_semantics = [#tpu.dimension_semantics<arbitrary>], iteration_bounds = array<i64: 1>, scalar_prefetch = 0 : i64, scratch_operands = 0 : i64, tpu.core_type = #tpu.core_type<tc>, window_params = [{pipeline_mode = #tpu.pipeline_mode<synchronous>, transform_indices = @transform_0, window_bounds = array<i64: 16, 3200>}, {pipeline_mode = #tpu.pipeline_mode<synchronous>, transform_indices = @transform_1, window_bounds = array<i64: 3200, 512>}, {pipeline_mode = #tpu.pipeline_mode<synchronous>, transform_indices = @transform_2, window_bounds = array<i64: 1, 512>}, {pipeline_mode = #tpu.pipeline_mode<synchronous>, transform_indices = @transform_3, window_bounds = array<i64: 512, 128>}, {pipeline_mode = #tpu.pipeline_mode<synchronous>, transform_indices = @transform_4, window_bounds = array<i64: 1, 128>}, {pipeline_mode = #tpu.pipeline_mode<synchronous>, transform_indices = @transform_5, window_bounds = array<i64: 128, 128>}, {pipeline_mode = #tpu.pipeline_mode<synchronous>, transform_indices = @transform_6, window_bounds = array<i64: 1, 128>}, {pipeline_mode = #tpu.pipeline_mode<synchronous>, transform_indices = @transform_7, window_bounds = array<i64: 128, 128>}, {pipeline_mode = #tpu.pipeline_mode<synchronous>, transform_indices = @transform_8, window_bounds = array<i64: 1, 128>}, {pipeline_mode = #tpu.pipeline_mode<synchronous>, transform_indices = @transform_9, window_bounds = array<i64: 16, 128>}]} {
    %c0 = arith.constant 0 : index
    %c0_0 = arith.constant 0 : index
    %0 = vector.load %arg1[%c0, %c0_0] : memref<16x3200xbf16, #tpu.memory_space<vmem>>, vector<16x3200xbf16>
    %c0_1 = arith.constant 0 : index
    %c0_2 = arith.constant 0 : index
    %1 = vector.load %arg2[%c0_1, %c0_2] : memref<3200x512xbf16, #tpu.memory_space<vmem>>, vector<3200x512xbf16>
    %c0_3 = arith.constant 0 : index
    %c0_4 = arith.constant 0 : index
    %2 = vector.load %arg3[%c0_3, %c0_4] : memref<1x512xf32, #tpu.memory_space<vmem>>, vector<1x512xf32>
    %cst = arith.constant dense<0.000000e+00> : vector<16x512xf32>
    %3 = tpu.matmul %0, %1, %cst {dimension_numbers = #tpu.dot_dimension_numbers<[1], [0], [0], [1], [0, 0, 1, 1], [], []>} : vector<16x3200xbf16>, vector<3200x512xbf16>, vector<16x512xf32> -> vector<16x512xf32>
    %4 = vector.broadcast %2 : vector<1x512xf32> to vector<16x512xf32>
    %5 = arith.addf %3, %4 : vector<16x512xf32>
    %cst_5 = arith.constant 0.000000e+00 : f32
    %6 = vector.broadcast %cst_5 : f32 to vector<16x512xf32>
    %7 = arith.maximumf %5, %6 : vector<16x512xf32>
    %8 = arith.truncf %7 : vector<16x512xf32> to vector<16x512xbf16>
    %c0_6 = arith.constant 0 : index
    %c0_7 = arith.constant 0 : index
    %9 = vector.load %arg4[%c0_6, %c0_7] : memref<512x128xbf16, #tpu.memory_space<vmem>>, vector<512x128xbf16>
    %c0_8 = arith.constant 0 : index
    %c0_9 = arith.constant 0 : index
    %10 = vector.load %arg5[%c0_8, %c0_9] : memref<1x128xf32, #tpu.memory_space<vmem>>, vector<1x128xf32>
    %cst_10 = arith.constant dense<0.000000e+00> : vector<16x128xf32>
    %11 = tpu.matmul %8, %9, %cst_10 {dimension_numbers = #tpu.dot_dimension_numbers<[1], [0], [0], [1], [0, 0, 1, 1], [], []>} : vector<16x512xbf16>, vector<512x128xbf16>, vector<16x128xf32> -> vector<16x128xf32>
    %12 = vector.broadcast %10 : vector<1x128xf32> to vector<16x128xf32>
    %13 = arith.addf %11, %12 : vector<16x128xf32>
    %cst_11 = arith.constant 0.000000e+00 : f32
    %14 = vector.broadcast %cst_11 : f32 to vector<16x128xf32>
    %15 = arith.maximumf %13, %14 : vector<16x128xf32>
    %16 = arith.truncf %15 : vector<16x128xf32> to vector<16x128xbf16>
    %c0_12 = arith.constant 0 : index
    %c0_13 = arith.constant 0 : index
    %17 = vector.load %arg6[%c0_12, %c0_13] : memref<128x128xbf16, #tpu.memory_space<vmem>>, vector<128x128xbf16>
    %c0_14 = arith.constant 0 : index
    %c0_15 = arith.constant 0 : index
    %18 = vector.load %arg7[%c0_14, %c0_15] : memref<1x128xf32, #tpu.memory_space<vmem>>, vector<1x128xf32>
    %cst_16 = arith.constant dense<0.000000e+00> : vector<16x128xf32>
    %19 = tpu.matmul %16, %17, %cst_16 {dimension_numbers = #tpu.dot_dimension_numbers<[1], [0], [0], [1], [0, 0, 1, 1], [], []>} : vector<16x128xbf16>, vector<128x128xbf16>, vector<16x128xf32> -> vector<16x128xf32>
    %20 = vector.broadcast %18 : vector<1x128xf32> to vector<16x128xf32>
    %21 = arith.addf %19, %20 : vector<16x128xf32>
    %cst_17 = arith.constant 0.000000e+00 : f32
    %22 = vector.broadcast %cst_17 : f32 to vector<16x128xf32>
    %23 = arith.maximumf %21, %22 : vector<16x128xf32>
    %24 = arith.truncf %23 : vector<16x128xf32> to vector<16x128xbf16>
    %c0_18 = arith.constant 0 : index
    %c0_19 = arith.constant 0 : index
    %25 = vector.load %arg8[%c0_18, %c0_19] : memref<128x128xbf16, #tpu.memory_space<vmem>>, vector<128x128xbf16>
    %c0_20 = arith.constant 0 : index
    %c0_21 = arith.constant 0 : index
    %26 = vector.load %arg9[%c0_20, %c0_21] : memref<1x128xf32, #tpu.memory_space<vmem>>, vector<1x128xf32>
    %cst_22 = arith.constant dense<0.000000e+00> : vector<16x128xf32>
    %27 = tpu.matmul %24, %25, %cst_22 {dimension_numbers = #tpu.dot_dimension_numbers<[1], [0], [0], [1], [0, 0, 1, 1], [], []>} : vector<16x128xbf16>, vector<128x128xbf16>, vector<16x128xf32> -> vector<16x128xf32>
    %28 = vector.broadcast %26 : vector<1x128xf32> to vector<16x128xf32>
    %29 = arith.addf %27, %28 : vector<16x128xf32>
    %c0_23 = arith.constant 0 : index
    %c0_24 = arith.constant 0 : index
    %30 = vector.load %arg10[%c0_23, %c0_24] : memref<16x128xf32, #tpu.memory_space<vmem>>, vector<16x128xf32>
    tpu.vector_store %arg10[%c0_23, %c0_24], %29 {strides = array<i32>} : memref<16x128xf32, #tpu.memory_space<vmem>>, vector<16x128xf32>,
    return
  }
  func.func @transform_0(%arg0: i32) -> (i32, i32) {
    %c0_i32 = arith.constant 0 : i32
    %c0_i32_0 = arith.constant 0 : i32
    %c0_i32_1 = arith.constant 0 : i32
    return %c0_i32, %c0_i32_0 : i32, i32
  }
  func.func @transform_1(%arg0: i32) -> (i32, i32) {
    %c0_i32 = arith.constant 0 : i32
    %c0_i32_0 = arith.constant 0 : i32
    %c0_i32_1 = arith.constant 0 : i32
    return %c0_i32, %c0_i32_0 : i32, i32
  }
  func.func @transform_2(%arg0: i32) -> (i32, i32) {
    %c0_i32 = arith.constant 0 : i32
    %c0_i32_0 = arith.constant 0 : i32
    %c0_i32_1 = arith.constant 0 : i32
    return %c0_i32, %c0_i32_0 : i32, i32
  }
  func.func @transform_3(%arg0: i32) -> (i32, i32) {
    %c0_i32 = arith.constant 0 : i32
    %c0_i32_0 = arith.constant 0 : i32
    %c0_i32_1 = arith.constant 0 : i32
    return %c0_i32, %c0_i32_0 : i32, i32
  }
  func.func @transform_4(%arg0: i32) -> (i32, i32) {
    %c0_i32 = arith.constant 0 : i32
    %c0_i32_0 = arith.constant 0 : i32
    %c0_i32_1 = arith.constant 0 : i32
    return %c0_i32, %c0_i32_0 : i32, i32
  }
  func.func @transform_5(%arg0: i32) -> (i32, i32) {
    %c0_i32 = arith.constant 0 : i32
    %c0_i32_0 = arith.constant 0 : i32
    %c0_i32_1 = arith.constant 0 : i32
    return %c0_i32, %c0_i32_0 : i32, i32
  }
  func.func @transform_6(%arg0: i32) -> (i32, i32) {
    %c0_i32 = arith.constant 0 : i32
    %c0_i32_0 = arith.constant 0 : i32
    %c0_i32_1 = arith.constant 0 : i32
    return %c0_i32, %c0_i32_0 : i32, i32
  }
  func.func @transform_7(%arg0: i32) -> (i32, i32) {
    %c0_i32 = arith.constant 0 : i32
    %c0_i32_0 = arith.constant 0 : i32
    %c0_i32_1 = arith.constant 0 : i32
    return %c0_i32, %c0_i32_0 : i32, i32
  }
  func.func @transform_8(%arg0: i32) -> (i32, i32) {
    %c0_i32 = arith.constant 0 : i32
    %c0_i32_0 = arith.constant 0 : i32
    %c0_i32_1 = arith.constant 0 : i32
    return %c0_i32, %c0_i32_0 : i32, i32
  }
  func.func @transform_9(%arg0: i32) -> (i32, i32) {
    %c0_i32 = arith.constant 0 : i32
    %c0_i32_0 = arith.constant 0 : i32
    %c0_i32_1 = arith.constant 0 : i32
    return %c0_i32, %c0_i32_0 : i32, i32
  }
}

</mosaic_0001>

<bundles_post_ra>
// kernel: qreps_forward.4
= control target key start
LH: loop header
LB: loop body
LE: loop exit
PB: predicated region body
PF: predicated region fallthrough
CT: control target
= control target key end

     0   :  { %s2021_s12 = smov 0   ;;  %s2291_s0 = inlined_call_operand.vmem [shape: bf16[1024,256], index: 0, kind: input, shape index: {}]   ;;  %s2292_s1 = inlined_call_operand.vmem [shape: bf16[256,128], index: 1, kind: input, shape index: {}]   ;;  %s2293_s2 = inlined_call_operand.vmem [shape: f32[1,128], index: 2, kind: input, shape index: {}]   ;;  %s2294_s3 = inlined_call_operand.vmem [shape: bf16[1024,128], index: 3, kind: output, shape index: {}]  }
   0x1 LB: > { %s1426_s13 = sadd.s32 4294967295, %s1998_s12   ;;  %p1430_p0 = scmp.ge.s32.totalorder %s1998_s12, 1  ;;  %s1998_s12 = sphi %s2021_s12, %s13_s12  }
   0x2   : > { %p139_p1 = scmp.lt.s32.totalorder %s1998_s12, 3 }
   0x4   : > { %p140_p2 = pnand %p1430_p0, %p139_p1 }
   0x5   : > { %s1431_s16 = sshll.u32 (!%p140_p2), %s1426_s13, 6 }
   0x6   : > { %143 = sbr.rel (%p140_p2) target bundleno = 400 (0x190), region = 32  ;;  %p165_p3 = scmp.lt.s32.totalorder (!%p140_p2), %s1431_s16, 127 }
   0xb   : > { %v1880_v0 = vld [vmem:[%s2292_s1 + $0x38] sm:$0xff]   ;;  %v2000_v1 = vmov 0   ;;  %v1881_v2 = vld [vmem:[%s2292_s1 + $0x30] sm:$0xff]   ;;  %v1882_v3 = vld [vmem:[%s2292_s1 + $0x28] sm:$0xff]   ;;  %s2296_s16 = smov (!%p165_p3, %s1431_s16), 127 }
   0xc   : > { %697 = vmatprep.subr.bf16.mxu0 %v2000_v1  ;;  %1839 = vmatprep.subr.bf16.mxu1 %v2000_v1  ;;  %v1883_v4 = vld [vmem:[%s2292_s1 + $0x20] sm:$0xff]   ;;  %s1583_s23 = sshll.u32 %s2296_s16, 3  ;;  %v1884_v5 = vld [vmem:[%s2292_s1 + $0x18] sm:$0xff]   ;;  %v1885_v7 = vld [vmem:[%s2292_s1 + $0x10] sm:$0xff]   ;;  %s1435_s29 = sshll.u32 %s2296_s16, 2 }
   0xd   : > { %698 = vmatpush1.bf16.msra.mxu0 %v1880_v0  ;;  %1855 = vmatpush1.bf16.msra.mxu1 %v1880_v0  ;;  %s2058_s28 = scalar_lea.vmem %s2291_s0, %s1583_s23  ;;  %v1886_v9 = vld [vmem:[%s2292_s1 + $0x8] sm:$0xff]   ;;  %v1887_v10 = vld [vmem:[%s2292_s1] sm:$0xff]   ;;  %v1888_v11 = vld [vmem:[%s2292_s1 + $0x78] sm:$0xff]   ;;  %s2194_s4 = scalar_lea.vmem %s2294_s3, %s1435_s29 }
   0xe   : > { %699 = vmatprep.subr.bf16.mxu0 %v2000_v1  ;;  %1840 = vmatprep.subr.bf16.mxu1 %v2000_v1  ;;  %v1898_v6 = vld [vmem:[%s2058_s28 + $0x4] ss:$8 sps:$4 sm:$0xff]   ;;  %v1889_v12 = vld [vmem:[%s2292_s1 + $0x70] sm:$0xff]   ;;  %v1892_v15 = vld [vmem:[%s2292_s1 + $0x58] sm:$0xff]  }
   0xf   : > { %v1901_v8 = vld [vmem:[%s2058_s28 + $0x104] ss:$8 sps:$4 sm:$0xff]   ;;  %729 = vmatprep.mubr.bf16.mxu0 %v1898_v6  ;;  %v1893_v16 = vld [vmem:[%s2292_s1 + $0x50] sm:$0xff]   ;;  %v1896_v19 = vld [vmem:[%s2058_s28] ss:$8 sps:$4 sm:$0xff]  }
  0x10   : > { %857 = vmatprep.mubr.bf16.mxu1 %v1901_v8  ;;  %v1890_v13 = vld [vmem:[%s2292_s1 + $0x68] sm:$0xff]   ;;  %v1891_v14 = vld [vmem:[%s2292_s1 + $0x60] sm:$0xff]   ;;  %v1902_v21 = vld [vmem:[%s2058_s28 + $0x14] ss:$8 sps:$4 sm:$0xff]  }
  0x11   : > { %700 = vmatpush1.bf16.msra.mxu0 %v1881_v2  ;;  %1856 = vmatpush1.bf16.msra.mxu1 %v1881_v2  ;;  %v1894_v17 = vld [vmem:[%s2292_s1 + $0x48] sm:$0xff]   ;;  %v1895_v18 = vld [vmem:[%s2292_s1 + $0x40] sm:$0xff]   ;;  %v1904_v22 = vld [vmem:[%s2058_s28 + $0x114] ss:$8 sps:$4 sm:$0xff]  }
  0x12   : > { %701 = vmatprep.subr.bf16.mxu0 %v2000_v1  ;;  %1841 = vmatprep.subr.bf16.mxu1 %v2000_v1  ;;  %v1899_v20 = vld [vmem:[%s2058_s28 + $0x100] ss:$8 sps:$4 sm:$0xff]   ;;  %v1906_v23 = vld [vmem:[%s2058_s28 + $0x10] ss:$8 sps:$4 sm:$0xff]   ;;  %v1908_v25 = vld [vmem:[%s2058_s28 + $0x24] ss:$8 sps:$4 sm:$0xff]  }
  0x13   : > { %v1907_v24 = vld [vmem:[%s2058_s28 + $0x110] ss:$8 sps:$4 sm:$0xff]   ;;  %v1910_v26 = vld [vmem:[%s2058_s28 + $0x124] ss:$8 sps:$4 sm:$0xff]   ;;  %v1912_v27 = vld [vmem:[%s2058_s28 + $0x20] ss:$8 sps:$4 sm:$0xff]  }
  0x14   : > { %v1913_v28 = vld [vmem:[%s2058_s28 + $0x120] ss:$8 sps:$4 sm:$0xff]   ;;  %v1914_v29 = vld [vmem:[%s2058_s28 + $0x34] ss:$8 sps:$4 sm:$0xff]   ;;  %v1918_v31 = vld [vmem:[%s2058_s28 + $0x30] ss:$8 sps:$4 sm:$0xff]  }
  0x15   : > { %702 = vmatpush1.bf16.msra.mxu0 %v1882_v3  ;;  %1857 = vmatpush1.bf16.msra.mxu1 %v1882_v3  ;;  %v1916_v30 = vld [vmem:[%s2058_s28 + $0x134] ss:$8 sps:$4 sm:$0xff]   ;;  %v1919_v32 = vld [vmem:[%s2058_s28 + $0x130] ss:$8 sps:$4 sm:$0xff]   ;;  %v1920_v33 = vld [vmem:[%s2058_s28 + $0x44] ss:$8 sps:$4 sm:$0xff]  }
  0x16   : > { %703 = vmatprep.subr.bf16.mxu0 %v2000_v1  ;;  %1842 = vmatprep.subr.bf16.mxu1 %v2000_v1  ;;  %v1922_v34 = vld [vmem:[%s2058_s28 + $0x144] ss:$8 sps:$4 sm:$0xff]   ;;  %v1924_v35 = vld [vmem:[%s2058_s28 + $0x40] ss:$8 sps:$4 sm:$0xff]   ;;  %v1926_v37 = vld [vmem:[%s2058_s28 + $0x54] ss:$8 sps:$4 sm:$0xff]  }
  0x17   : > { %v1925_v36 = vld [vmem:[%s2058_s28 + $0x140] ss:$8 sps:$4 sm:$0xff]   ;;  %v1928_v38 = vld [vmem:[%s2058_s28 + $0x154] ss:$8 sps:$4 sm:$0xff]   ;;  %v1930_v39 = vld [vmem:[%s2058_s28 + $0x50] ss:$8 sps:$4 sm:$0xff]  }
  0x18   : > { %v1931_v40 = vld [vmem:[%s2058_s28 + $0x150] ss:$8 sps:$4 sm:$0xff]   ;;  %v1932_v41 = vld [vmem:[%s2058_s28 + $0x64] ss:$8 sps:$4 sm:$0xff]   ;;  %v1936_v43 = vld [vmem:[%s2058_s28 + $0x60] ss:$8 sps:$4 sm:$0xff]  }
  0x19   : > { %704 = vmatpush1.bf16.msra.mxu0 %v1883_v4  ;;  %1858 = vmatpush1.bf16.msra.mxu1 %v1883_v4  ;;  %v1934_v42 = vld [vmem:[%s2058_s28 + $0x164] ss:$8 sps:$4 sm:$0xff]   ;;  %v1937_v44 = vld [vmem:[%s2058_s28 + $0x160] ss:$8 sps:$4 sm:$0xff]   ;;  %v1938_v45 = vld [vmem:[%s2058_s28 + $0x74] ss:$8 sps:$4 sm:$0xff]  }
  0x1a   : > { %705 = vmatprep.subr.bf16.mxu0 %v2000_v1  ;;  %1843 = vmatprep.subr.bf16.mxu1 %v2000_v1  ;;  %v1940_v46 = vld [vmem:[%s2058_s28 + $0x174] ss:$8 sps:$4 sm:$0xff]   ;;  %v1942_v47 = vld [vmem:[%s2058_s28 + $0x70] ss:$8 sps:$4 sm:$0xff]   ;;  %v1944_v49 = vld [vmem:[%s2058_s28 + $0x84] ss:$8 sps:$4 sm:$0xff]  }
  0x1b   : > { %v1943_v48 = vld [vmem:[%s2058_s28 + $0x170] ss:$8 sps:$4 sm:$0xff]   ;;  %v1946_v50 = vld [vmem:[%s2058_s28 + $0x184] ss:$8 sps:$4 sm:$0xff]   ;;  %v1948_v51 = vld [vmem:[%s2058_s28 + $0x80] ss:$8 sps:$4 sm:$0xff]  }
  0x1c   : > { %v1949_v52 = vld [vmem:[%s2058_s28 + $0x180] ss:$8 sps:$4 sm:$0xff]   ;;  %v1950_v53 = vld [vmem:[%s2058_s28 + $0x94] ss:$8 sps:$4 sm:$0xff]   ;;  %v1954_v55 = vld [vmem:[%s2058_s28 + $0x90] ss:$8 sps:$4 sm:$0xff]  }
  0x1d   : > { %706 = vmatpush1.bf16.msra.mxu0 %v1884_v5  ;;  %1859 = vmatpush1.bf16.msra.mxu1 %v1884_v5  ;;  %v1952_v54 = vld [vmem:[%s2058_s28 + $0x194] ss:$8 sps:$4 sm:$0xff]   ;;  %v1955_v56 = vld [vmem:[%s2058_s28 + $0x190] ss:$8 sps:$4 sm:$0xff]   ;;  %v1956_v57 = vld [vmem:[%s2058_s28 + $0xa4] ss:$8 sps:$4 sm:$0xff]  }
  0x1e   : > { %707 = vmatprep.subr.bf16.mxu0 %v2000_v1  ;;  %1844 = vmatprep.subr.bf16.mxu1 %v2000_v1  ;;  %v1958_v58 = vld [vmem:[%s2058_s28 + $0x1a4] ss:$8 sps:$4 sm:$0xff]   ;;  %v1960_v59 = vld [vmem:[%s2058_s28 + $0xa0] ss:$8 sps:$4 sm:$0xff]   ;;  %v1962_v61 = vld [vmem:[%s2058_s28 + $0xb4] ss:$8 sps:$4 sm:$0xff]  }
  0x1f   : > { %v1961_v60 = vld [vmem:[%s2058_s28 + $0x1a0] ss:$8 sps:$4 sm:$0xff]   ;;  %v1964_v62 = vld [vmem:[%s2058_s28 + $0x1b4] ss:$8 sps:$4 sm:$0xff]   ;;  %v1966_v63 = vld [vmem:[%s2058_s28 + $0xb0] ss:$8 sps:$4 sm:$0xff]  }
  0x20   : > { %v1967_v0 = vld [vmem:[%s2058_s28 + $0x1b0] ss:$8 sps:$4 sm:$0xff]   ;;  %v1970_v2 = vld [vmem:[%s2058_s28 + $0x1c4] ss:$8 sps:$4 sm:$0xff]   ;;  %v1972_v3 = vld [vmem:[%s2058_s28 + $0xc0] ss:$8 sps:$4 sm:$0xff]  }
  0x21   : > { %708 = vmatpush1.bf16.msra.mxu0 %v1885_v7  ;;  %1860 = vmatpush1.bf16.msra.mxu1 %v1885_v7  ;;  %v1973_v4 = vld [vmem:[%s2058_s28 + $0x1c0] ss:$8 sps:$4 sm:$0xff]   ;;  %v1974_v5 = vld [vmem:[%s2058_s28 + $0xd4] ss:$8 sps:$4 sm:$0xff]   ;;  %v1978_v7 = vld [vmem:[%s2058_s28 + $0xd0] ss:$8 sps:$4 sm:$0xff]  }
  0x22   : > { %709 = vmatprep.subr.bf16.mxu0 %v2000_v1  ;;  %1845 = vmatprep.subr.bf16.mxu1 %v2000_v1  ;;  %v1976_v6 = vld [vmem:[%s2058_s28 + $0x1d4] ss:$8 sps:$4 sm:$0xff]   ;;  %v1979_v8 = vld [vmem:[%s2058_s28 + $0x1d0] ss:$8 sps:$4 sm:$0xff]  }
  0x25   : > { %710 = vmatpush1.bf16.msra.mxu0 %v1886_v9  ;;  %1861 = vmatpush1.bf16.msra.mxu1 %v1886_v9  ;;  %v1980_v9 = vld [vmem:[%s2058_s28 + $0xe4] ss:$8 sps:$4 sm:$0xff]  }
  0x26   : > { %711 = vmatprep.subr.bf16.mxu0 %v2000_v1  ;;  %1846 = vmatprep.subr.bf16.mxu1 %v2000_v1 }
  0x29   : > { %712 = vmatpush1.bf16.msra.mxu0 %v1887_v10  ;;  %1862 = vmatpush1.bf16.msra.mxu1 %v1887_v10  ;;  %v1982_v10 = vld [vmem:[%s2058_s28 + $0x1e4] ss:$8 sps:$4 sm:$0xff]  }
  0x2a   : > { %713 = vmatprep.subr.bf16.mxu0 %v2000_v1  ;;  %1847 = vmatprep.subr.bf16.mxu1 %v2000_v1 }
  0x2d   : > { %714 = vmatpush2.bf16.msra.mxu0 %v1888_v11  ;;  %1863 = vmatpush2.bf16.msra.mxu1 %v1888_v11  ;;  %v1984_v11 = vld [vmem:[%s2058_s28 + $0xe0] ss:$8 sps:$4 sm:$0xff]  }
  0x2e   : > { %715 = vmatprep.subr.bf16.mxu0 %v2000_v1  ;;  %1848 = vmatprep.subr.bf16.mxu1 %v2000_v1 }
  0x31   : > { %716 = vmatpush2.bf16.msra.mxu0 %v1889_v12  ;;  %1864 = vmatpush2.bf16.msra.mxu1 %v1889_v12  ;;  %v1985_v12 = vld [vmem:[%s2058_s28 + $0x1e0] ss:$8 sps:$4 sm:$0xff]  }
  0x32   : > { %717 = vmatprep.subr.bf16.mxu0 %v2000_v1  ;;  %1849 = vmatprep.subr.bf16.mxu1 %v2000_v1 }
  0x35   : > { %718 = vmatpush2.bf16.msra.mxu0 %v1890_v13  ;;  %1865 = vmatpush2.bf16.msra.mxu1 %v1890_v13  ;;  %v1986_v13 = vld [vmem:[%s2058_s28 + $0xf4] ss:$8 sps:$4 sm:$0xff]  }
  0x36   : > { %719 = vmatprep.subr.bf16.mxu0 %v2000_v1  ;;  %1850 = vmatprep.subr.bf16.mxu1 %v2000_v1 }
  0x39   : > { %720 = vmatpush2.bf16.msra.mxu0 %v1891_v14  ;;  %1866 = vmatpush2.bf16.msra.mxu1 %v1891_v14  ;;  %v1988_v14 = vld [vmem:[%s2058_s28 + $0x1f4] ss:$8 sps:$4 sm:$0xff]  }
  0x3a   : > { %721 = vmatprep.subr.bf16.mxu0 %v2000_v1  ;;  %1851 = vmatprep.subr.bf16.mxu1 %v2000_v1 }
  0x3d   : > { %722 = vmatpush2.bf16.msra.mxu0 %v1892_v15  ;;  %1867 = vmatpush2.bf16.msra.mxu1 %v1892_v15  ;;  %v1990_v15 = vld [vmem:[%s2058_s28 + $0xf0] ss:$8 sps:$4 sm:$0xff]  }
  0x3e   : > { %723 = vmatprep.subr.bf16.mxu0 %v2000_v1  ;;  %1852 = vmatprep.subr.bf16.mxu1 %v2000_v1 }
  0x41   : > { %724 = vmatpush2.bf16.msra.mxu0 %v1893_v16  ;;  %1868 = vmatpush2.bf16.msra.mxu1 %v1893_v16  ;;  %v1991_v16 = vld [vmem:[%s2058_s28 + $0x1f0] ss:$8 sps:$4 sm:$0xff]  }
  0x42   : > { %725 = vmatprep.subr.bf16.mxu0 %v2000_v1  ;;  %1853 = vmatprep.subr.bf16.mxu1 %v2000_v1 }
  0x45   : > { %726 = vmatpush2.bf16.msra.mxu0 %v1894_v17  ;;  %1869 = vmatpush2.bf16.msra.mxu1 %v1894_v17  ;;  %v2184_v17 = vld [vmem:[%s2293_s2] ss:$0 sm:$0xff] }
  0x46   : > { %727 = vmatprep.subr.bf16.mxu0 %v2000_v1  ;;  %1854 = vmatprep.subr.bf16.mxu1 %v2000_v1  ;;  %v1968_v1 = vld [vmem:[%s2058_s28 + $0xc4] ss:$8 sps:$4 sm:$0xff]  }
  0x49   : > { %728 = vmatpush2.bf16.msra.mxu0 %v1895_v18  ;;  %1870 = vmatpush2.bf16.msra.mxu1 %v1895_v18 }
  0x4c   : > { %730 = vmatmul.mubr.bf16.vlgmr.msra.gmra.mxu0 %v1896_v19  ;;  %858 = vmatmul.mubr.bf16.vlgmr.msra.gmra.mxu1 %v1899_v20 }
  0x4d   : > { %737 = vmatprep.mubr.bf16.mxu0 %v1902_v21  ;;  %865 = vmatprep.mubr.bf16.mxu1 %v1904_v22 }
  0x54   : > { %738 = vmatmul.mubr.bf16.gmra.mxu0 %v1906_v23  ;;  %866 = vmatmul.mubr.bf16.gmra.mxu1 %v1907_v24 }
  0x55   : > { %745 = vmatprep.mubr.bf16.mxu0 %v1908_v25  ;;  %873 = vmatprep.mubr.bf16.mxu1 %v1910_v26 }
  0x5c   : > { %746 = vmatmul.mubr.bf16.gmra.mxu0 %v1912_v27  ;;  %874 = vmatmul.mubr.bf16.gmra.mxu1 %v1913_v28 }
  0x5d   : > { %753 = vmatprep.mubr.bf16.mxu0 %v1914_v29  ;;  %881 = vmatprep.mubr.bf16.mxu1 %v1916_v30 }
  0x64   : > { %754 = vmatmul.mubr.bf16.gmra.mxu0 %v1918_v31  ;;  %882 = vmatmul.mubr.bf16.gmra.mxu1 %v1919_v32 }
  0x65   : > { %761 = vmatprep.mubr.bf16.mxu0 %v1920_v33  ;;  %889 = vmatprep.mubr.bf16.mxu1 %v1922_v34 }
  0x6c   : > { %762 = vmatmul.mubr.bf16.gmra.mxu0 %v1924_v35  ;;  %890 = vmatmul.mubr.bf16.gmra.mxu1 %v1925_v36 }
  0x6d   : > { %769 = vmatprep.mubr.bf16.mxu0 %v1926_v37  ;;  %897 = vmatprep.mubr.bf16.mxu1 %v1928_v38 }
  0x74   : > { %770 = vmatmul.mubr.bf16.gmra.mxu0 %v1930_v39  ;;  %898 = vmatmul.mubr.bf16.gmra.mxu1 %v1931_v40 }
  0x75   : > { %777 = vmatprep.mubr.bf16.mxu0 %v1932_v41  ;;  %905 = vmatprep.mubr.bf16.mxu1 %v1934_v42 }
  0x7c   : > { %778 = vmatmul.mubr.bf16.gmra.mxu0 %v1936_v43  ;;  %906 = vmatmul.mubr.bf16.gmra.mxu1 %v1937_v44 }
  0x7d   : > { %785 = vmatprep.mubr.bf16.mxu0 %v1938_v45  ;;  %913 = vmatprep.mubr.bf16.mxu1 %v1940_v46 }
  0x84   : > { %786 = vmatmul.mubr.bf16.gmra.mxu0 %v1942_v47  ;;  %914 = vmatmul.mubr.bf16.gmra.mxu1 %v1943_v48 }
  0x85   : > { %793 = vmatprep.mubr.bf16.mxu0 %v1944_v49  ;;  %921 = vmatprep.mubr.bf16.mxu1 %v1946_v50 }
  0x8c   : > { %794 = vmatmul.mubr.bf16.gmra.mxu0 %v1948_v51  ;;  %922 = vmatmul.mubr.bf16.gmra.mxu1 %v1949_v52 }
  0x8d   : > { %801 = vmatprep.mubr.bf16.mxu0 %v1950_v53  ;;  %929 = vmatprep.mubr.bf16.mxu1 %v1952_v54 }
  0x94   : > { %802 = vmatmul.mubr.bf16.gmra.mxu0 %v1954_v55  ;;  %930 = vmatmul.mubr.bf16.gmra.mxu1 %v1955_v56 }
  0x95   : > { %809 = vmatprep.mubr.bf16.mxu0 %v1956_v57  ;;  %937 = vmatprep.mubr.bf16.mxu1 %v1958_v58 }
  0x9c   : > { %810 = vmatmul.mubr.bf16.gmra.mxu0 %v1960_v59  ;;  %938 = vmatmul.mubr.bf16.gmra.mxu1 %v1961_v60 }
  0x9d   : > { %817 = vmatprep.mubr.bf16.mxu0 %v1962_v61  ;;  %945 = vmatprep.mubr.bf16.mxu1 %v1964_v62 }
  0xa4   : > { %818 = vmatmul.mubr.bf16.gmra.mxu0 %v1966_v63  ;;  %946 = vmatmul.mubr.bf16.gmra.mxu1 %v1967_v0 }
  0xa5   : > { %825 = vmatprep.mubr.bf16.mxu0 %v1968_v1  ;;  %953 = vmatprep.mubr.bf16.mxu1 %v1970_v2 }
  0xac   : > { %826 = vmatmul.mubr.bf16.gmra.mxu0 %v1972_v3  ;;  %954 = vmatmul.mubr.bf16.gmra.mxu1 %v1973_v4 }
  0xad   : > { %833 = vmatprep.mubr.bf16.mxu0 %v1974_v5  ;;  %961 = vmatprep.mubr.bf16.mxu1 %v1976_v6 }
  0xb4   : > { %834 = vmatmul.mubr.bf16.gmra.mxu0 %v1978_v7  ;;  %962 = vmatmul.mubr.bf16.gmra.mxu1 %v1979_v8 }
  0xb5   : > { %841 = vmatprep.mubr.bf16.mxu0 %v1980_v9  ;;  %969 = vmatprep.mubr.bf16.mxu1 %v1982_v10 }
  0xbc   : > { %842 = vmatmul.mubr.bf16.gmra.mxu0 %v1984_v11  ;;  %970 = vmatmul.mubr.bf16.gmra.mxu1 %v1985_v12 }
  0xbd   : > { %849 = vmatprep.mubr.bf16.mxu0 %v1986_v13  ;;  %977 = vmatprep.mubr.bf16.mxu1 %v1988_v14 }
  0xc4   : > { %850 = vmatmul.mubr.bf16.gmra.mxu0 %v1990_v15  ;;  %978 = vmatmul.mubr.bf16.gmra.mxu1 %v1991_v16 }
 0x10c   : > { %v731_v18 = vpop.f32.mrf.mxu0  ;;  %v859_v19 = vpop.f32.mrf.mxu1 }
 0x10d   : > { %v732_v22 = vadd.f32 %v2184_v17, %v731_v18  ;;  %v860_v23 = vadd.f32 %v2184_v17, %v859_v19 }
 0x10e   : > { %v733_v20 = vpop.f32.mrf.mxu0  ;;  %v861_v21 = vpop.f32.mrf.mxu1 }
 0x10f   : > { %v986_v30 = vmax.f32 %v732_v22, 0.0  ;;  %v1018_v31 = vmax.f32 %v860_v23, 0.0 }
 0x110   : > { %v734_v24 = vpop.f32.mrf.mxu0  ;;  %v862_v25 = vpop.f32.mrf.mxu1 }
 0x111   : > { %v735_v26 = vadd.f32 %v2184_v17, %v734_v24  ;;  %v863_v27 = vadd.f32 %v2184_v17, %v862_v25 }
 0x112   : > { %v736_v28 = vpop.f32.mrf.mxu0  ;;  %v864_v29 = vpop.f32.mrf.mxu1 }
 0x113   : > { %v987_v32 = vmax.f32 %v735_v26, 0.0  ;;  %v1019_v33 = vmax.f32 %v863_v27, 0.0 }
 0x114   : > { %v739_v34 = vpop.f32.mrf.mxu0  ;;  %v867_v35 = vpop.f32.mrf.mxu1 }
 0x115   : > { %v1651_v36 = vpack.c.bf16 %v987_v32, %v986_v30  ;;  %v1731_v37 = vpack.c.bf16 %v1019_v33, %v1018_v31  ;;  %v740_v40 = vadd.f32 %v2184_v17, %v739_v34  ;;  %v868_v41 = vadd.f32 %v2184_v17, %v867_v35 }
 0x116   : > { %v741_v38 = vpop.f32.mrf.mxu0  ;;  %v869_v39 = vpop.f32.mrf.mxu1 }
 0x117   : > { %1652 = vst [vmem:[%s2194_s4] sm:$0xff] %v1651_v36   ;;  %1823 = vst [vmem:[%s2194_s4 + $0x80] sm:$0xff] %v1731_v37   ;;  %v988_v48 = vmax.f32 %v740_v40, 0.0  ;;  %v1020_v49 = vmax.f32 %v868_v41, 0.0 }
 0x118   : > { %v742_v42 = vpop.f32.mrf.mxu0  ;;  %v870_v43 = vpop.f32.mrf.mxu1 }
 0x119   : > { %v743_v44 = vadd.f32 %v2184_v17, %v742_v42  ;;  %v871_v45 = vadd.f32 %v2184_v17, %v870_v43 }
 0x11a   : > { %v744_v46 = vpop.f32.mrf.mxu0  ;;  %v872_v47 = vpop.f32.mrf.mxu1 }
 0x11b   : > { %v989_v50 = vmax.f32 %v743_v44, 0.0  ;;  %v1021_v51 = vmax.f32 %v871_v45, 0.0 }
 0x11c   : > { %v747_v52 = vpop.f32.mrf.mxu0  ;;  %v875_v53 = vpop.f32.mrf.mxu1 }
 0x11d   : > { %v1656_v54 = vpack.c.bf16 %v989_v50, %v988_v48  ;;  %v1736_v55 = vpack.c.bf16 %v1021_v51, %v1020_v49  ;;  %v748_v58 = vadd.f32 %v2184_v17, %v747_v52  ;;  %v876_v59 = vadd.f32 %v2184_v17, %v875_v53 }
 0x11e   : > { %v749_v56 = vpop.f32.mrf.mxu0  ;;  %v877_v57 = vpop.f32.mrf.mxu1 }
 0x11f   : > { %1808 = vst [vmem:[%s2194_s4 + $0x8] sm:$0xff] %v1656_v54   ;;  %1824 = vst [vmem:[%s2194_s4 + $0x88] sm:$0xff] %v1736_v55   ;;  %v990_v2 = vmax.f32 %v748_v58, 0.0  ;;  %v1022_v3 = vmax.f32 %v876_v59, 0.0 }
 0x120   : > { %v750_v60 = vpop.f32.mrf.mxu0  ;;  %v878_v61 = vpop.f32.mrf.mxu1 }
 0x121   : > { %v751_v62 = vadd.f32 %v2184_v17, %v750_v60  ;;  %v879_v63 = vadd.f32 %v2184_v17, %v878_v61 }
 0x122   : > { %v752_v0 = vpop.f32.mrf.mxu0  ;;  %v880_v1 = vpop.f32.mrf.mxu1 }
 0x123   : > { %v991_v4 = vmax.f32 %v751_v62, 0.0  ;;  %v1023_v5 = vmax.f32 %v879_v63, 0.0 }
 0x124   : > { %v755_v6 = vpop.f32.mrf.mxu0  ;;  %v883_v7 = vpop.f32.mrf.mxu1 }
 0x125   : > { %v1661_v8 = vpack.c.bf16 %v991_v4, %v990_v2  ;;  %v1741_v9 = vpack.c.bf16 %v1023_v5, %v1022_v3  ;;  %v756_v12 = vadd.f32 %v2184_v17, %v755_v6  ;;  %v884_v13 = vadd.f32 %v2184_v17, %v883_v7 }
 0x126   : > { %v757_v10 = vpop.f32.mrf.mxu0  ;;  %v885_v11 = vpop.f32.mrf.mxu1 }
 0x127   : > { %1809 = vst [vmem:[%s2194_s4 + $0x10] sm:$0xff] %v1661_v8   ;;  %1825 = vst [vmem:[%s2194_s4 + $0x90] sm:$0xff] %v1741_v9   ;;  %v992_v21 = vmax.f32 %v756_v12, 0.0  ;;  %v1024_v22 = vmax.f32 %v884_v13, 0.0 }
 0x128   : > { %v758_v14 = vpop.f32.mrf.mxu0  ;;  %v886_v15 = vpop.f32.mrf.mxu1 }
 0x129   : > { %v759_v16 = vadd.f32 %v2184_v17, %v758_v14  ;;  %v887_v18 = vadd.f32 %v2184_v17, %v886_v15 }
 0x12a   : > { %v760_v19 = vpop.f32.mrf.mxu0  ;;  %v888_v20 = vpop.f32.mrf.mxu1 }
 0x12b   : > { %v993_v23 = vmax.f32 %v759_v16, 0.0  ;;  %v1025_v24 = vmax.f32 %v887_v18, 0.0 }
 0x12c   : > { %v763_v25 = vpop.f32.mrf.mxu0  ;;  %v891_v26 = vpop.f32.mrf.mxu1 }
 0x12d   : > { %v1666_v27 = vpack.c.bf16 %v993_v23, %v992_v21  ;;  %v1746_v28 = vpack.c.bf16 %v1025_v24, %v1024_v22  ;;  %v764_v31 = vadd.f32 %v2184_v17, %v763_v25  ;;  %v892_v32 = vadd.f32 %v2184_v17, %v891_v26 }
 0x12e   : > { %v765_v29 = vpop.f32.mrf.mxu0  ;;  %v893_v30 = vpop.f32.mrf.mxu1 }
 0x12f   : > { %1810 = vst [vmem:[%s2194_s4 + $0x18] sm:$0xff] %v1666_v27   ;;  %1826 = vst [vmem:[%s2194_s4 + $0x98] sm:$0xff] %v1746_v28   ;;  %v994_v39 = vmax.f32 %v764_v31, 0.0  ;;  %v1026_v40 = vmax.f32 %v892_v32, 0.0 }
 0x130   : > { %v766_v33 = vpop.f32.mrf.mxu0  ;;  %v894_v34 = vpop.f32.mrf.mxu1 }
 0x131   : > { %v767_v35 = vadd.f32 %v2184_v17, %v766_v33  ;;  %v895_v36 = vadd.f32 %v2184_v17, %v894_v34 }
 0x132   : > { %v768_v37 = vpop.f32.mrf.mxu0  ;;  %v896_v38 = vpop.f32.mrf.mxu1 }
 0x133   : > { %v995_v41 = vmax.f32 %v767_v35, 0.0  ;;  %v1027_v42 = vmax.f32 %v895_v36, 0.0 }
 0x134   : > { %v771_v43 = vpop.f32.mrf.mxu0  ;;  %v899_v44 = vpop.f32.mrf.mxu1 }
 0x135   : > { %v1671_v45 = vpack.c.bf16 %v995_v41, %v994_v39  ;;  %v1751_v46 = vpack.c.bf16 %v1027_v42, %v1026_v40  ;;  %v772_v49 = vadd.f32 %v2184_v17, %v771_v43  ;;  %v900_v50 = vadd.f32 %v2184_v17, %v899_v44 }
 0x136   : > { %v773_v47 = vpop.f32.mrf.mxu0  ;;  %v901_v48 = vpop.f32.mrf.mxu1 }
 0x137   : > { %1811 = vst [vmem:[%s2194_s4 + $0x20] sm:$0xff] %v1671_v45   ;;  %1827 = vst [vmem:[%s2194_s4 + $0xa0] sm:$0xff] %v1751_v46   ;;  %v996_v57 = vmax.f32 %v772_v49, 0.0  ;;  %v1028_v58 = vmax.f32 %v900_v50, 0.0 }
 0x138   : > { %v774_v51 = vpop.f32.mrf.mxu0  ;;  %v902_v52 = vpop.f32.mrf.mxu1 }
 0x139   : > { %v775_v53 = vadd.f32 %v2184_v17, %v774_v51  ;;  %v903_v54 = vadd.f32 %v2184_v17, %v902_v52 }
 0x13a   : > { %v776_v55 = vpop.f32.mrf.mxu0  ;;  %v904_v56 = vpop.f32.mrf.mxu1 }
 0x13b   : > { %v997_v59 = vmax.f32 %v775_v53, 0.0  ;;  %v1029_v60 = vmax.f32 %v903_v54, 0.0 }
 0x13c   : > { %v779_v61 = vpop.f32.mrf.mxu0  ;;  %v907_v62 = vpop.f32.mrf.mxu1 }
 0x13d   : > { %v1676_v63 = vpack.c.bf16 %v997_v59, %v996_v57  ;;  %v1756_v0 = vpack.c.bf16 %v1029_v60, %v1028_v58  ;;  %v780_v3 = vadd.f32 %v2184_v17, %v779_v61  ;;  %v908_v4 = vadd.f32 %v2184_v17, %v907_v62 }
 0x13e   : > { %v781_v1 = vpop.f32.mrf.mxu0  ;;  %v909_v2 = vpop.f32.mrf.mxu1 }
 0x13f   : > { %1812 = vst [vmem:[%s2194_s4 + $0x28] sm:$0xff] %v1676_v63   ;;  %1828 = vst [vmem:[%s2194_s4 + $0xa8] sm:$0xff] %v1756_v0   ;;  %v998_v11 = vmax.f32 %v780_v3, 0.0  ;;  %v1030_v12 = vmax.f32 %v908_v4, 0.0 }
 0x140   : > { %v782_v5 = vpop.f32.mrf.mxu0  ;;  %v910_v6 = vpop.f32.mrf.mxu1 }
 0x141   : > { %v783_v7 = vadd.f32 %v2184_v17, %v782_v5  ;;  %v911_v8 = vadd.f32 %v2184_v17, %v910_v6 }
 0x142   : > { %v784_v9 = vpop.f32.mrf.mxu0  ;;  %v912_v10 = vpop.f32.mrf.mxu1 }
 0x143   : > { %v999_v13 = vmax.f32 %v783_v7, 0.0  ;;  %v1031_v14 = vmax.f32 %v911_v8, 0.0 }
 0x144   : > { %v787_v15 = vpop.f32.mrf.mxu0  ;;  %v915_v16 = vpop.f32.mrf.mxu1 }
 0x145   : > { %v1681_v18 = vpack.c.bf16 %v999_v13, %v998_v11  ;;  %v1761_v19 = vpack.c.bf16 %v1031_v14, %v1030_v12  ;;  %v788_v22 = vadd.f32 %v2184_v17, %v787_v15  ;;  %v916_v23 = vadd.f32 %v2184_v17, %v915_v16 }
 0x146   : > { %v789_v20 = vpop.f32.mrf.mxu0  ;;  %v917_v21 = vpop.f32.mrf.mxu1 }
 0x147   : > { %1813 = vst [vmem:[%s2194_s4 + $0x30] sm:$0xff] %v1681_v18   ;;  %1829 = vst [vmem:[%s2194_s4 + $0xb0] sm:$0xff] %v1761_v19   ;;  %v1000_v30 = vmax.f32 %v788_v22, 0.0  ;;  %v1032_v31 = vmax.f32 %v916_v23, 0.0 }
 0x148   : > { %v790_v24 = vpop.f32.mrf.mxu0  ;;  %v918_v25 = vpop.f32.mrf.mxu1 }
 0x149   : > { %v791_v26 = vadd.f32 %v2184_v17, %v790_v24  ;;  %v919_v27 = vadd.f32 %v2184_v17, %v918_v25 }
 0x14a   : > { %v792_v28 = vpop.f32.mrf.mxu0  ;;  %v920_v29 = vpop.f32.mrf.mxu1 }
 0x14b   : > { %v1001_v32 = vmax.f32 %v791_v26, 0.0  ;;  %v1033_v33 = vmax.f32 %v919_v27, 0.0 }
 0x14c   : > { %v795_v34 = vpop.f32.mrf.mxu0  ;;  %v923_v35 = vpop.f32.mrf.mxu1 }
 0x14d   : > { %v1686_v36 = vpack.c.bf16 %v1001_v32, %v1000_v30  ;;  %v1766_v37 = vpack.c.bf16 %v1033_v33, %v1032_v31  ;;  %v796_v40 = vadd.f32 %v2184_v17, %v795_v34  ;;  %v924_v41 = vadd.f32 %v2184_v17, %v923_v35 }
 0x14e   : > { %v797_v38 = vpop.f32.mrf.mxu0  ;;  %v925_v39 = vpop.f32.mrf.mxu1 }
 0x14f   : > { %1814 = vst [vmem:[%s2194_s4 + $0x38] sm:$0xff] %v1686_v36   ;;  %1830 = vst [vmem:[%s2194_s4 + $0xb8] sm:$0xff] %v1766_v37   ;;  %v1002_v48 = vmax.f32 %v796_v40, 0.0  ;;  %v1034_v49 = vmax.f32 %v924_v41, 0.0 }
 0x150   : > { %v798_v42 = vpop.f32.mrf.mxu0  ;;  %v926_v43 = vpop.f32.mrf.mxu1 }
 0x151   : > { %v799_v44 = vadd.f32 %v2184_v17, %v798_v42  ;;  %v927_v45 = vadd.f32 %v2184_v17, %v926_v43 }
 0x152   : > { %v800_v46 = vpop.f32.mrf.mxu0  ;;  %v928_v47 = vpop.f32.mrf.mxu1 }
 0x153   : > { %v1003_v50 = vmax.f32 %v799_v44, 0.0  ;;  %v1035_v51 = vmax.f32 %v927_v45, 0.0 }
 0x154   : > { %v803_v52 = vpop.f32.mrf.mxu0  ;;  %v931_v53 = vpop.f32.mrf.mxu1 }
 0x155   : > { %v1691_v54 = vpack.c.bf16 %v1003_v50, %v1002_v48  ;;  %v1771_v55 = vpack.c.bf16 %v1035_v51, %v1034_v49  ;;  %v804_v58 = vadd.f32 %v2184_v17, %v803_v52  ;;  %v932_v59 = vadd.f32 %v2184_v17, %v931_v53 }
 0x156   : > { %v805_v56 = vpop.f32.mrf.mxu0  ;;  %v933_v57 = vpop.f32.mrf.mxu1 }
 0x157   : > { %1815 = vst [vmem:[%s2194_s4 + $0x40] sm:$0xff] %v1691_v54   ;;  %1831 = vst [vmem:[%s2194_s4 + $0xc0] sm:$0xff] %v1771_v55   ;;  %v1004_v2 = vmax.f32 %v804_v58, 0.0  ;;  %v1036_v3 = vmax.f32 %v932_v59, 0.0 }
 0x158   : > { %v806_v60 = vpop.f32.mrf.mxu0  ;;  %v934_v61 = vpop.f32.mrf.mxu1 }
 0x159   : > { %v807_v62 = vadd.f32 %v2184_v17, %v806_v60  ;;  %v935_v63 = vadd.f32 %v2184_v17, %v934_v61 }
 0x15a   : > { %v808_v0 = vpop.f32.mrf.mxu0  ;;  %v936_v1 = vpop.f32.mrf.mxu1 }
 0x15b   : > { %v1005_v4 = vmax.f32 %v807_v62, 0.0  ;;  %v1037_v5 = vmax.f32 %v935_v63, 0.0 }
 0x15c   : > { %v811_v6 = vpop.f32.mrf.mxu0  ;;  %v939_v7 = vpop.f32.mrf.mxu1 }
 0x15d   : > { %v1696_v8 = vpack.c.bf16 %v1005_v4, %v1004_v2  ;;  %v1776_v9 = vpack.c.bf16 %v1037_v5, %v1036_v3  ;;  %v812_v12 = vadd.f32 %v2184_v17, %v811_v6  ;;  %v940_v13 = vadd.f32 %v2184_v17, %v939_v7 }
 0x15e   : > { %v813_v10 = vpop.f32.mrf.mxu0  ;;  %v941_v11 = vpop.f32.mrf.mxu1 }
 0x15f   : > { %1816 = vst [vmem:[%s2194_s4 + $0x48] sm:$0xff] %v1696_v8   ;;  %1832 = vst [vmem:[%s2194_s4 + $0xc8] sm:$0xff] %v1776_v9   ;;  %v1006_v21 = vmax.f32 %v812_v12, 0.0  ;;  %v1038_v22 = vmax.f32 %v940_v13, 0.0 }
 0x160   : > { %v814_v14 = vpop.f32.mrf.mxu0  ;;  %v942_v15 = vpop.f32.mrf.mxu1 }
 0x161   : > { %v815_v16 = vadd.f32 %v2184_v17, %v814_v14  ;;  %v943_v18 = vadd.f32 %v2184_v17, %v942_v15 }
 0x162   : > { %v816_v19 = vpop.f32.mrf.mxu0  ;;  %v944_v20 = vpop.f32.mrf.mxu1 }
 0x163   : > { %v1007_v23 = vmax.f32 %v815_v16, 0.0  ;;  %v1039_v24 = vmax.f32 %v943_v18, 0.0 }
 0x164   : > { %v819_v25 = vpop.f32.mrf.mxu0  ;;  %v947_v26 = vpop.f32.mrf.mxu1 }
 0x165   : > { %v1701_v27 = vpack.c.bf16 %v1007_v23, %v1006_v21  ;;  %v1781_v28 = vpack.c.bf16 %v1039_v24, %v1038_v22  ;;  %v820_v31 = vadd.f32 %v2184_v17, %v819_v25  ;;  %v948_v32 = vadd.f32 %v2184_v17, %v947_v26 }
 0x166   : > { %v821_v29 = vpop.f32.mrf.mxu0  ;;  %v949_v30 = vpop.f32.mrf.mxu1 }
 0x167   : > { %1817 = vst [vmem:[%s2194_s4 + $0x50] sm:$0xff] %v1701_v27   ;;  %1833 = vst [vmem:[%s2194_s4 + $0xd0] sm:$0xff] %v1781_v28   ;;  %v1008_v39 = vmax.f32 %v820_v31, 0.0  ;;  %v1040_v40 = vmax.f32 %v948_v32, 0.0 }
 0x168   : > { %v822_v33 = vpop.f32.mrf.mxu0  ;;  %v950_v34 = vpop.f32.mrf.mxu1 }
 0x169   : > { %v823_v35 = vadd.f32 %v2184_v17, %v822_v33  ;;  %v951_v36 = vadd.f32 %v2184_v17, %v950_v34 }
 0x16a   : > { %v824_v37 = vpop.f32.mrf.mxu0  ;;  %v952_v38 = vpop.f32.mrf.mxu1 }
 0x16b   : > { %v1009_v41 = vmax.f32 %v823_v35, 0.0  ;;  %v1041_v42 = vmax.f32 %v951_v36, 0.0 }
 0x16c   : > { %v827_v43 = vpop.f32.mrf.mxu0  ;;  %v955_v44 = vpop.f32.mrf.mxu1 }
 0x16d   : > { %v1706_v45 = vpack.c.bf16 %v1009_v41, %v1008_v39  ;;  %v1786_v46 = vpack.c.bf16 %v1041_v42, %v1040_v40  ;;  %v828_v49 = vadd.f32 %v2184_v17, %v827_v43  ;;  %v956_v50 = vadd.f32 %v2184_v17, %v955_v44 }
 0x16e   : > { %v829_v47 = vpop.f32.mrf.mxu0  ;;  %v957_v48 = vpop.f32.mrf.mxu1 }
 0x16f   : > { %1818 = vst [vmem:[%s2194_s4 + $0x58] sm:$0xff] %v1706_v45   ;;  %1834 = vst [vmem:[%s2194_s4 + $0xd8] sm:$0xff] %v1786_v46   ;;  %v1010_v57 = vmax.f32 %v828_v49, 0.0  ;;  %v1042_v58 = vmax.f32 %v956_v50, 0.0 }
 0x170   : > { %v830_v51 = vpop.f32.mrf.mxu0  ;;  %v958_v52 = vpop.f32.mrf.mxu1 }
 0x171   : > { %v831_v53 = vadd.f32 %v2184_v17, %v830_v51  ;;  %v959_v54 = vadd.f32 %v2184_v17, %v958_v52 }
 0x172   : > { %v832_v55 = vpop.f32.mrf.mxu0  ;;  %v960_v56 = vpop.f32.mrf.mxu1 }
 0x173   : > { %v1011_v59 = vmax.f32 %v831_v53, 0.0  ;;  %v1043_v60 = vmax.f32 %v959_v54, 0.0 }
 0x174   : > { %v835_v61 = vpop.f32.mrf.mxu0  ;;  %v963_v62 = vpop.f32.mrf.mxu1 }
 0x175   : > { %v1711_v63 = vpack.c.bf16 %v1011_v59, %v1010_v57  ;;  %v1791_v0 = vpack.c.bf16 %v1043_v60, %v1042_v58  ;;  %v836_v3 = vadd.f32 %v2184_v17, %v835_v61  ;;  %v964_v4 = vadd.f32 %v2184_v17, %v963_v62 }
 0x176   : > { %v837_v1 = vpop.f32.mrf.mxu0  ;;  %v965_v2 = vpop.f32.mrf.mxu1 }
 0x177   : > { %1819 = vst [vmem:[%s2194_s4 + $0x60] sm:$0xff] %v1711_v63   ;;  %1835 = vst [vmem:[%s2194_s4 + $0xe0] sm:$0xff] %v1791_v0   ;;  %v1012_v11 = vmax.f32 %v836_v3, 0.0  ;;  %v1044_v12 = vmax.f32 %v964_v4, 0.0 }
 0x178   : > { %v838_v5 = vpop.f32.mrf.mxu0  ;;  %v966_v6 = vpop.f32.mrf.mxu1 }
 0x179   : > { %v839_v7 = vadd.f32 %v2184_v17, %v838_v5  ;;  %v967_v8 = vadd.f32 %v2184_v17, %v966_v6 }
 0x17a   : > { %v840_v9 = vpop.f32.mrf.mxu0  ;;  %v968_v10 = vpop.f32.mrf.mxu1 }
 0x17b   : > { %v1013_v13 = vmax.f32 %v839_v7, 0.0  ;;  %v1045_v14 = vmax.f32 %v967_v8, 0.0 }
 0x17c   : > { %v843_v15 = vpop.f32.mrf.mxu0  ;;  %v971_v16 = vpop.f32.mrf.mxu1 }
 0x17d   : > { %v1716_v18 = vpack.c.bf16 %v1013_v13, %v1012_v11  ;;  %v1796_v19 = vpack.c.bf16 %v1045_v14, %v1044_v12  ;;  %v844_v22 = vadd.f32 %v2184_v17, %v843_v15  ;;  %v972_v23 = vadd.f32 %v2184_v17, %v971_v16 }
 0x17e   : > { %v845_v20 = vpop.f32.mrf.mxu0  ;;  %v973_v21 = vpop.f32.mrf.mxu1 }
 0x17f   : > { %1820 = vst [vmem:[%s2194_s4 + $0x68] sm:$0xff] %v1716_v18   ;;  %1836 = vst [vmem:[%s2194_s4 + $0xe8] sm:$0xff] %v1796_v19   ;;  %v1014_v30 = vmax.f32 %v844_v22, 0.0  ;;  %v1046_v31 = vmax.f32 %v972_v23, 0.0 }
 0x180   : > { %v846_v24 = vpop.f32.mrf.mxu0  ;;  %v974_v25 = vpop.f32.mrf.mxu1 }
 0x181   : > { %v847_v26 = vadd.f32 %v2184_v17, %v846_v24  ;;  %v975_v27 = vadd.f32 %v2184_v17, %v974_v25 }
 0x182   : > { %v848_v28 = vpop.f32.mrf.mxu0  ;;  %v976_v29 = vpop.f32.mrf.mxu1 }
 0x183   : > { %v1015_v32 = vmax.f32 %v847_v26, 0.0  ;;  %v1047_v33 = vmax.f32 %v975_v27, 0.0 }
 0x184   : > { %v851_v34 = vpop.f32.mrf.mxu0  ;;  %v979_v35 = vpop.f32.mrf.mxu1 }
 0x185   : > { %v1721_v36 = vpack.c.bf16 %v1015_v32, %v1014_v30  ;;  %v1801_v37 = vpack.c.bf16 %v1047_v33, %v1046_v31  ;;  %v852_v40 = vadd.f32 %v2184_v17, %v851_v34  ;;  %v980_v41 = vadd.f32 %v2184_v17, %v979_v35 }
 0x186   : > { %v853_v38 = vpop.f32.mrf.mxu0  ;;  %v981_v39 = vpop.f32.mrf.mxu1 }
 0x187   : > { %1821 = vst [vmem:[%s2194_s4 + $0x70] sm:$0xff] %v1721_v36   ;;  %1837 = vst [vmem:[%s2194_s4 + $0xf0] sm:$0xff] %v1801_v37   ;;  %v1016_v48 = vmax.f32 %v852_v40, 0.0  ;;  %v1048_v49 = vmax.f32 %v980_v41, 0.0 }
 0x188   : > { %v854_v42 = vpop.f32.mrf.mxu0  ;;  %v982_v43 = vpop.f32.mrf.mxu1 }
 0x189   : > { %v855_v44 = vadd.f32 %v2184_v17, %v854_v42  ;;  %v983_v45 = vadd.f32 %v2184_v17, %v982_v43 }
 0x18a   : > { %v856_v46 = vpop.f32.mrf.mxu0  ;;  %v984_v47 = vpop.f32.mrf.mxu1 }
 0x18b   : > { %v1017_v50 = vmax.f32 %v855_v44, 0.0  ;;  %v1049_v51 = vmax.f32 %v983_v45, 0.0 }
 0x18d   : > { %v1726_v52 = vpack.c.bf16 %v1017_v50, %v1016_v48  ;;  %v1806_v53 = vpack.c.bf16 %v1049_v51, %v1048_v49 }
 0x18f   : > { %1822 = vst [vmem:[%s2194_s4 + $0x78] sm:$0xff] %v1726_v52   ;;  %1838 = vst [vmem:[%s2194_s4 + $0xf8] sm:$0xff] %v1806_v53  }
 0x190 PF: > { %s13_s12 = sadd.s32 1, %s1998_s12  }
 0x191   : > { %p10_p4 = scmp.ge.s32.totalorder %s13_s12, 4  }
 0x193   :  { %12 = sbr.rel (!%p10_p4) target bundleno = 1 (0x1), region = 62 }

// kernel: qreps_forward.5
= control target key start
LH: loop header
LB: loop body
LE: loop exit
PB: predicated region body
PF: predicated region fallthrough
CT: control target
= control target key end

     0   :  { %s1676_s1 = inlined_call_operand.vmem [shape: bf16[512,128], index: 1, kind: input, shape index: {}]   ;;  %s1677_s0 = inlined_call_operand.vmem [shape: bf16[176,512], index: 0, kind: input, shape index: {}]   ;;  %s1678_s2 = inlined_call_operand.vmem [shape: f32[1,128], index: 2, kind: input, shape index: {}]   ;;  %s1679_s3 = inlined_call_operand.vmem [shape: bf16[176,128], index: 3, kind: output, shape index: {}]  }
   0x1   :  { %v1270_v0 = vld [vmem:[%s1676_s1 + $0x78] sm:$0xff]   ;;  %v1274_v4 = vld [vmem:[%s1676_s1 + $0x70] sm:$0xff]   ;;  %v1278_v8 = vld [vmem:[%s1676_s1 + $0x68] sm:$0xff]  }
   0x2   :  { %v1271_v1 = vld [vmem:[%s1676_s1 + $0xf8] sm:$0xff]   ;;  %1106 = vmatprep.subr.bf16.mxu0 %v1270_v0  ;;  %v1275_v5 = vld [vmem:[%s1676_s1 + $0xf0] sm:$0xff]   ;;  %v1279_v9 = vld [vmem:[%s1676_s1 + $0xe8] sm:$0xff]  }
   0x3   :  { %v1272_v2 = vld [vmem:[%s1676_s1 + $0x38] sm:$0xff]   ;;  %1188 = vmatprep.subr.bf16.mxu1 %v1271_v1  ;;  %v1276_v6 = vld [vmem:[%s1676_s1 + $0x30] sm:$0xff]   ;;  %v1280_v10 = vld [vmem:[%s1676_s1 + $0x28] sm:$0xff]  }
   0x4   :  { %v1273_v3 = vld [vmem:[%s1676_s1 + $0xb8] sm:$0xff]   ;;  %1107 = vmatpush3.bf16.msra.mxu0 %v1272_v2  ;;  %v1277_v7 = vld [vmem:[%s1676_s1 + $0xb0] sm:$0xff]   ;;  %v1281_v11 = vld [vmem:[%s1676_s1 + $0xa8] sm:$0xff]  }
   0x5   :  { %1189 = vmatpush3.bf16.msra.mxu1 %v1273_v3  ;;  %1108 = vmatprep.subr.bf16.mxu0 %v1274_v4  ;;  %v1282_v12 = vld [vmem:[%s1676_s1 + $0x60] sm:$0xff]   ;;  %v1286_v16 = vld [vmem:[%s1676_s1 + $0x58] sm:$0xff]   ;;  %v1290_v20 = vld [vmem:[%s1676_s1 + $0x50] sm:$0xff]  }
   0x6   :  { %1190 = vmatprep.subr.bf16.mxu1 %v1275_v5  ;;  %v1283_v13 = vld [vmem:[%s1676_s1 + $0xe0] sm:$0xff]   ;;  %v1287_v17 = vld [vmem:[%s1676_s1 + $0xd8] sm:$0xff]   ;;  %v1291_v21 = vld [vmem:[%s1676_s1 + $0xd0] sm:$0xff]  }
   0x7   :  { %v1284_v14 = vld [vmem:[%s1676_s1 + $0x20] sm:$0xff]   ;;  %v1288_v18 = vld [vmem:[%s1676_s1 + $0x18] sm:$0xff]   ;;  %v1292_v22 = vld [vmem:[%s1676_s1 + $0x10] sm:$0xff]  }
   0x8   :  { %1109 = vmatpush3.bf16.msra.mxu0 %v1276_v6  ;;  %v1285_v15 = vld [vmem:[%s1676_s1 + $0xa0] sm:$0xff]   ;;  %v1289_v19 = vld [vmem:[%s1676_s1 + $0x98] sm:$0xff]   ;;  %v1293_v23 = vld [vmem:[%s1676_s1 + $0x90] sm:$0xff]  }
   0x9   :  { %1191 = vmatpush3.bf16.msra.mxu1 %v1277_v7  ;;  %1110 = vmatprep.subr.bf16.mxu0 %v1278_v8  ;;  %v1294_v24 = vld [vmem:[%s1676_s1 + $0x48] sm:$0xff]   ;;  %v1298_v28 = vld [vmem:[%s1676_s1 + $0x40] sm:$0xff]  }
   0xa   :  { %1192 = vmatprep.subr.bf16.mxu1 %v1279_v9  ;;  %v1295_v25 = vld [vmem:[%s1676_s1 + $0xc8] sm:$0xff]   ;;  %v1299_v29 = vld [vmem:[%s1676_s1 + $0xc0] sm:$0xff]  }
   0xb   :  { %v1296_v26 = vld [vmem:[%s1676_s1 + $0x8] sm:$0xff]   ;;  %v1300_v30 = vld [vmem:[%s1676_s1] sm:$0xff]  }
   0xc   :  { %1111 = vmatpush3.bf16.msra.mxu0 %v1280_v10  ;;  %v1297_v27 = vld [vmem:[%s1676_s1 + $0x88] sm:$0xff]   ;;  %v1301_v31 = vld [vmem:[%s1676_s1 + $0x80] sm:$0xff]  }
   0xd   :  { %1193 = vmatpush3.bf16.msra.mxu1 %v1281_v11  ;;  %1112 = vmatprep.subr.bf16.mxu0 %v1282_v12  ;;  %v1302_v32 = vld [vmem:[%s1677_s0] ss:$16 sps:$4 sm:$0xff]   ;;  %v1304_v33 = vld [vmem:[%s1677_s0 + $0x4] ss:$16 sps:$4 sm:$0xff]   ;;  %v1305_v34 = vld [vmem:[%s1677_s0 + $0x8] ss:$16 sps:$4 sm:$0xff]  }
   0xe   :  { %1194 = vmatprep.subr.bf16.mxu1 %v1283_v13  ;;  %v1307_v35 = vld [vmem:[%s1677_s0 + $0xc] ss:$16 sps:$4 sm:$0xff]   ;;  %574 = vmatprep.mubr.bf16.mxu0 %v1304_v33  ;;  %v1308_v36 = vld [vmem:[%s1677_s0 + $0x24] ss:$16 sps:$4 sm:$0xff]   ;;  %v1312_v38 = vld [vmem:[%s1677_s0 + $0x20] ss:$16 sps:$4 sm:$0xff]  }
   0xf   :  { %695 = vmatprep.mubr.bf16.mxu1 %v1307_v35  ;;  %v1310_v37 = vld [vmem:[%s1677_s0 + $0x2c] ss:$16 sps:$4 sm:$0xff]   ;;  %v1313_v39 = vld [vmem:[%s1677_s0 + $0x28] ss:$16 sps:$4 sm:$0xff]   ;;  %v1314_v40 = vld [vmem:[%s1677_s0 + $0x44] ss:$16 sps:$4 sm:$0xff]  }
  0x10   :  { %1113 = vmatpush3.bf16.msra.mxu0 %v1284_v14  ;;  %v1316_v41 = vld [vmem:[%s1677_s0 + $0x4c] ss:$16 sps:$4 sm:$0xff]   ;;  %v1318_v42 = vld [vmem:[%s1677_s0 + $0x40] ss:$16 sps:$4 sm:$0xff]   ;;  %v1319_v43 = vld [vmem:[%s1677_s0 + $0x48] ss:$16 sps:$4 sm:$0xff]  }
  0x11   :  { %1195 = vmatpush3.bf16.msra.mxu1 %v1285_v15  ;;  %1114 = vmatprep.subr.bf16.mxu0 %v1286_v16  ;;  %v1320_v44 = vld [vmem:[%s1677_s0 + $0x64] ss:$16 sps:$4 sm:$0xff]   ;;  %v1322_v45 = vld [vmem:[%s1677_s0 + $0x6c] ss:$16 sps:$4 sm:$0xff]   ;;  %v1324_v46 = vld [vmem:[%s1677_s0 + $0x60] ss:$16 sps:$4 sm:$0xff]  }
  0x12   :  { %1196 = vmatprep.subr.bf16.mxu1 %v1287_v17  ;;  %v1325_v47 = vld [vmem:[%s1677_s0 + $0x68] ss:$16 sps:$4 sm:$0xff]   ;;  %v1326_v48 = vld [vmem:[%s1677_s0 + $0x84] ss:$16 sps:$4 sm:$0xff]   ;;  %v1328_v49 = vld [vmem:[%s1677_s0 + $0x8c] ss:$16 sps:$4 sm:$0xff]  }
  0x13   :  { %v1330_v50 = vld [vmem:[%s1677_s0 + $0x80] ss:$16 sps:$4 sm:$0xff]   ;;  %v1331_v51 = vld [vmem:[%s1677_s0 + $0x88] ss:$16 sps:$4 sm:$0xff]   ;;  %v1332_v52 = vld [vmem:[%s1677_s0 + $0xa4] ss:$16 sps:$4 sm:$0xff]  }
  0x14   :  { %1115 = vmatpush3.bf16.msra.mxu0 %v1288_v18  ;;  %v1334_v53 = vld [vmem:[%s1677_s0 + $0xac] ss:$16 sps:$4 sm:$0xff]   ;;  %v1336_v54 = vld [vmem:[%s1677_s0 + $0xa0] ss:$16 sps:$4 sm:$0xff]   ;;  %v1337_v55 = vld [vmem:[%s1677_s0 + $0xa8] ss:$16 sps:$4 sm:$0xff]  }
  0x15   :  { %1197 = vmatpush3.bf16.msra.mxu1 %v1289_v19  ;;  %1116 = vmatprep.subr.bf16.mxu0 %v1290_v20  ;;  %v1338_v56 = vld [vmem:[%s1677_s0 + $0xc4] ss:$16 sps:$4 sm:$0xff]   ;;  %v1340_v57 = vld [vmem:[%s1677_s0 + $0xcc] ss:$16 sps:$4 sm:$0xff]   ;;  %v1342_v58 = vld [vmem:[%s1677_s0 + $0xc0] ss:$16 sps:$4 sm:$0xff]  }
  0x16   :  { %1198 = vmatprep.subr.bf16.mxu1 %v1291_v21  ;;  %v1343_v59 = vld [vmem:[%s1677_s0 + $0xc8] ss:$16 sps:$4 sm:$0xff]   ;;  %v1344_v60 = vld [vmem:[%s1677_s0 + $0xe4] ss:$16 sps:$4 sm:$0xff]   ;;  %v1346_v61 = vld [vmem:[%s1677_s0 + $0xec] ss:$16 sps:$4 sm:$0xff]  }
  0x17   :  { %v1348_v62 = vld [vmem:[%s1677_s0 + $0xe0] ss:$16 sps:$4 sm:$0xff]   ;;  %v1349_v63 = vld [vmem:[%s1677_s0 + $0xe8] ss:$16 sps:$4 sm:$0xff]   ;;  %v1350_v0 = vld [vmem:[%s1677_s0 + $0x104] ss:$16 sps:$4 sm:$0xff]  }
  0x18   :  { %1117 = vmatpush3.bf16.msra.mxu0 %v1292_v22  ;;  %v1352_v1 = vld [vmem:[%s1677_s0 + $0x10c] ss:$16 sps:$4 sm:$0xff]   ;;  %v1354_v2 = vld [vmem:[%s1677_s0 + $0x100] ss:$16 sps:$4 sm:$0xff]   ;;  %v1355_v3 = vld [vmem:[%s1677_s0 + $0x108] ss:$16 sps:$4 sm:$0xff]  }
  0x19   :  { %1199 = vmatpush3.bf16.msra.mxu1 %v1293_v23  ;;  %1118 = vmatprep.subr.bf16.mxu0 %v1294_v24  ;;  %v1356_v4 = vld [vmem:[%s1677_s0 + $0x124] ss:$16 sps:$4 sm:$0xff]   ;;  %v1358_v5 = vld [vmem:[%s1677_s0 + $0x12c] ss:$16 sps:$4 sm:$0xff]   ;;  %v1360_v6 = vld [vmem:[%s1677_s0 + $0x120] ss:$16 sps:$4 sm:$0xff]  }
  0x1a   :  { %1200 = vmatprep.subr.bf16.mxu1 %v1295_v25  ;;  %v1361_v7 = vld [vmem:[%s1677_s0 + $0x128] ss:$16 sps:$4 sm:$0xff]   ;;  %v1362_v8 = vld [vmem:[%s1677_s0 + $0x144] ss:$16 sps:$4 sm:$0xff]   ;;  %v1364_v9 = vld [vmem:[%s1677_s0 + $0x14c] ss:$16 sps:$4 sm:$0xff]  }
  0x1b   :  { %v1366_v10 = vld [vmem:[%s1677_s0 + $0x140] ss:$16 sps:$4 sm:$0xff]   ;;  %v1367_v11 = vld [vmem:[%s1677_s0 + $0x148] ss:$16 sps:$4 sm:$0xff]  }
  0x1c   :  { %1119 = vmatpush3.bf16.msra.mxu0 %v1296_v26  ;;  %v1619_v14 = vld [vmem:[%s1678_s2] ss:$0 sm:$0xff] }
  0x1d   :  { %1201 = vmatpush3.bf16.msra.mxu1 %v1297_v27  ;;  %1120 = vmatprep.subr.bf16.mxu0 %v1298_v28 }
  0x1e   :  { %1202 = vmatprep.subr.bf16.mxu1 %v1299_v29 }
  0x20   :  { %1121 = vmatpush3.bf16.msra.mxu0 %v1300_v30 }
  0x21   :  { %1203 = vmatpush3.bf16.msra.mxu1 %v1301_v31 }
  0x23   :  { %575 = vmatmul.mubr.bf16.vlgmr.msra.gmra.mxu0 %v1302_v32 }
  0x24   :  { %696 = vmatmul.mubr.bf16.vlgmr.msra.gmra.mxu1 %v1305_v34  ;;  %582 = vmatprep.mubr.bf16.mxu0 %v1308_v36 }
  0x25   :  { %703 = vmatprep.mubr.bf16.mxu1 %v1310_v37 }
  0x2b   :  { %583 = vmatmul.mubr.bf16.gmra.mxu0 %v1312_v38 }
  0x2c   :  { %704 = vmatmul.mubr.bf16.gmra.mxu1 %v1313_v39  ;;  %590 = vmatprep.mubr.bf16.mxu0 %v1314_v40 }
  0x2d   :  { %711 = vmatprep.mubr.bf16.mxu1 %v1316_v41 }
  0x33   :  { %591 = vmatmul.mubr.bf16.gmra.mxu0 %v1318_v42 }
  0x34   :  { %712 = vmatmul.mubr.bf16.gmra.mxu1 %v1319_v43  ;;  %598 = vmatprep.mubr.bf16.mxu0 %v1320_v44 }
  0x35   :  { %719 = vmatprep.mubr.bf16.mxu1 %v1322_v45 }
  0x3b   :  { %599 = vmatmul.mubr.bf16.gmra.mxu0 %v1324_v46 }
  0x3c   :  { %720 = vmatmul.mubr.bf16.gmra.mxu1 %v1325_v47  ;;  %606 = vmatprep.mubr.bf16.mxu0 %v1326_v48 }
  0x3d   :  { %727 = vmatprep.mubr.bf16.mxu1 %v1328_v49 }
  0x43   :  { %607 = vmatmul.mubr.bf16.gmra.mxu0 %v1330_v50 }
  0x44   :  { %728 = vmatmul.mubr.bf16.gmra.mxu1 %v1331_v51  ;;  %614 = vmatprep.mubr.bf16.mxu0 %v1332_v52 }
  0x45   :  { %735 = vmatprep.mubr.bf16.mxu1 %v1334_v53 }
  0x4b   :  { %615 = vmatmul.mubr.bf16.gmra.mxu0 %v1336_v54 }
  0x4c   :  { %736 = vmatmul.mubr.bf16.gmra.mxu1 %v1337_v55  ;;  %622 = vmatprep.mubr.bf16.mxu0 %v1338_v56 }
  0x4d   :  { %743 = vmatprep.mubr.bf16.mxu1 %v1340_v57 }
  0x53   :  { %623 = vmatmul.mubr.bf16.gmra.mxu0 %v1342_v58 }
  0x54   :  { %744 = vmatmul.mubr.bf16.gmra.mxu1 %v1343_v59  ;;  %630 = vmatprep.mubr.bf16.mxu0 %v1344_v60 }
  0x55   :  { %751 = vmatprep.mubr.bf16.mxu1 %v1346_v61 }
  0x5b   :  { %631 = vmatmul.mubr.bf16.gmra.mxu0 %v1348_v62 }
  0x5c   :  { %752 = vmatmul.mubr.bf16.gmra.mxu1 %v1349_v63  ;;  %638 = vmatprep.mubr.bf16.mxu0 %v1350_v0 }
  0x5d   :  { %759 = vmatprep.mubr.bf16.mxu1 %v1352_v1 }
  0x63   :  { %639 = vmatmul.mubr.bf16.gmra.mxu0 %v1354_v2 }
  0x64   :  { %760 = vmatmul.mubr.bf16.gmra.mxu1 %v1355_v3  ;;  %646 = vmatprep.mubr.bf16.mxu0 %v1356_v4 }
  0x65   :  { %767 = vmatprep.mubr.bf16.mxu1 %v1358_v5 }
  0x6b   :  { %647 = vmatmul.mubr.bf16.gmra.mxu0 %v1360_v6 }
  0x6c   :  { %768 = vmatmul.mubr.bf16.gmra.mxu1 %v1361_v7  ;;  %654 = vmatprep.mubr.bf16.mxu0 %v1362_v8 }
  0x6d   :  { %775 = vmatprep.mubr.bf16.mxu1 %v1364_v9 }
  0x73   :  { %655 = vmatmul.mubr.bf16.gmra.mxu0 %v1366_v10 }
  0x74   :  { %776 = vmatmul.mubr.bf16.gmra.mxu1 %v1367_v11 }
  0xe3   :  { %v1122_v12 = vpop.f32.mrf.mxu0 }
  0xe4   :  { %v1204_v13 = vpop.f32.mrf.mxu1 }
  0xe5   :  { %v1123_v15 = vpop.f32.mrf.mxu0 }
  0xe6   :  { %v1124_v16 = vadd.f32 %v1123_v15, %v1122_v12  ;;  %v1205_v17 = vpop.f32.mrf.mxu1 }
  0xe7   :  { %v1125_v18 = vpop.f32.mrf.mxu0  ;;  %v1206_v22 = vadd.f32 %v1205_v17, %v1204_v13 }
  0xe8   :  { %v577_v19 = vadd.f32 %v1124_v16, %v1619_v14  ;;  %v1207_v20 = vpop.f32.mrf.mxu1 }
  0xe9   :  { %v1126_v21 = vpop.f32.mrf.mxu0 }
  0xea   :  { %v1127_v23 = vadd.f32 %v1126_v21, %v1125_v18  ;;  %v1208_v24 = vpop.f32.mrf.mxu1  ;;  %v698_v26 = vadd.f32 %v1206_v22, %v577_v19 }
  0xeb   :  { %v1128_v25 = vpop.f32.mrf.mxu0  ;;  %v1209_v28 = vadd.f32 %v1208_v24, %v1207_v20 }
  0xec   :  { %v580_v27 = vadd.f32 %v1127_v23, %v1619_v14  ;;  %v1210_v29 = vpop.f32.mrf.mxu1  ;;  %v784_v35 = vmax.f32 %v698_v26, 0.0 }
  0xed   :  { %v1129_v30 = vpop.f32.mrf.mxu0 }
  0xee   :  { %v701_v31 = vadd.f32 %v1209_v28, %v580_v27  ;;  %v1130_v32 = vadd.f32 %v1129_v30, %v1128_v25  ;;  %v1211_v33 = vpop.f32.mrf.mxu1 }
  0xef   :  { %v1131_v34 = vpop.f32.mrf.mxu0  ;;  %v1212_v41 = vadd.f32 %v1211_v33, %v1210_v29 }
  0xf0   :  { %v785_v36 = vmax.f32 %v701_v31, 0.0  ;;  %v585_v37 = vadd.f32 %v1130_v32, %v1619_v14  ;;  %v1213_v38 = vpop.f32.mrf.mxu1 }
  0xf1   :  { %v1132_v39 = vpop.f32.mrf.mxu0 }
  0xf2   :  { %v1044_v40 = vpack.c.bf16 %v785_v36, %v784_v35  ;;  %v1133_v42 = vadd.f32 %v1132_v39, %v1131_v34  ;;  %v1214_v43 = vpop.f32.mrf.mxu1  ;;  %v706_v45 = vadd.f32 %v1212_v41, %v585_v37 }
  0xf3   :  { %v1134_v44 = vpop.f32.mrf.mxu0  ;;  %v1215_v47 = vadd.f32 %v1214_v43, %v1213_v38 }
  0xf4   :  { %1045 = vst [vmem:[%s1679_s3] sm:$0xff] %v1044_v40   ;;  %v588_v46 = vadd.f32 %v1133_v42, %v1619_v14  ;;  %v1216_v48 = vpop.f32.mrf.mxu1  ;;  %v786_v54 = vmax.f32 %v706_v45, 0.0 }
  0xf5   :  { %v1135_v49 = vpop.f32.mrf.mxu0 }
  0xf6   :  { %v709_v50 = vadd.f32 %v1215_v47, %v588_v46  ;;  %v1136_v51 = vadd.f32 %v1135_v49, %v1134_v44  ;;  %v1217_v52 = vpop.f32.mrf.mxu1 }
  0xf7   :  { %v1137_v53 = vpop.f32.mrf.mxu0  ;;  %v1218_v60 = vadd.f32 %v1217_v52, %v1216_v48 }
  0xf8   :  { %v787_v55 = vmax.f32 %v709_v50, 0.0  ;;  %v593_v56 = vadd.f32 %v1136_v51, %v1619_v14  ;;  %v1219_v57 = vpop.f32.mrf.mxu1 }
  0xf9   :  { %v1138_v58 = vpop.f32.mrf.mxu0 }
  0xfa   :  { %v1049_v59 = vpack.c.bf16 %v787_v55, %v786_v54  ;;  %v1139_v61 = vadd.f32 %v1138_v58, %v1137_v53  ;;  %v1220_v62 = vpop.f32.mrf.mxu1  ;;  %v714_v0 = vadd.f32 %v1218_v60, %v593_v56 }
  0xfb   :  { %v1140_v63 = vpop.f32.mrf.mxu0  ;;  %v1221_v2 = vadd.f32 %v1220_v62, %v1219_v57 }
  0xfc   :  { %1096 = vst [vmem:[%s1679_s3 + $0x8] sm:$0xff] %v1049_v59   ;;  %v596_v1 = vadd.f32 %v1139_v61, %v1619_v14  ;;  %v1222_v3 = vpop.f32.mrf.mxu1  ;;  %v788_v9 = vmax.f32 %v714_v0, 0.0 }
  0xfd   :  { %v1141_v4 = vpop.f32.mrf.mxu0 }
  0xfe   :  { %v717_v5 = vadd.f32 %v1221_v2, %v596_v1  ;;  %v1142_v6 = vadd.f32 %v1141_v4, %v1140_v63  ;;  %v1223_v7 = vpop.f32.mrf.mxu1 }
  0xff   :  { %v1143_v8 = vpop.f32.mrf.mxu0  ;;  %v1224_v16 = vadd.f32 %v1223_v7, %v1222_v3 }
 0x100   :  { %v789_v10 = vmax.f32 %v717_v5, 0.0  ;;  %v601_v11 = vadd.f32 %v1142_v6, %v1619_v14  ;;  %v1225_v12 = vpop.f32.mrf.mxu1 }
 0x101   :  { %v1144_v13 = vpop.f32.mrf.mxu0 }
 0x102   :  { %v1054_v15 = vpack.c.bf16 %v789_v10, %v788_v9  ;;  %v1145_v17 = vadd.f32 %v1144_v13, %v1143_v8  ;;  %v1226_v18 = vpop.f32.mrf.mxu1  ;;  %v722_v20 = vadd.f32 %v1224_v16, %v601_v11 }
 0x103   :  { %v1146_v19 = vpop.f32.mrf.mxu0  ;;  %v1227_v22 = vadd.f32 %v1226_v18, %v1225_v12 }
 0x104   :  { %1097 = vst [vmem:[%s1679_s3 + $0x10] sm:$0xff] %v1054_v15   ;;  %v604_v21 = vadd.f32 %v1145_v17, %v1619_v14  ;;  %v1228_v23 = vpop.f32.mrf.mxu1  ;;  %v790_v29 = vmax.f32 %v722_v20, 0.0 }
 0x105   :  { %v1147_v24 = vpop.f32.mrf.mxu0 }
 0x106   :  { %v725_v25 = vadd.f32 %v1227_v22, %v604_v21  ;;  %v1148_v26 = vadd.f32 %v1147_v24, %v1146_v19  ;;  %v1229_v27 = vpop.f32.mrf.mxu1 }
 0x107   :  { %v1149_v28 = vpop.f32.mrf.mxu0  ;;  %v1230_v35 = vadd.f32 %v1229_v27, %v1228_v23 }
 0x108   :  { %v791_v30 = vmax.f32 %v725_v25, 0.0  ;;  %v609_v31 = vadd.f32 %v1148_v26, %v1619_v14  ;;  %v1231_v32 = vpop.f32.mrf.mxu1 }
 0x109   :  { %v1150_v33 = vpop.f32.mrf.mxu0 }
 0x10a   :  { %v1059_v34 = vpack.c.bf16 %v791_v30, %v790_v29  ;;  %v1151_v36 = vadd.f32 %v1150_v33, %v1149_v28  ;;  %v1232_v37 = vpop.f32.mrf.mxu1  ;;  %v730_v39 = vadd.f32 %v1230_v35, %v609_v31 }
 0x10b   :  { %v1152_v38 = vpop.f32.mrf.mxu0  ;;  %v1233_v41 = vadd.f32 %v1232_v37, %v1231_v32 }
 0x10c   :  { %1098 = vst [vmem:[%s1679_s3 + $0x18] sm:$0xff] %v1059_v34   ;;  %v612_v40 = vadd.f32 %v1151_v36, %v1619_v14  ;;  %v1234_v42 = vpop.f32.mrf.mxu1  ;;  %v792_v48 = vmax.f32 %v730_v39, 0.0 }
 0x10d   :  { %v1153_v43 = vpop.f32.mrf.mxu0 }
 0x10e   :  { %v733_v44 = vadd.f32 %v1233_v41, %v612_v40  ;;  %v1154_v45 = vadd.f32 %v1153_v43, %v1152_v38  ;;  %v1235_v46 = vpop.f32.mrf.mxu1 }
 0x10f   :  { %v1155_v47 = vpop.f32.mrf.mxu0  ;;  %v1236_v54 = vadd.f32 %v1235_v46, %v1234_v42 }
 0x110   :  { %v793_v49 = vmax.f32 %v733_v44, 0.0  ;;  %v617_v50 = vadd.f32 %v1154_v45, %v1619_v14  ;;  %v1237_v51 = vpop.f32.mrf.mxu1 }
 0x111   :  { %v1156_v52 = vpop.f32.mrf.mxu0 }
 0x112   :  { %v1064_v53 = vpack.c.bf16 %v793_v49, %v792_v48  ;;  %v1157_v55 = vadd.f32 %v1156_v52, %v1155_v47  ;;  %v1238_v56 = vpop.f32.mrf.mxu1  ;;  %v738_v58 = vadd.f32 %v1236_v54, %v617_v50 }
 0x113   :  { %v1158_v57 = vpop.f32.mrf.mxu0  ;;  %v1239_v60 = vadd.f32 %v1238_v56, %v1237_v51 }
 0x114   :  { %1099 = vst [vmem:[%s1679_s3 + $0x20] sm:$0xff] %v1064_v53   ;;  %v620_v59 = vadd.f32 %v1157_v55, %v1619_v14  ;;  %v1240_v61 = vpop.f32.mrf.mxu1  ;;  %v794_v3 = vmax.f32 %v738_v58, 0.0 }
 0x115   :  { %v1159_v62 = vpop.f32.mrf.mxu0 }
 0x116   :  { %v741_v63 = vadd.f32 %v1239_v60, %v620_v59  ;;  %v1160_v0 = vadd.f32 %v1159_v62, %v1158_v57  ;;  %v1241_v1 = vpop.f32.mrf.mxu1 }
 0x117   :  { %v1161_v2 = vpop.f32.mrf.mxu0  ;;  %v1242_v9 = vadd.f32 %v1241_v1, %v1240_v61 }
 0x118   :  { %v795_v4 = vmax.f32 %v741_v63, 0.0  ;;  %v625_v5 = vadd.f32 %v1160_v0, %v1619_v14  ;;  %v1243_v6 = vpop.f32.mrf.mxu1 }
 0x119   :  { %v1162_v7 = vpop.f32.mrf.mxu0 }
 0x11a   :  { %v1069_v8 = vpack.c.bf16 %v795_v4, %v794_v3  ;;  %v1163_v10 = vadd.f32 %v1162_v7, %v1161_v2  ;;  %v1244_v11 = vpop.f32.mrf.mxu1  ;;  %v746_v13 = vadd.f32 %v1242_v9, %v625_v5 }
 0x11b   :  { %v1164_v12 = vpop.f32.mrf.mxu0  ;;  %v1245_v16 = vadd.f32 %v1244_v11, %v1243_v6 }
 0x11c   :  { %1100 = vst [vmem:[%s1679_s3 + $0x28] sm:$0xff] %v1069_v8   ;;  %v628_v15 = vadd.f32 %v1163_v10, %v1619_v14  ;;  %v1246_v17 = vpop.f32.mrf.mxu1  ;;  %v796_v23 = vmax.f32 %v746_v13, 0.0 }
 0x11d   :  { %v1165_v18 = vpop.f32.mrf.mxu0 }
 0x11e   :  { %v749_v19 = vadd.f32 %v1245_v16, %v628_v15  ;;  %v1166_v20 = vadd.f32 %v1165_v18, %v1164_v12  ;;  %v1247_v21 = vpop.f32.mrf.mxu1 }
 0x11f   :  { %v1167_v22 = vpop.f32.mrf.mxu0  ;;  %v1248_v29 = vadd.f32 %v1247_v21, %v1246_v17 }
 0x120   :  { %v797_v24 = vmax.f32 %v749_v19, 0.0  ;;  %v633_v25 = vadd.f32 %v1166_v20, %v1619_v14  ;;  %v1249_v26 = vpop.f32.mrf.mxu1 }
 0x121   :  { %v1168_v27 = vpop.f32.mrf.mxu0 }
 0x122   :  { %v1074_v28 = vpack.c.bf16 %v797_v24, %v796_v23  ;;  %v1169_v30 = vadd.f32 %v1168_v27, %v1167_v22  ;;  %v1250_v31 = vpop.f32.mrf.mxu1  ;;  %v754_v33 = vadd.f32 %v1248_v29, %v633_v25 }
 0x123   :  { %v1170_v32 = vpop.f32.mrf.mxu0  ;;  %v1251_v35 = vadd.f32 %v1250_v31, %v1249_v26 }
 0x124   :  { %1101 = vst [vmem:[%s1679_s3 + $0x30] sm:$0xff] %v1074_v28   ;;  %v636_v34 = vadd.f32 %v1169_v30, %v1619_v14  ;;  %v1252_v36 = vpop.f32.mrf.mxu1  ;;  %v798_v42 = vmax.f32 %v754_v33, 0.0 }
 0x125   :  { %v1171_v37 = vpop.f32.mrf.mxu0 }
 0x126   :  { %v757_v38 = vadd.f32 %v1251_v35, %v636_v34  ;;  %v1172_v39 = vadd.f32 %v1171_v37, %v1170_v32  ;;  %v1253_v40 = vpop.f32.mrf.mxu1 }
 0x127   :  { %v1173_v41 = vpop.f32.mrf.mxu0  ;;  %v1254_v48 = vadd.f32 %v1253_v40, %v1252_v36 }
 0x128   :  { %v799_v43 = vmax.f32 %v757_v38, 0.0  ;;  %v641_v44 = vadd.f32 %v1172_v39, %v1619_v14  ;;  %v1255_v45 = vpop.f32.mrf.mxu1 }
 0x129   :  { %v1174_v46 = vpop.f32.mrf.mxu0 }
 0x12a   :  { %v1079_v47 = vpack.c.bf16 %v799_v43, %v798_v42  ;;  %v1175_v49 = vadd.f32 %v1174_v46, %v1173_v41  ;;  %v1256_v50 = vpop.f32.mrf.mxu1  ;;  %v762_v52 = vadd.f32 %v1254_v48, %v641_v44 }
 0x12b   :  { %v1176_v51 = vpop.f32.mrf.mxu0  ;;  %v1257_v54 = vadd.f32 %v1256_v50, %v1255_v45 }
 0x12c   :  { %1102 = vst [vmem:[%s1679_s3 + $0x38] sm:$0xff] %v1079_v47   ;;  %v644_v53 = vadd.f32 %v1175_v49, %v1619_v14  ;;  %v1258_v55 = vpop.f32.mrf.mxu1  ;;  %v800_v61 = vmax.f32 %v762_v52, 0.0 }
 0x12d   :  { %v1177_v56 = vpop.f32.mrf.mxu0 }
 0x12e   :  { %v765_v57 = vadd.f32 %v1257_v54, %v644_v53  ;;  %v1178_v58 = vadd.f32 %v1177_v56, %v1176_v51  ;;  %v1259_v59 = vpop.f32.mrf.mxu1 }
 0x12f   :  { %v1179_v60 = vpop.f32.mrf.mxu0  ;;  %v1260_v3 = vadd.f32 %v1259_v59, %v1258_v55 }
 0x130   :  { %v801_v62 = vmax.f32 %v765_v57, 0.0  ;;  %v649_v63 = vadd.f32 %v1178_v58, %v1619_v14  ;;  %v1261_v0 = vpop.f32.mrf.mxu1 }
 0x131   :  { %v1180_v1 = vpop.f32.mrf.mxu0 }
 0x132   :  { %v1084_v2 = vpack.c.bf16 %v801_v62, %v800_v61  ;;  %v1181_v4 = vadd.f32 %v1180_v1, %v1179_v60  ;;  %v1262_v5 = vpop.f32.mrf.mxu1  ;;  %v770_v7 = vadd.f32 %v1260_v3, %v649_v63 }
 0x133   :  { %v1182_v6 = vpop.f32.mrf.mxu0  ;;  %v1263_v9 = vadd.f32 %v1262_v5, %v1261_v0 }
 0x134   :  { %1103 = vst [vmem:[%s1679_s3 + $0x40] sm:$0xff] %v1084_v2   ;;  %v652_v8 = vadd.f32 %v1181_v4, %v1619_v14  ;;  %v1264_v10 = vpop.f32.mrf.mxu1  ;;  %v802_v17 = vmax.f32 %v770_v7, 0.0 }
 0x135   :  { %v1183_v11 = vpop.f32.mrf.mxu0 }
 0x136   :  { %v773_v12 = vadd.f32 %v1263_v9, %v652_v8  ;;  %v1184_v13 = vadd.f32 %v1183_v11, %v1182_v6  ;;  %v1265_v15 = vpop.f32.mrf.mxu1 }
 0x137   :  { %v1185_v16 = vpop.f32.mrf.mxu0  ;;  %v1266_v23 = vadd.f32 %v1265_v15, %v1264_v10 }
 0x138   :  { %v803_v18 = vmax.f32 %v773_v12, 0.0  ;;  %v657_v19 = vadd.f32 %v1184_v13, %v1619_v14  ;;  %v1267_v20 = vpop.f32.mrf.mxu1 }
 0x139   :  { %v1186_v21 = vpop.f32.mrf.mxu0 }
 0x13a   :  { %v1089_v22 = vpack.c.bf16 %v803_v18, %v802_v17  ;;  %v1187_v24 = vadd.f32 %v1186_v21, %v1185_v16  ;;  %v1268_v25 = vpop.f32.mrf.mxu1  ;;  %v778_v26 = vadd.f32 %v1266_v23, %v657_v19 }
 0x13b   :  { %v1269_v28 = vadd.f32 %v1268_v25, %v1267_v20 }
 0x13c   :  { %1104 = vst [vmem:[%s1679_s3 + $0x48] sm:$0xff] %v1089_v22   ;;  %v660_v27 = vadd.f32 %v1187_v24, %v1619_v14  ;;  %v804_v30 = vmax.f32 %v778_v26, 0.0 }
 0x13e   :  { %v781_v29 = vadd.f32 %v1269_v28, %v660_v27 }
 0x140   :  { %v805_v31 = vmax.f32 %v781_v29, 0.0 }
 0x142   :  { %v1094_v32 = vpack.c.bf16 %v805_v31, %v804_v30 }
 0x144   :  { %1105 = vst [vmem:[%s1679_s3 + $0x50] sm:$0xff] %v1094_v32  }

// kernel: qreps_forward.6
= control target key start
LH: loop header
LB: loop body
LE: loop exit
PB: predicated region body
PF: predicated region fallthrough
CT: control target
= control target key end

     0   :  { %v1348_v24 = vmov 0.0   ;;  %vm1349_vm0 = vmmov 0   ;;  %s1705_s1 = inlined_call_operand.vmem [shape: bf16[640,128], index: 1, kind: input, shape index: {}]   ;;  %s1706_s0 = inlined_call_operand.vmem [shape: bf16[112,640], index: 0, kind: input, shape index: {}]   ;;  %s1707_s2 = inlined_call_operand.vmem [shape: f32[1,128], index: 2, kind: input, shape index: {}]   ;;  %s1708_s3 = inlined_call_operand.vmem [shape: bf16[112,128], index: 3, kind: output, shape index: {}]  }
   0x1   :  { %v1259_v0 = vld [vmem:[%s1705_s1 + $0x78] sm:$0xff]   ;;  %v1261_v2 = vld [vmem:[%s1705_s1 + $0x70] sm:$0xff]   ;;  %v1263_v4 = vld [vmem:[%s1705_s1 + $0x68] sm:$0xff]  }
   0x2   :  { %v1260_v1 = vld [vmem:[%s1705_s1 + $0x38] sm:$0xff]   ;;  %1066 = vmatprep.subr.bf16.mxu0 %v1259_v0  ;;  %1241 = vmatprep.subr.bf16.mxu1 %v1259_v0  ;;  %v1262_v3 = vld [vmem:[%s1705_s1 + $0x30] sm:$0xff]   ;;  %v1264_v5 = vld [vmem:[%s1705_s1 + $0x28] sm:$0xff]  }
   0x3   :  { %1067 = vmatpush3.bf16.msra.mxu0 %v1260_v1  ;;  %1249 = vmatpush3.bf16.msra.mxu1 %v1260_v1  ;;  %v1265_v6 = vld [vmem:[%s1705_s1 + $0x60] sm:$0xff]   ;;  %v1267_v8 = vld [vmem:[%s1705_s1 + $0x58] sm:$0xff]   ;;  %v1269_v10 = vld [vmem:[%s1705_s1 + $0x50] sm:$0xff]  }
   0x4   :  { %1068 = vmatprep.subr.bf16.mxu0 %v1261_v2  ;;  %1242 = vmatprep.subr.bf16.mxu1 %v1261_v2  ;;  %v1266_v7 = vld [vmem:[%s1705_s1 + $0x20] sm:$0xff]   ;;  %v1268_v9 = vld [vmem:[%s1705_s1 + $0x18] sm:$0xff]   ;;  %v1270_v13 = vld [vmem:[%s1705_s1 + $0x10] sm:$0xff]  }
   0x5   :  { %v1277_v11 = vld [vmem:[%s1706_s0 + $0x4] ss:$20 sps:$4 sm:$0xff]   ;;  %v1271_v14 = vld [vmem:[%s1705_s1 + $0x48] sm:$0xff]   ;;  %v1275_v18 = vld [vmem:[%s1706_s0] ss:$20 sps:$4 sm:$0xff]  }
   0x6   :  { %v1280_v12 = vld [vmem:[%s1706_s0 + $0xa4] ss:$20 sps:$4 sm:$0xff]   ;;  %598 = vmatprep.mubr.bf16.mxu0 %v1277_v11  ;;  %v1272_v15 = vld [vmem:[%s1705_s1 + $0x8] sm:$0xff]   ;;  %v1278_v19 = vld [vmem:[%s1706_s0 + $0xa0] ss:$20 sps:$4 sm:$0xff]  }
   0x7   :  { %1069 = vmatpush3.bf16.msra.mxu0 %v1262_v3  ;;  %1250 = vmatpush3.bf16.msra.mxu1 %v1262_v3  ;;  %v1273_v16 = vld [vmem:[%s1705_s1 + $0x40] sm:$0xff]   ;;  %v1281_v20 = vld [vmem:[%s1705_s1 + $0xf8] sm:$0xff]   ;;  %v1284_v23 = vld [vmem:[%s1705_s1 + $0xf0] sm:$0xff]  }
   0x8   :  { %1070 = vmatprep.subr.bf16.mxu0 %v1263_v4  ;;  %1243 = vmatprep.subr.bf16.mxu1 %v1263_v4  ;;  %v1274_v17 = vld [vmem:[%s1705_s1] sm:$0xff]   ;;  %v1282_v21 = vld [vmem:[%s1705_s1 + $0xb8] sm:$0xff]   ;;  %v1285_v27 = vld [vmem:[%s1705_s1 + $0xb0] sm:$0xff]  }
   0x9   :  { %630 = vmatprep.mubr.bf16.mxu1 %v1280_v12  ;;  %v1283_v22 = vld [vmem:[%s1705_s1 + $0x138] sm:$0xff]   ;;  %v1287_v25 = vld [vmem:[%s1706_s0 + $0x2c] ss:$20 sps:$4 sm:$0xff]   ;;  %v1286_v28 = vld [vmem:[%s1705_s1 + $0x130] sm:$0xff]  }
   0xa   :  { %v1291_v26 = vld [vmem:[%s1706_s0 + $0xcc] ss:$20 sps:$4 sm:$0xff]   ;;  %v1289_v29 = vld [vmem:[%s1706_s0 + $0x28] ss:$20 sps:$4 sm:$0xff]   ;;  %v1301_v39 = vld [vmem:[%s1706_s0 + $0x50] ss:$20 sps:$4 sm:$0xff]  }
   0xb   :  { %1071 = vmatpush3.bf16.msra.mxu0 %v1264_v5  ;;  %1251 = vmatpush3.bf16.msra.mxu1 %v1264_v5  ;;  %v1290_v30 = vld [vmem:[%s1705_s1 + $0xe8] sm:$0xff]   ;;  %v1296_v34 = vld [vmem:[%s1705_s1 + $0xe0] sm:$0xff]   ;;  %v1302_v40 = vld [vmem:[%s1705_s1 + $0xd8] sm:$0xff]  }
   0xc   :  { %1072 = vmatprep.subr.bf16.mxu0 %v1265_v6  ;;  %1244 = vmatprep.subr.bf16.mxu1 %v1265_v6  ;;  %v1293_v31 = vld [vmem:[%s1705_s1 + $0xa8] sm:$0xff]   ;;  %v1297_v37 = vld [vmem:[%s1705_s1 + $0xa0] sm:$0xff]   ;;  %v1305_v41 = vld [vmem:[%s1705_s1 + $0x98] sm:$0xff]  }
   0xd   :  { %v1294_v32 = vld [vmem:[%s1705_s1 + $0x128] sm:$0xff]   ;;  %v1298_v38 = vld [vmem:[%s1705_s1 + $0x120] sm:$0xff]   ;;  %v1306_v43 = vld [vmem:[%s1705_s1 + $0x118] sm:$0xff]  }
   0xe   :  { %v1295_v33 = vld [vmem:[%s1706_s0 + $0xc8] ss:$20 sps:$4 sm:$0xff]   ;;  %v1307_v42 = vld [vmem:[%s1706_s0 + $0xf0] ss:$20 sps:$4 sm:$0xff]   ;;  %v1322_v47 = vld [vmem:[%s1706_s0 + $0xc] ss:$20 sps:$4 sm:$0xff]  }
   0xf   :  { %1073 = vmatpush3.bf16.msra.mxu0 %v1266_v7  ;;  %1252 = vmatpush3.bf16.msra.mxu1 %v1266_v7  ;;  %v1299_v35 = vld [vmem:[%s1706_s0 + $0x54] ss:$20 sps:$4 sm:$0xff]   ;;  %v1311_v45 = vld [vmem:[%s1706_s0 + $0x7c] ss:$20 sps:$4 sm:$0xff]   ;;  %v1313_v50 = vld [vmem:[%s1706_s0 + $0x78] ss:$20 sps:$4 sm:$0xff]  }
  0x10   :  { %1074 = vmatprep.subr.bf16.mxu0 %v1267_v8  ;;  %1245 = vmatprep.subr.bf16.mxu1 %v1267_v8  ;;  %v1303_v36 = vld [vmem:[%s1706_s0 + $0xf4] ss:$20 sps:$4 sm:$0xff]   ;;  %v1317_v53 = vld [vmem:[%s1705_s1 + $0xc0] sm:$0xff]   ;;  %v1327_v60 = vld [vmem:[%s1706_s0 + $0x38] ss:$20 sps:$4 sm:$0xff]  }
  0x11   :  { %v1308_v44 = vld [vmem:[%s1705_s1 + $0xd0] sm:$0xff]   ;;  %v1314_v49 = vld [vmem:[%s1705_s1 + $0xc8] sm:$0xff]   ;;  %v1318_v54 = vld [vmem:[%s1705_s1 + $0x80] sm:$0xff]  }
  0x12   :  { %v1309_v46 = vld [vmem:[%s1705_s1 + $0x90] sm:$0xff]   ;;  %v1315_v51 = vld [vmem:[%s1705_s1 + $0x88] sm:$0xff]   ;;  %v1319_v55 = vld [vmem:[%s1705_s1 + $0x100] sm:$0xff]  }
  0x13   :  { %1075 = vmatpush3.bf16.msra.mxu0 %v1268_v9  ;;  %1253 = vmatpush3.bf16.msra.mxu1 %v1268_v9  ;;  %v1310_v48 = vld [vmem:[%s1705_s1 + $0x110] sm:$0xff]   ;;  %v1316_v52 = vld [vmem:[%s1705_s1 + $0x108] sm:$0xff]   ;;  %v1332_v0 = vld [vmem:[%s1706_s0 + $0x84] ss:$20 sps:$4 sm:$0xff]  }
  0x14   :  { %1076 = vmatprep.subr.bf16.mxu0 %v1269_v10  ;;  %1246 = vmatprep.subr.bf16.mxu1 %v1269_v10  ;;  %v1320_v56 = vld [vmem:[%s1706_s0 + $0x8] ss:$20 sps:$4 sm:$0xff]   ;;  %v1323_v57 = vld [vmem:[%s1706_s0 + $0x10] ss:$20 sps:$4 sm:$0xff]   ;;  %v1330_v62 = vld [vmem:[%s1706_s0 + $0x58] ss:$20 sps:$4 sm:$0xff]  }
  0x15   :  { %v1324_v58 = vld [vmem:[%s1706_s0 + $0x34] ss:$20 sps:$4 sm:$0xff]   ;;  %v1326_v59 = vld [vmem:[%s1706_s0 + $0x30] ss:$20 sps:$4 sm:$0xff]   ;;  %v1336_v3 = vld [vmem:[%s1706_s0 + $0xac] ss:$20 sps:$4 sm:$0xff]  }
  0x16   :  { %v1328_v61 = vld [vmem:[%s1706_s0 + $0x5c] ss:$20 sps:$4 sm:$0xff]   ;;  %v1331_v63 = vld [vmem:[%s1706_s0 + $0x60] ss:$20 sps:$4 sm:$0xff]   ;;  %v1343_v8 = vld [vmem:[%s1706_s0 + $0xd8] ss:$20 sps:$4 sm:$0xff]  }
  0x17   :  { %1077 = vmatpush3.bf16.msra.mxu0 %v1270_v13  ;;  %1254 = vmatpush3.bf16.msra.mxu1 %v1270_v13  ;;  %v1334_v1 = vld [vmem:[%s1706_s0 + $0x80] ss:$20 sps:$4 sm:$0xff]   ;;  %v1335_v2 = vld [vmem:[%s1706_s0 + $0x88] ss:$20 sps:$4 sm:$0xff]   ;;  %v1339_v5 = vld [vmem:[%s1706_s0 + $0xb0] ss:$20 sps:$4 sm:$0xff]  }
  0x18   :  { %1078 = vmatprep.subr.bf16.mxu0 %v1271_v14  ;;  %1247 = vmatprep.subr.bf16.mxu1 %v1271_v14  ;;  %v1338_v4 = vld [vmem:[%s1706_s0 + $0xa8] ss:$20 sps:$4 sm:$0xff]   ;;  %v1342_v7 = vld [vmem:[%s1706_s0 + $0xd0] ss:$20 sps:$4 sm:$0xff]   ;;  %v1346_v10 = vld [vmem:[%s1706_s0 + $0xf8] ss:$20 sps:$4 sm:$0xff]  }
  0x19   :  { %v1340_v6 = vld [vmem:[%s1706_s0 + $0xd4] ss:$20 sps:$4 sm:$0xff]   ;;  %v1344_v9 = vld [vmem:[%s1706_s0 + $0xfc] ss:$20 sps:$4 sm:$0xff]  }
  0x1a   :  { %v1347_v11 = vld [vmem:[%s1706_s0 + $0x100] ss:$20 sps:$4 sm:$0xff]  }
  0x1b   :  { %1079 = vmatpush3.bf16.msra.mxu0 %v1272_v15  ;;  %1255 = vmatpush3.bf16.msra.mxu1 %v1272_v15 }
  0x1c   :  { %1080 = vmatprep.subr.bf16.mxu0 %v1273_v16  ;;  %1248 = vmatprep.subr.bf16.mxu1 %v1273_v16 }
  0x1f   :  { %1081 = vmatpush3.bf16.msra.mxu0 %v1274_v17  ;;  %1256 = vmatpush3.bf16.msra.mxu1 %v1274_v17 }
  0x20   :  { %1124 = vmatprep.subr.bf16.mxu1 %v1281_v20  ;;  %1197 = vmatprep.subr.bf16.mxu0 %v1348_v24 }
  0x22   :  { %599 = vmatmul.mubr.bf16.vlgmr.msra.gmra.mxu0 %v1275_v18  ;;  %631 = vmatmul.mubr.bf16.vlgmr.msra.gmra.mxu1 %v1278_v19 }
  0x23   :  { %1125 = vmatpush3.bf16.msra.mxu1 %v1282_v21  ;;  %1198 = vmatpush3.bf16.msra.mxu0 %v1283_v22 }
  0x24   :  { %1126 = vmatprep.subr.bf16.mxu1 %v1284_v23  ;;  %1199 = vmatprep.subr.bf16.mxu0 %v1348_v24 }
  0x25   :  { %606 = vmatprep.mubr.bf16.mxu0 %v1287_v25  ;;  %638 = vmatprep.mubr.bf16.mxu1 %v1291_v26 }
  0x27   :  { %1127 = vmatpush3.bf16.msra.mxu1 %v1285_v27  ;;  %1200 = vmatpush3.bf16.msra.mxu0 %v1286_v28 }
  0x28   :  { %1128 = vmatprep.subr.bf16.mxu1 %v1290_v30  ;;  %1201 = vmatprep.subr.bf16.mxu0 %v1348_v24 }
  0x2a   :  { %607 = vmatmul.mubr.bf16.gmra.mxu0 %v1289_v29  ;;  %639 = vmatmul.mubr.bf16.gmra.mxu1 %v1295_v33 }
  0x2b   :  { %1129 = vmatpush3.bf16.msra.mxu1 %v1293_v31  ;;  %1202 = vmatpush3.bf16.msra.mxu0 %v1294_v32 }
  0x2c   :  { %1130 = vmatprep.subr.bf16.mxu1 %v1296_v34  ;;  %1203 = vmatprep.subr.bf16.mxu0 %v1348_v24 }
  0x2d   :  { %614 = vmatprep.mubr.bf16.mxu0 %v1299_v35  ;;  %646 = vmatprep.mubr.bf16.mxu1 %v1303_v36 }
  0x2f   :  { %1131 = vmatpush3.bf16.msra.mxu1 %v1297_v37  ;;  %1204 = vmatpush3.bf16.msra.mxu0 %v1298_v38 }
  0x30   :  { %1132 = vmatprep.subr.bf16.mxu1 %v1302_v40  ;;  %1205 = vmatprep.subr.bf16.mxu0 %v1348_v24 }
  0x32   :  { %615 = vmatmul.mubr.bf16.gmra.mxu0 %v1301_v39  ;;  %647 = vmatmul.mubr.bf16.gmra.mxu1 %v1307_v42 }
  0x33   :  { %1133 = vmatpush3.bf16.msra.mxu1 %v1305_v41  ;;  %1206 = vmatpush3.bf16.msra.mxu0 %v1306_v43  ;;  %v1652_v43 = vld [vmem:[%s1707_s2] ss:$0 sm:$0xff] }
  0x34   :  { %1134 = vmatprep.subr.bf16.mxu1 %v1308_v44  ;;  %1207 = vmatprep.subr.bf16.mxu0 %v1348_v24 }
  0x35   :  { %622 = vmatprep.mubr.bf16.mxu0 %v1311_v45  ;;  %687 = vmatprep.mubr.bf16.mxu1 %v1322_v47 }
  0x37   :  { %1135 = vmatpush3.bf16.msra.mxu1 %v1309_v46  ;;  %1208 = vmatpush3.bf16.msra.mxu0 %v1310_v48 }
  0x38   :  { %1136 = vmatprep.subr.bf16.mxu1 %v1314_v49  ;;  %1209 = vmatprep.subr.bf16.mxu0 %v1348_v24 }
  0x3a   :  { %623 = vmatmul.mubr.bf16.gmra.mxu0 %v1313_v50 }
  0x3b   :  { %1137 = vmatpush3.bf16.msra.mxu1 %v1315_v51  ;;  %1210 = vmatpush3.bf16.msra.mxu0 %v1316_v52 }
  0x3c   :  { %1138 = vmatprep.subr.bf16.mxu1 %v1317_v53  ;;  %1211 = vmatprep.subr.bf16.mxu0 %v1348_v24 }
  0x3d   :  { %1213 = vmatprep.mubr.msk.bf16.mxu0 %vm1349_vm0, %v1348_v24 }
  0x3f   :  { %1139 = vmatpush3.bf16.msra.mxu1 %v1318_v54  ;;  %1212 = vmatpush3.bf16.msra.mxu0 %v1319_v55 }
  0x42   :  { %688 = vmatmul.mubr.bf16.vlgmr.msra.gmra.mxu1 %v1320_v56  ;;  %1214 = vmatmul.mubr.bf16.vlgmr.msra.gmra.mxu0 %v1323_v57 }
  0x43   :  { %695 = vmatprep.mubr.bf16.mxu1 %v1324_v58  ;;  %1217 = vmatprep.mubr.msk.bf16.mxu0 %vm1349_vm0, %v1348_v24 }
  0x4a   :  { %696 = vmatmul.mubr.bf16.gmra.mxu1 %v1326_v59  ;;  %1218 = vmatmul.mubr.bf16.gmra.mxu0 %v1327_v60 }
  0x4b   :  { %703 = vmatprep.mubr.bf16.mxu1 %v1328_v61  ;;  %1221 = vmatprep.mubr.msk.bf16.mxu0 %vm1349_vm0, %v1348_v24 }
  0x52   :  { %704 = vmatmul.mubr.bf16.gmra.mxu1 %v1330_v62  ;;  %1222 = vmatmul.mubr.bf16.gmra.mxu0 %v1331_v63 }
  0x53   :  { %711 = vmatprep.mubr.bf16.mxu1 %v1332_v0  ;;  %1225 = vmatprep.mubr.msk.bf16.mxu0 %vm1349_vm0, %v1348_v24 }
  0x5a   :  { %712 = vmatmul.mubr.bf16.gmra.mxu1 %v1334_v1  ;;  %1226 = vmatmul.mubr.bf16.gmra.mxu0 %v1335_v2 }
  0x5b   :  { %719 = vmatprep.mubr.bf16.mxu1 %v1336_v3  ;;  %1229 = vmatprep.mubr.msk.bf16.mxu0 %vm1349_vm0, %v1348_v24 }
  0x62   :  { %720 = vmatmul.mubr.bf16.gmra.mxu1 %v1338_v4  ;;  %1230 = vmatmul.mubr.bf16.gmra.mxu0 %v1339_v5 }
  0x63   :  { %727 = vmatprep.mubr.bf16.mxu1 %v1340_v6  ;;  %1233 = vmatprep.mubr.msk.bf16.mxu0 %vm1349_vm0, %v1348_v24 }
  0x6a   :  { %728 = vmatmul.mubr.bf16.gmra.mxu1 %v1342_v7  ;;  %1234 = vmatmul.mubr.bf16.gmra.mxu0 %v1343_v8 }
  0x6b   :  { %735 = vmatprep.mubr.bf16.mxu1 %v1344_v9  ;;  %1237 = vmatprep.mubr.msk.bf16.mxu0 %vm1349_vm0, %v1348_v24 }
  0x72   :  { %736 = vmatmul.mubr.bf16.gmra.mxu1 %v1346_v10  ;;  %1238 = vmatmul.mubr.bf16.gmra.mxu0 %v1347_v11 }
  0xe2   :  { %v1082_v12 = vpop.f32.mrf.mxu0  ;;  %v1617_v13 = vpop.f32.mrf.mxu1 }
  0xe4   :  { %v1083_v14 = vpop.f32.mrf.mxu0  ;;  %v1619_v15 = vpop.f32.mrf.mxu1 }
  0xe5   :  { %v1084_v40 = vadd.f32 %v1083_v14, %v1082_v12 }
  0xe6   :  { %v1085_v16 = vpop.f32.mrf.mxu0  ;;  %v1621_v17 = vpop.f32.mrf.mxu1 }
  0xe7   :  { %v601_v46 = vadd.f32 %v1084_v40, %v1652_v43 }
  0xe8   :  { %v1086_v18 = vpop.f32.mrf.mxu0  ;;  %v1623_v19 = vpop.f32.mrf.mxu1 }
  0xe9   :  { %v1087_v47 = vadd.f32 %v1086_v18, %v1085_v16 }
  0xea   :  { %v1088_v20 = vpop.f32.mrf.mxu0  ;;  %v1625_v21 = vpop.f32.mrf.mxu1 }
  0xeb   :  { %v604_v54 = vadd.f32 %v1087_v47, %v1652_v43 }
  0xec   :  { %v1089_v22 = vpop.f32.mrf.mxu0  ;;  %v1627_v23 = vpop.f32.mrf.mxu1 }
  0xed   :  { %v1090_v55 = vadd.f32 %v1089_v22, %v1088_v20 }
  0xee   :  { %v1091_v24 = vpop.f32.mrf.mxu0  ;;  %v1629_v25 = vpop.f32.mrf.mxu1 }
  0xef   :  { %v609_v63 = vadd.f32 %v1090_v55, %v1652_v43 }
  0xf0   :  { %v1092_v26 = vpop.f32.mrf.mxu0  ;;  %v1631_v27 = vpop.f32.mrf.mxu1 }
  0xf1   :  { %v1093_v0 = vadd.f32 %v1092_v26, %v1091_v24 }
  0xf2   :  { %v1094_v28 = vpop.f32.mrf.mxu0  ;;  %v1633_v30 = vpop.f32.mrf.mxu1 }
  0xf3   :  { %v612_v10 = vadd.f32 %v1093_v0, %v1652_v43 }
  0xf4   :  { %v1095_v29 = vpop.f32.mrf.mxu0  ;;  %v1635_v32 = vpop.f32.mrf.mxu1 }
  0xf5   :  { %v1096_v11 = vadd.f32 %v1095_v29, %v1094_v28 }
  0xf6   :  { %v1097_v31 = vpop.f32.mrf.mxu0  ;;  %v1639_v35 = vpop.f32.mrf.mxu1 }
  0xf7   :  { %v617_v40 = vadd.f32 %v1096_v11, %v1652_v43 }
  0xf8   :  { %v1098_v33 = vpop.f32.mrf.mxu0  ;;  %v1645_v38 = vpop.f32.mrf.mxu1 }
  0xfa   :  { %v1637_v34 = vpop.f32.mrf.mxu0 }
  0xfc   :  { %v1641_v36 = vpop.f32.mrf.mxu0 }
  0xfe   :  { %v1643_v37 = vpop.f32.mrf.mxu0 }
 0x100   :  { %v1647_v39 = vpop.f32.mrf.mxu0 }
 0x102   :  { %v1140_v41 = vpop.f32.mrf.mxu1  ;;  %v778_v42 = vpop.f32.mrf.mxu0 }
 0x104   :  { %v1141_v44 = vpop.f32.mrf.mxu1  ;;  %v1215_v45 = vpop.f32.mrf.mxu0 }
 0x105   :  { %v1142_v48 = vadd.f32 %v1141_v44, %v1140_v41  ;;  %v1099_v41 = vadd.f32 %v1098_v33, %v1097_v31 }
 0x106   :  { %v1143_v49 = vpop.f32.mrf.mxu1  ;;  %v781_v50 = vpop.f32.mrf.mxu0 }
 0x107   :  { %v690_v51 = vadd.f32 %v1142_v48, %v601_v46 }
 0x108   :  { %v1144_v52 = vpop.f32.mrf.mxu1  ;;  %v1216_v53 = vpop.f32.mrf.mxu0 }
 0x109   :  { %v1145_v56 = vadd.f32 %v1144_v52, %v1143_v49  ;;  %v779_v59 = vadd.f32 %v778_v42, %v690_v51  ;;  %v1102_v51 = vadd.f32 %v1641_v36, %v1637_v34 }
 0x10a   :  { %v1146_v57 = vpop.f32.mrf.mxu1  ;;  %v786_v58 = vpop.f32.mrf.mxu0 }
 0x10b   :  { %v693_v60 = vadd.f32 %v1145_v56, %v604_v54  ;;  %v833_v5 = vmax.f32 %v779_v59, 0.0  ;;  %v1105_v59 = vadd.f32 %v1647_v39, %v1643_v37 }
 0x10c   :  { %v1147_v61 = vpop.f32.mrf.mxu1  ;;  %v1219_v62 = vpop.f32.mrf.mxu0 }
 0x10d   :  { %v782_v1 = vadd.f32 %v781_v50, %v693_v60  ;;  %v1148_v2 = vadd.f32 %v1147_v61, %v1146_v57  ;;  %v620_v50 = vadd.f32 %v1099_v41, %v1652_v43  ;;  %v1114_v41 = vadd.f32 %v1627_v23, %v1625_v21 }
 0x10e   :  { %v1149_v3 = vpop.f32.mrf.mxu1  ;;  %v789_v4 = vpop.f32.mrf.mxu0 }
 0x10f   :  { %v834_v6 = vmax.f32 %v782_v1, 0.0  ;;  %v698_v7 = vadd.f32 %v1148_v2, %v609_v63 }
 0x110   :  { %v1150_v8 = vpop.f32.mrf.mxu1  ;;  %v1220_v9 = vpop.f32.mrf.mxu0 }
 0x111   :  { %v1028_v12 = vpack.c.bf16 %v834_v6, %v833_v5  ;;  %v1151_v14 = vadd.f32 %v1150_v8, %v1149_v3  ;;  %v787_v20 = vadd.f32 %v786_v58, %v698_v7  ;;  %v625_v58 = vadd.f32 %v1102_v51, %v1652_v43 }
 0x112   :  { %v1152_v16 = vpop.f32.mrf.mxu1  ;;  %v794_v18 = vpop.f32.mrf.mxu0  ;;  %v1108_v3 = vadd.f32 %v1619_v15, %v1617_v13 }
 0x113   :  { %1029 = vst [vmem:[%s1708_s3] sm:$0xff] %v1028_v12   ;;  %v701_v22 = vadd.f32 %v1151_v14, %v612_v10  ;;  %v835_v28 = vmax.f32 %v787_v20, 0.0  ;;  %v1111_v12 = vadd.f32 %v1623_v19, %v1621_v17 }
 0x114   :  { %v1153_v24 = vpop.f32.mrf.mxu1  ;;  %v1223_v26 = vpop.f32.mrf.mxu0  ;;  %v633_v11 = vadd.f32 %v1108_v3, %v1652_v43 }
 0x115   :  { %v790_v42 = vadd.f32 %v789_v4, %v701_v22  ;;  %v1154_v44 = vadd.f32 %v1153_v24, %v1152_v16  ;;  %v628_v4 = vadd.f32 %v1105_v59, %v1652_v43 }
 0x116   :  { %v1155_v45 = vpop.f32.mrf.mxu1  ;;  %v797_v46 = vpop.f32.mrf.mxu0 }
 0x117   :  { %v836_v29 = vmax.f32 %v790_v42, 0.0  ;;  %v706_v47 = vadd.f32 %v1154_v44, %v617_v40  ;;  %v636_v40 = vadd.f32 %v1111_v12, %v1652_v43 }
 0x118   :  { %v1156_v48 = vpop.f32.mrf.mxu1  ;;  %v1224_v49 = vpop.f32.mrf.mxu0 }
 0x119   :  { %v1033_v52 = vpack.c.bf16 %v836_v29, %v835_v28  ;;  %v1157_v53 = vadd.f32 %v1156_v48, %v1155_v45  ;;  %v795_v31 = vadd.f32 %v794_v18, %v706_v47  ;;  %v641_v47 = vadd.f32 %v1114_v41, %v1652_v43 }
 0x11a   :  { %v1158_v54 = vpop.f32.mrf.mxu1  ;;  %v802_v55 = vpop.f32.mrf.mxu0  ;;  %v1117_v48 = vadd.f32 %v1631_v27, %v1629_v25 }
 0x11b   :  { %1060 = vst [vmem:[%s1708_s3 + $0x8] sm:$0xff] %v1033_v52   ;;  %v709_v33 = vadd.f32 %v1157_v53, %v620_v50  ;;  %v837_v62 = vmax.f32 %v795_v31, 0.0 }
 0x11c   :  { %v1159_v56 = vpop.f32.mrf.mxu1  ;;  %v1227_v57 = vpop.f32.mrf.mxu0  ;;  %v644_v31 = vadd.f32 %v1117_v48, %v1652_v43 }
 0x11d   :  { %v798_v60 = vadd.f32 %v797_v46, %v709_v33  ;;  %v1160_v61 = vadd.f32 %v1159_v56, %v1158_v54  ;;  %v1120_v33 = vadd.f32 %v1635_v32, %v1633_v30 }
 0x11e   :  { %v1161_v34 = vpop.f32.mrf.mxu1  ;;  %v805_v36 = vpop.f32.mrf.mxu0 }
 0x11f   :  { %v838_v63 = vmax.f32 %v798_v60, 0.0  ;;  %v714_v0 = vadd.f32 %v1160_v61, %v625_v58 }
 0x120   :  { %v1162_v1 = vpop.f32.mrf.mxu1  ;;  %v1228_v2 = vpop.f32.mrf.mxu0 }
 0x121   :  { %v1038_v5 = vpack.c.bf16 %v838_v63, %v837_v62  ;;  %v1163_v6 = vadd.f32 %v1162_v1, %v1161_v34  ;;  %v803_v37 = vadd.f32 %v802_v55, %v714_v0  ;;  %v649_v34 = vadd.f32 %v1120_v33, %v1652_v43 }
 0x122   :  { %v1164_v7 = vpop.f32.mrf.mxu1  ;;  %v810_v8 = vpop.f32.mrf.mxu0 }
 0x123   :  { %1061 = vst [vmem:[%s1708_s3 + $0x10] sm:$0xff] %v1038_v5   ;;  %v717_v39 = vadd.f32 %v1163_v6, %v628_v4  ;;  %v839_v18 = vmax.f32 %v803_v37, 0.0 }
 0x124   :  { %v1165_v9 = vpop.f32.mrf.mxu1  ;;  %v1231_v10 = vpop.f32.mrf.mxu0 }
 0x125   :  { %v806_v13 = vadd.f32 %v805_v36, %v717_v39  ;;  %v1166_v15 = vadd.f32 %v1165_v9, %v1164_v7  ;;  %v1123_v36 = vadd.f32 %v1645_v38, %v1639_v35 }
 0x126   :  { %v1167_v14 = vpop.f32.mrf.mxu1  ;;  %v813_v16 = vpop.f32.mrf.mxu0 }
 0x127   :  { %v840_v20 = vmax.f32 %v806_v13, 0.0  ;;  %v722_v22 = vadd.f32 %v1166_v15, %v633_v11  ;;  %v652_v5 = vadd.f32 %v1123_v36, %v1652_v43 }
 0x128   :  { %v1168_v24 = vpop.f32.mrf.mxu1  ;;  %v1232_v26 = vpop.f32.mrf.mxu0 }
 0x129   :  { %v1043_v42 = vpack.c.bf16 %v840_v20, %v839_v18  ;;  %v1169_v44 = vadd.f32 %v1168_v24, %v1167_v14  ;;  %v811_v17 = vadd.f32 %v810_v8, %v722_v22 }
 0x12a   :  { %v1170_v45 = vpop.f32.mrf.mxu1  ;;  %v818_v46 = vpop.f32.mrf.mxu0 }
 0x12b   :  { %1062 = vst [vmem:[%s1708_s3 + $0x18] sm:$0xff] %v1043_v42   ;;  %v725_v19 = vadd.f32 %v1169_v44, %v636_v40  ;;  %v841_v51 = vmax.f32 %v811_v17, 0.0 }
 0x12c   :  { %v1171_v28 = vpop.f32.mrf.mxu1  ;;  %v1235_v29 = vpop.f32.mrf.mxu0 }
 0x12d   :  { %v814_v49 = vadd.f32 %v813_v16, %v725_v19  ;;  %v1172_v50 = vadd.f32 %v1171_v28, %v1170_v45 }
 0x12e   :  { %v1173_v21 = vpop.f32.mrf.mxu1  ;;  %v821_v23 = vpop.f32.mrf.mxu0 }
 0x12f   :  { %v842_v52 = vmax.f32 %v814_v49, 0.0  ;;  %v730_v53 = vadd.f32 %v1172_v50, %v641_v47 }
 0x130   :  { %v1174_v54 = vpop.f32.mrf.mxu1  ;;  %v1236_v55 = vpop.f32.mrf.mxu0 }
 0x131   :  { %v1048_v56 = vpack.c.bf16 %v842_v52, %v841_v51  ;;  %v1175_v57 = vadd.f32 %v1174_v54, %v1173_v21  ;;  %v819_v25 = vadd.f32 %v818_v46, %v730_v53 }
 0x132   :  { %v1176_v58 = vpop.f32.mrf.mxu1  ;;  %v826_v59 = vpop.f32.mrf.mxu0 }
 0x133   :  { %1063 = vst [vmem:[%s1708_s3 + $0x20] sm:$0xff] %v1048_v56   ;;  %v733_v27 = vadd.f32 %v1175_v57, %v644_v31  ;;  %v843_v0 = vmax.f32 %v819_v25, 0.0 }
 0x134   :  { %v1177_v60 = vpop.f32.mrf.mxu1  ;;  %v1239_v61 = vpop.f32.mrf.mxu0 }
 0x135   :  { %v822_v62 = vadd.f32 %v821_v23, %v733_v27  ;;  %v1178_v63 = vadd.f32 %v1177_v60, %v1176_v58 }
 0x136   :  { %v1179_v30 = vpop.f32.mrf.mxu1  ;;  %v829_v32 = vpop.f32.mrf.mxu0 }
 0x137   :  { %v844_v1 = vmax.f32 %v822_v62, 0.0  ;;  %v738_v2 = vadd.f32 %v1178_v63, %v649_v34 }
 0x138   :  { %v1180_v3 = vpop.f32.mrf.mxu1  ;;  %v1240_v4 = vpop.f32.mrf.mxu0 }
 0x139   :  { %v1053_v6 = vpack.c.bf16 %v844_v1, %v843_v0  ;;  %v1181_v7 = vadd.f32 %v1180_v3, %v1179_v30  ;;  %v827_v8 = vadd.f32 %v826_v59, %v738_v2 }
 0x13b   :  { %1064 = vst [vmem:[%s1708_s3 + $0x28] sm:$0xff] %v1053_v6   ;;  %v741_v37 = vadd.f32 %v1181_v7, %v652_v5  ;;  %v845_v38 = vmax.f32 %v827_v8, 0.0 }
 0x13d   :  { %v830_v35 = vadd.f32 %v829_v32, %v741_v37 }
 0x13f   :  { %v846_v39 = vmax.f32 %v830_v35, 0.0 }
 0x141   :  { %v1058_v9 = vpack.c.bf16 %v846_v39, %v845_v38 }
 0x143   :  { %1065 = vst [vmem:[%s1708_s3 + $0x30] sm:$0xff] %v1058_v9  }

// kernel: qreps_forward.7
= control target key start
LH: loop header
LB: loop body
LE: loop exit
PB: predicated region body
PF: predicated region fallthrough
CT: control target
= control target key end

     0   :  { %vm9011_vm0 = vmmov 0   ;;  %s11941_s1 = inlined_call_operand.vmem [shape: bf16[3200,512], index: 1, kind: input, shape index: {}]   ;;  %s11942_s0 = inlined_call_operand.vmem [shape: bf16[16,3200], index: 0, kind: input, shape index: {}]   ;;  %s11943_s3 = inlined_call_operand.vmem [shape: bf16[512,128], index: 3, kind: input, shape index: {}]   ;;  %s11944_s2 = inlined_call_operand.vmem [shape: f32[1,512], index: 2, kind: input, shape index: {}]   ;;  %s11945_s5 = inlined_call_operand.vmem [shape: bf16[128,128], index: 5, kind: input, shape index: {}]   ;;  %s11946_s7 = inlined_call_operand.vmem [shape: bf16[128,128], index: 7, kind: input, shape index: {}]   ;;  %s11947_s4 = inlined_call_operand.vmem [shape: f32[1,128], index: 4, kind: input, shape index: {}]   ;;  %s11948_s6 = inlined_call_operand.vmem [shape: f32[1,128], index: 6, kind: input, shape index: {}]   ;;  %s11949_s8 = inlined_call_operand.vmem [shape: f32[1,128], index: 8, kind: input, shape index: {}]   ;;  %s11950_s9 = inlined_call_operand.vmem [shape: f32[16,128], index: 9, kind: output, shape index: {}]  }
   0x1   :  { %v7699_v0 = vld [vmem:[%s11941_s1 + $0xe4] ss:$16 sps:$4 sm:$0xff]   ;;  %v7703_v2 = vld [vmem:[%s11941_s1 + $0xe0] ss:$16 sps:$4 sm:$0xff]  }
   0x2   :  { %v7701_v1 = vld [vmem:[%s11941_s1 + $0x2e4] ss:$16 sps:$4 sm:$0xff]   ;;  %5007 = vmatprep.subr.bf16.mxu0 %v7699_v0  ;;  %v7704_v3 = vld [vmem:[%s11941_s1 + $0x2e0] ss:$16 sps:$4 sm:$0xff]  }
   0x3   :  { %5050 = vmatprep.subr.bf16.mxu1 %v7701_v1  ;;  %v7705_v4 = vld [vmem:[%s11941_s1 + $0xc4] ss:$16 sps:$4 sm:$0xff]   ;;  %5008 = vmatpush1.bf16.msra.mxu0 %v7703_v2  ;;  %v7709_v6 = vld [vmem:[%s11941_s1 + $0xc0] ss:$16 sps:$4 sm:$0xff]  }
   0x4   :  { %5051 = vmatpush1.bf16.msra.mxu1 %v7704_v3  ;;  %v7707_v5 = vld [vmem:[%s11941_s1 + $0x2c4] ss:$16 sps:$4 sm:$0xff]   ;;  %5009 = vmatprep.subr.bf16.mxu0 %v7705_v4  ;;  %v7710_v7 = vld [vmem:[%s11941_s1 + $0x2c0] ss:$16 sps:$4 sm:$0xff]  }
   0x5   :  { %5052 = vmatprep.subr.bf16.mxu1 %v7707_v5  ;;  %v7711_v8 = vld [vmem:[%s11941_s1 + $0xa4] ss:$16 sps:$4 sm:$0xff]   ;;  %v7715_v10 = vld [vmem:[%s11941_s1 + $0xa0] ss:$16 sps:$4 sm:$0xff]   ;;  %v7798_v5 = vld [vmem:[%s11942_s0 + $0x8] ss:$100 sps:$4 sm:$0xff]  }
   0x6   :  { %v7713_v9 = vld [vmem:[%s11941_s1 + $0x2a4] ss:$16 sps:$4 sm:$0xff]   ;;  %v7716_v11 = vld [vmem:[%s11941_s1 + $0x2a0] ss:$16 sps:$4 sm:$0xff]  }
   0x7   :  { %5010 = vmatpush1.bf16.msra.mxu0 %v7709_v6  ;;  %v7717_v12 = vld [vmem:[%s11941_s1 + $0x84] ss:$16 sps:$4 sm:$0xff]   ;;  %v7721_v14 = vld [vmem:[%s11941_s1 + $0x80] ss:$16 sps:$4 sm:$0xff]  }
   0x8   :  { %5053 = vmatpush1.bf16.msra.mxu1 %v7710_v7  ;;  %5011 = vmatprep.subr.bf16.mxu0 %v7711_v8  ;;  %v7719_v13 = vld [vmem:[%s11941_s1 + $0x284] ss:$16 sps:$4 sm:$0xff]   ;;  %v7722_v15 = vld [vmem:[%s11941_s1 + $0x280] ss:$16 sps:$4 sm:$0xff]  }
   0x9   :  { %5054 = vmatprep.subr.bf16.mxu1 %v7713_v9  ;;  %v7723_v16 = vld [vmem:[%s11941_s1 + $0x64] ss:$16 sps:$4 sm:$0xff]   ;;  %v7727_v18 = vld [vmem:[%s11941_s1 + $0x60] ss:$16 sps:$4 sm:$0xff]  }
   0xa   :  { %v7725_v17 = vld [vmem:[%s11941_s1 + $0x264] ss:$16 sps:$4 sm:$0xff]   ;;  %v7728_v19 = vld [vmem:[%s11941_s1 + $0x260] ss:$16 sps:$4 sm:$0xff]  }
   0xb   :  { %5012 = vmatpush1.bf16.msra.mxu0 %v7715_v10  ;;  %v7729_v20 = vld [vmem:[%s11941_s1 + $0x44] ss:$16 sps:$4 sm:$0xff]   ;;  %v7733_v22 = vld [vmem:[%s11941_s1 + $0x40] ss:$16 sps:$4 sm:$0xff]  }
   0xc   :  { %5055 = vmatpush1.bf16.msra.mxu1 %v7716_v11  ;;  %5013 = vmatprep.subr.bf16.mxu0 %v7717_v12  ;;  %v7731_v21 = vld [vmem:[%s11941_s1 + $0x244] ss:$16 sps:$4 sm:$0xff]   ;;  %v7734_v23 = vld [vmem:[%s11941_s1 + $0x240] ss:$16 sps:$4 sm:$0xff]  }
   0xd   :  { %5056 = vmatprep.subr.bf16.mxu1 %v7719_v13  ;;  %v7735_v24 = vld [vmem:[%s11941_s1 + $0x24] ss:$16 sps:$4 sm:$0xff]   ;;  %v7739_v26 = vld [vmem:[%s11941_s1 + $0x20] ss:$16 sps:$4 sm:$0xff]  }
   0xe   :  { %v7737_v25 = vld [vmem:[%s11941_s1 + $0x224] ss:$16 sps:$4 sm:$0xff]   ;;  %v7740_v27 = vld [vmem:[%s11941_s1 + $0x220] ss:$16 sps:$4 sm:$0xff]  }
   0xf   :  { %5014 = vmatpush1.bf16.msra.mxu0 %v7721_v14  ;;  %v7741_v28 = vld [vmem:[%s11941_s1 + $0x4] ss:$16 sps:$4 sm:$0xff]   ;;  %v7745_v30 = vld [vmem:[%s11941_s1] ss:$16 sps:$4 sm:$0xff]  }
  0x10   :  { %5057 = vmatpush1.bf16.msra.mxu1 %v7722_v15  ;;  %5015 = vmatprep.subr.bf16.mxu0 %v7723_v16  ;;  %v7743_v29 = vld [vmem:[%s11941_s1 + $0x204] ss:$16 sps:$4 sm:$0xff]   ;;  %v7746_v31 = vld [vmem:[%s11941_s1 + $0x200] ss:$16 sps:$4 sm:$0xff]  }
  0x11   :  { %5058 = vmatprep.subr.bf16.mxu1 %v7725_v17  ;;  %v7747_v32 = vld [vmem:[%s11941_s1 + $0x1e4] ss:$16 sps:$4 sm:$0xff]   ;;  %v7751_v34 = vld [vmem:[%s11941_s1 + $0x1e0] ss:$16 sps:$4 sm:$0xff]  }
  0x12   :  { %v7749_v33 = vld [vmem:[%s11941_s1 + $0x3e4] ss:$16 sps:$4 sm:$0xff]   ;;  %v7752_v35 = vld [vmem:[%s11941_s1 + $0x3e0] ss:$16 sps:$4 sm:$0xff]  }
  0x13   :  { %5016 = vmatpush1.bf16.msra.mxu0 %v7727_v18  ;;  %v7753_v36 = vld [vmem:[%s11941_s1 + $0x1c4] ss:$16 sps:$4 sm:$0xff]   ;;  %v7757_v38 = vld [vmem:[%s11941_s1 + $0x1c0] ss:$16 sps:$4 sm:$0xff]  }
  0x14   :  { %5059 = vmatpush1.bf16.msra.mxu1 %v7728_v19  ;;  %5017 = vmatprep.subr.bf16.mxu0 %v7729_v20  ;;  %v7755_v37 = vld [vmem:[%s11941_s1 + $0x3c4] ss:$16 sps:$4 sm:$0xff]   ;;  %v7758_v39 = vld [vmem:[%s11941_s1 + $0x3c0] ss:$16 sps:$4 sm:$0xff]  }
  0x15   :  { %5060 = vmatprep.subr.bf16.mxu1 %v7731_v21  ;;  %v7759_v40 = vld [vmem:[%s11941_s1 + $0x1a4] ss:$16 sps:$4 sm:$0xff]   ;;  %v7763_v42 = vld [vmem:[%s11941_s1 + $0x1a0] ss:$16 sps:$4 sm:$0xff]  }
  0x16   :  { %v7761_v41 = vld [vmem:[%s11941_s1 + $0x3a4] ss:$16 sps:$4 sm:$0xff]   ;;  %v7764_v43 = vld [vmem:[%s11941_s1 + $0x3a0] ss:$16 sps:$4 sm:$0xff]  }
  0x17   :  { %5018 = vmatpush1.bf16.msra.mxu0 %v7733_v22  ;;  %v7765_v44 = vld [vmem:[%s11941_s1 + $0x184] ss:$16 sps:$4 sm:$0xff]   ;;  %v7769_v46 = vld [vmem:[%s11941_s1 + $0x180] ss:$16 sps:$4 sm:$0xff]  }
  0x18   :  { %5061 = vmatpush1.bf16.msra.mxu1 %v7734_v23  ;;  %5019 = vmatprep.subr.bf16.mxu0 %v7735_v24  ;;  %v7767_v45 = vld [vmem:[%s11941_s1 + $0x384] ss:$16 sps:$4 sm:$0xff]   ;;  %v7770_v47 = vld [vmem:[%s11941_s1 + $0x380] ss:$16 sps:$4 sm:$0xff]  }
  0x19   :  { %5062 = vmatprep.subr.bf16.mxu1 %v7737_v25  ;;  %v7771_v48 = vld [vmem:[%s11941_s1 + $0x164] ss:$16 sps:$4 sm:$0xff]   ;;  %v7800_v51 = vld [vmem:[%s11942_s0 + $0xc] ss:$100 sps:$4 sm:$0xff]  }
  0x1a   :  { %v7797_v49 = vld [vmem:[%s11942_s0 + $0x4] ss:$100 sps:$4 sm:$0xff]   ;;  %v7775_v52 = vld [vmem:[%s11941_s1 + $0x160] ss:$16 sps:$4 sm:$0xff]   ;;  %5082 = vmatprep.mubr.bf16.mxu1 %v7800_v51 }
  0x1b   :  { %5020 = vmatpush1.bf16.msra.mxu0 %v7739_v26  ;;  %v7773_v50 = vld [vmem:[%s11941_s1 + $0x364] ss:$16 sps:$4 sm:$0xff]   ;;  %5039 = vmatprep.mubr.bf16.mxu0 %v7797_v49  ;;  %v7776_v53 = vld [vmem:[%s11941_s1 + $0x360] ss:$16 sps:$4 sm:$0xff]  }
  0x1c   :  { %5063 = vmatpush1.bf16.msra.mxu1 %v7740_v27  ;;  %5021 = vmatprep.subr.bf16.mxu0 %v7741_v28  ;;  %v7777_v54 = vld [vmem:[%s11941_s1 + $0x144] ss:$16 sps:$4 sm:$0xff]   ;;  %v7781_v56 = vld [vmem:[%s11941_s1 + $0x140] ss:$16 sps:$4 sm:$0xff]  }
  0x1d   :  { %5064 = vmatprep.subr.bf16.mxu1 %v7743_v29  ;;  %v7779_v55 = vld [vmem:[%s11941_s1 + $0x344] ss:$16 sps:$4 sm:$0xff]   ;;  %v7782_v57 = vld [vmem:[%s11941_s1 + $0x340] ss:$16 sps:$4 sm:$0xff]  }
  0x1e   :  { %v7783_v58 = vld [vmem:[%s11941_s1 + $0x124] ss:$16 sps:$4 sm:$0xff]   ;;  %v7787_v60 = vld [vmem:[%s11941_s1 + $0x120] ss:$16 sps:$4 sm:$0xff]  }
  0x1f   :  { %5022 = vmatpush1.bf16.msra.mxu0 %v7745_v30  ;;  %v7785_v59 = vld [vmem:[%s11941_s1 + $0x324] ss:$16 sps:$4 sm:$0xff]   ;;  %v7788_v61 = vld [vmem:[%s11941_s1 + $0x320] ss:$16 sps:$4 sm:$0xff]  }
  0x20   :  { %5065 = vmatpush1.bf16.msra.mxu1 %v7746_v31  ;;  %5023 = vmatprep.subr.bf16.mxu0 %v7747_v32  ;;  %v7789_v62 = vld [vmem:[%s11941_s1 + $0x104] ss:$16 sps:$4 sm:$0xff]   ;;  %v7793_v0 = vld [vmem:[%s11941_s1 + $0x100] ss:$16 sps:$4 sm:$0xff]  }
  0x21   :  { %5066 = vmatprep.subr.bf16.mxu1 %v7749_v33  ;;  %v7791_v63 = vld [vmem:[%s11941_s1 + $0x304] ss:$16 sps:$4 sm:$0xff]   ;;  %v7794_v1 = vld [vmem:[%s11941_s1 + $0x300] ss:$16 sps:$4 sm:$0xff]  }
  0x22   :  { %v7803_v2 = vld [vmem:[%s11941_s1 + $0x4e4] ss:$16 sps:$4 sm:$0xff]   ;;  %v7801_v6 = vld [vmem:[%s11941_s1 + $0x4e0] ss:$16 sps:$4 sm:$0xff]  }
  0x23   :  { %5024 = vmatpush2.bf16.msra.mxu0 %v7751_v34  ;;  %v7806_v3 = vld [vmem:[%s11941_s1 + $0x6e4] ss:$16 sps:$4 sm:$0xff]   ;;  %v7804_v7 = vld [vmem:[%s11941_s1 + $0x6e0] ss:$16 sps:$4 sm:$0xff]  }
  0x24   :  { %5067 = vmatpush2.bf16.msra.mxu1 %v7752_v35  ;;  %5025 = vmatprep.subr.bf16.mxu0 %v7753_v36  ;;  %v7795_v4 = vld [vmem:[%s11942_s0] ss:$100 sps:$4 sm:$0xff]   ;;  %v7899_v34 = vld [vmem:[%s11942_s0 + $0x14] ss:$100 sps:$4 sm:$0xff]  }
  0x25   :  { %5068 = vmatprep.subr.bf16.mxu1 %v7755_v37  ;;  %v7809_v8 = vld [vmem:[%s11941_s1 + $0x4c4] ss:$16 sps:$4 sm:$0xff]   ;;  %v7807_v10 = vld [vmem:[%s11941_s1 + $0x4c0] ss:$16 sps:$4 sm:$0xff]  }
  0x26   :  { %v7812_v9 = vld [vmem:[%s11941_s1 + $0x6c4] ss:$16 sps:$4 sm:$0xff]   ;;  %v7810_v11 = vld [vmem:[%s11941_s1 + $0x6c0] ss:$16 sps:$4 sm:$0xff]  }
  0x27   :  { %5026 = vmatpush2.bf16.msra.mxu0 %v7757_v38  ;;  %v7815_v12 = vld [vmem:[%s11941_s1 + $0x4a4] ss:$16 sps:$4 sm:$0xff]   ;;  %v7813_v14 = vld [vmem:[%s11941_s1 + $0x4a0] ss:$16 sps:$4 sm:$0xff]  }
  0x28   :  { %5069 = vmatpush2.bf16.msra.mxu1 %v7758_v39  ;;  %5027 = vmatprep.subr.bf16.mxu0 %v7759_v40  ;;  %v7818_v13 = vld [vmem:[%s11941_s1 + $0x6a4] ss:$16 sps:$4 sm:$0xff]   ;;  %v7816_v15 = vld [vmem:[%s11941_s1 + $0x6a0] ss:$16 sps:$4 sm:$0xff]  }
  0x29   :  { %5070 = vmatprep.subr.bf16.mxu1 %v7761_v41  ;;  %v7821_v16 = vld [vmem:[%s11941_s1 + $0x484] ss:$16 sps:$4 sm:$0xff]   ;;  %v7819_v18 = vld [vmem:[%s11941_s1 + $0x480] ss:$16 sps:$4 sm:$0xff]  }
  0x2a   :  { %v7824_v17 = vld [vmem:[%s11941_s1 + $0x684] ss:$16 sps:$4 sm:$0xff]   ;;  %v7822_v19 = vld [vmem:[%s11941_s1 + $0x680] ss:$16 sps:$4 sm:$0xff]  }
  0x2b   :  { %5028 = vmatpush2.bf16.msra.mxu0 %v7763_v42  ;;  %v7827_v20 = vld [vmem:[%s11941_s1 + $0x464] ss:$16 sps:$4 sm:$0xff]   ;;  %v7825_v22 = vld [vmem:[%s11941_s1 + $0x460] ss:$16 sps:$4 sm:$0xff]  }
  0x2c   :  { %5071 = vmatpush2.bf16.msra.mxu1 %v7764_v43  ;;  %5029 = vmatprep.subr.bf16.mxu0 %v7765_v44  ;;  %v7830_v21 = vld [vmem:[%s11941_s1 + $0x664] ss:$16 sps:$4 sm:$0xff]   ;;  %v7828_v23 = vld [vmem:[%s11941_s1 + $0x660] ss:$16 sps:$4 sm:$0xff]  }
  0x2d   :  { %5072 = vmatprep.subr.bf16.mxu1 %v7767_v45  ;;  %v7833_v24 = vld [vmem:[%s11941_s1 + $0x444] ss:$16 sps:$4 sm:$0xff]   ;;  %v7831_v26 = vld [vmem:[%s11941_s1 + $0x440] ss:$16 sps:$4 sm:$0xff]  }
  0x2e   :  { %v7836_v25 = vld [vmem:[%s11941_s1 + $0x644] ss:$16 sps:$4 sm:$0xff]   ;;  %v7834_v27 = vld [vmem:[%s11941_s1 + $0x640] ss:$16 sps:$4 sm:$0xff]  }
  0x2f   :  { %5030 = vmatpush2.bf16.msra.mxu0 %v7769_v46  ;;  %v7839_v28 = vld [vmem:[%s11941_s1 + $0x424] ss:$16 sps:$4 sm:$0xff]   ;;  %v7837_v30 = vld [vmem:[%s11941_s1 + $0x420] ss:$16 sps:$4 sm:$0xff]  }
  0x30   :  { %5073 = vmatpush2.bf16.msra.mxu1 %v7770_v47  ;;  %5031 = vmatprep.subr.bf16.mxu0 %v7771_v48  ;;  %v7842_v29 = vld [vmem:[%s11941_s1 + $0x624] ss:$16 sps:$4 sm:$0xff]   ;;  %v7840_v31 = vld [vmem:[%s11941_s1 + $0x620] ss:$16 sps:$4 sm:$0xff]  }
  0x31   :  { %5074 = vmatprep.subr.bf16.mxu1 %v7773_v50  ;;  %v7845_v32 = vld [vmem:[%s11941_s1 + $0x404] ss:$16 sps:$4 sm:$0xff]   ;;  %v7902_v35 = vld [vmem:[%s11942_s0 + $0x1c] ss:$100 sps:$4 sm:$0xff]  }
  0x32   :  { %v7848_v33 = vld [vmem:[%s11941_s1 + $0x604] ss:$16 sps:$4 sm:$0xff]   ;;  %v7843_v36 = vld [vmem:[%s11941_s1 + $0x400] ss:$16 sps:$4 sm:$0xff]  }
  0x33   :  { %5032 = vmatpush2.bf16.msra.mxu0 %v7775_v52  ;;  %v7846_v37 = vld [vmem:[%s11941_s1 + $0x600] ss:$16 sps:$4 sm:$0xff]   ;;  %v7851_v38 = vld [vmem:[%s11941_s1 + $0x5e4] ss:$16 sps:$4 sm:$0xff]  }
  0x34   :  { %5075 = vmatpush2.bf16.msra.mxu1 %v7776_v53  ;;  %5033 = vmatprep.subr.bf16.mxu0 %v7777_v54  ;;  %v7854_v39 = vld [vmem:[%s11941_s1 + $0x7e4] ss:$16 sps:$4 sm:$0xff]   ;;  %v7849_v40 = vld [vmem:[%s11941_s1 + $0x5e0] ss:$16 sps:$4 sm:$0xff]  }
  0x35   :  { %5076 = vmatprep.subr.bf16.mxu1 %v7779_v55  ;;  %v7852_v41 = vld [vmem:[%s11941_s1 + $0x7e0] ss:$16 sps:$4 sm:$0xff]   ;;  %v7857_v42 = vld [vmem:[%s11941_s1 + $0x5c4] ss:$16 sps:$4 sm:$0xff]  }
  0x36   :  { %v7860_v43 = vld [vmem:[%s11941_s1 + $0x7c4] ss:$16 sps:$4 sm:$0xff]   ;;  %v7855_v44 = vld [vmem:[%s11941_s1 + $0x5c0] ss:$16 sps:$4 sm:$0xff]  }
  0x37   :  { %5034 = vmatpush2.bf16.msra.mxu0 %v7781_v56  ;;  %v7858_v45 = vld [vmem:[%s11941_s1 + $0x7c0] ss:$16 sps:$4 sm:$0xff]   ;;  %v7863_v46 = vld [vmem:[%s11941_s1 + $0x5a4] ss:$16 sps:$4 sm:$0xff]  }
  0x38   :  { %5077 = vmatpush2.bf16.msra.mxu1 %v7782_v57  ;;  %5035 = vmatprep.subr.bf16.mxu0 %v7783_v58  ;;  %v7866_v47 = vld [vmem:[%s11941_s1 + $0x7a4] ss:$16 sps:$4 sm:$0xff]   ;;  %v7861_v48 = vld [vmem:[%s11941_s1 + $0x5a0] ss:$16 sps:$4 sm:$0xff]  }
  0x39   :  { %5078 = vmatprep.subr.bf16.mxu1 %v7785_v59  ;;  %v7864_v49 = vld [vmem:[%s11941_s1 + $0x7a0] ss:$16 sps:$4 sm:$0xff]   ;;  %v7869_v50 = vld [vmem:[%s11941_s1 + $0x584] ss:$16 sps:$4 sm:$0xff]  }
  0x3a   :  { %v7872_v51 = vld [vmem:[%s11941_s1 + $0x784] ss:$16 sps:$4 sm:$0xff]   ;;  %v7867_v52 = vld [vmem:[%s11941_s1 + $0x580] ss:$16 sps:$4 sm:$0xff]  }
  0x3b   :  { %5036 = vmatpush2.bf16.msra.mxu0 %v7787_v60  ;;  %v7870_v53 = vld [vmem:[%s11941_s1 + $0x780] ss:$16 sps:$4 sm:$0xff]   ;;  %v7875_v54 = vld [vmem:[%s11941_s1 + $0x564] ss:$16 sps:$4 sm:$0xff]  }
  0x3c   :  { %5079 = vmatpush2.bf16.msra.mxu1 %v7788_v61  ;;  %5037 = vmatprep.subr.bf16.mxu0 %v7789_v62  ;;  %v7878_v55 = vld [vmem:[%s11941_s1 + $0x764] ss:$16 sps:$4 sm:$0xff]   ;;  %v7873_v56 = vld [vmem:[%s11941_s1 + $0x560] ss:$16 sps:$4 sm:$0xff]  }
  0x3d   :  { %5080 = vmatprep.subr.bf16.mxu1 %v7791_v63  ;;  %v7876_v57 = vld [vmem:[%s11941_s1 + $0x760] ss:$16 sps:$4 sm:$0xff]   ;;  %v7881_v58 = vld [vmem:[%s11941_s1 + $0x544] ss:$16 sps:$4 sm:$0xff]  }
  0x3e   :  { %v7884_v59 = vld [vmem:[%s11941_s1 + $0x744] ss:$16 sps:$4 sm:$0xff]   ;;  %v7879_v60 = vld [vmem:[%s11941_s1 + $0x540] ss:$16 sps:$4 sm:$0xff]  }
  0x3f   :  { %5038 = vmatpush2.bf16.msra.mxu0 %v7793_v0  ;;  %v7882_v61 = vld [vmem:[%s11941_s1 + $0x740] ss:$16 sps:$4 sm:$0xff]   ;;  %v7887_v62 = vld [vmem:[%s11941_s1 + $0x524] ss:$16 sps:$4 sm:$0xff]  }
  0x40   :  { %5081 = vmatpush2.bf16.msra.mxu1 %v7794_v1  ;;  %5093 = vmatprep.subr.bf16.mxu0 %v7803_v2  ;;  %v7890_v63 = vld [vmem:[%s11941_s1 + $0x724] ss:$16 sps:$4 sm:$0xff]   ;;  %v7885_v0 = vld [vmem:[%s11941_s1 + $0x520] ss:$16 sps:$4 sm:$0xff]  }
  0x41   :  { %5136 = vmatprep.subr.bf16.mxu1 %v7806_v3  ;;  %v7888_v1 = vld [vmem:[%s11941_s1 + $0x720] ss:$16 sps:$4 sm:$0xff]   ;;  %v7893_v2 = vld [vmem:[%s11941_s1 + $0x504] ss:$16 sps:$4 sm:$0xff]  }
  0x42   :  { %5040 = vmatmul.mubr.bf16.vlgmr.msra.gmra.mxu0 %v7795_v4  ;;  %v7896_v3 = vld [vmem:[%s11941_s1 + $0x704] ss:$16 sps:$4 sm:$0xff]   ;;  %v7891_v4 = vld [vmem:[%s11941_s1 + $0x500] ss:$16 sps:$4 sm:$0xff]  }
  0x43   :  { %5083 = vmatmul.mubr.bf16.vlgmr.msra.gmra.mxu1 %v7798_v5  ;;  %5094 = vmatpush1.bf16.msra.mxu0 %v7801_v6  ;;  %v7894_v5 = vld [vmem:[%s11941_s1 + $0x700] ss:$16 sps:$4 sm:$0xff]   ;;  %v7905_v6 = vld [vmem:[%s11941_s1 + $0x8e4] ss:$16 sps:$4 sm:$0xff]  }
  0x44   :  { %5137 = vmatpush1.bf16.msra.mxu1 %v7804_v7  ;;  %5095 = vmatprep.subr.bf16.mxu0 %v7809_v8  ;;  %v7908_v7 = vld [vmem:[%s11941_s1 + $0xae4] ss:$16 sps:$4 sm:$0xff]  }
  0x45   :  { %5138 = vmatprep.subr.bf16.mxu1 %v7812_v9  ;;  %5125 = vmatprep.mubr.bf16.mxu0 %v7899_v34  ;;  %v7897_v8 = vld [vmem:[%s11942_s0 + $0x10] ss:$100 sps:$4 sm:$0xff]   ;;  %v7900_v9 = vld [vmem:[%s11942_s0 + $0x18] ss:$100 sps:$4 sm:$0xff]  }
  0x46   :  { %5168 = vmatprep.mubr.bf16.mxu1 %v7902_v35  ;;  %v7941_v34 = vld [vmem:[%s11941_s1 + $0x824] ss:$16 sps:$4 sm:$0xff]  }
  0x47   :  { %5096 = vmatpush1.bf16.msra.mxu0 %v7807_v10  ;;  %v7903_v10 = vld [vmem:[%s11941_s1 + $0x8e0] ss:$16 sps:$4 sm:$0xff]   ;;  %v7944_v35 = vld [vmem:[%s11941_s1 + $0xa24] ss:$16 sps:$4 sm:$0xff]  }
  0x48   :  { %5139 = vmatpush1.bf16.msra.mxu1 %v7810_v11  ;;  %5097 = vmatprep.subr.bf16.mxu0 %v7815_v12  ;;  %v7906_v11 = vld [vmem:[%s11941_s1 + $0xae0] ss:$16 sps:$4 sm:$0xff]   ;;  %v7911_v12 = vld [vmem:[%s11941_s1 + $0x8c4] ss:$16 sps:$4 sm:$0xff]  }
  0x49   :  { %5140 = vmatprep.subr.bf16.mxu1 %v7818_v13  ;;  %v7914_v13 = vld [vmem:[%s11941_s1 + $0xac4] ss:$16 sps:$4 sm:$0xff]  }
  0x4b   :  { %5098 = vmatpush1.bf16.msra.mxu0 %v7813_v14  ;;  %v7909_v14 = vld [vmem:[%s11941_s1 + $0x8c0] ss:$16 sps:$4 sm:$0xff]  }
  0x4c   :  { %5141 = vmatpush1.bf16.msra.mxu1 %v7816_v15  ;;  %5099 = vmatprep.subr.bf16.mxu0 %v7821_v16  ;;  %v7912_v15 = vld [vmem:[%s11941_s1 + $0xac0] ss:$16 sps:$4 sm:$0xff]   ;;  %v7917_v16 = vld [vmem:[%s11941_s1 + $0x8a4] ss:$16 sps:$4 sm:$0xff]  }
  0x4d   :  { %5142 = vmatprep.subr.bf16.mxu1 %v7824_v17  ;;  %v7920_v17 = vld [vmem:[%s11941_s1 + $0xaa4] ss:$16 sps:$4 sm:$0xff]  }
  0x4f   :  { %5100 = vmatpush1.bf16.msra.mxu0 %v7819_v18  ;;  %v7915_v18 = vld [vmem:[%s11941_s1 + $0x8a0] ss:$16 sps:$4 sm:$0xff]  }
  0x50   :  { %5143 = vmatpush1.bf16.msra.mxu1 %v7822_v19  ;;  %5101 = vmatprep.subr.bf16.mxu0 %v7827_v20  ;;  %v8001_v19 = vld [vmem:[%s11942_s0 + $0x24] ss:$100 sps:$4 sm:$0xff]   ;;  %v7918_v20 = vld [vmem:[%s11941_s1 + $0xaa0] ss:$16 sps:$4 sm:$0xff]  }
  0x51   :  { %5144 = vmatprep.subr.bf16.mxu1 %v7830_v21  ;;  %v8004_v21 = vld [vmem:[%s11942_s0 + $0x2c] ss:$100 sps:$4 sm:$0xff]  }
  0x53   :  { %5102 = vmatpush1.bf16.msra.mxu0 %v7825_v22  ;;  %v7923_v22 = vld [vmem:[%s11941_s1 + $0x884] ss:$16 sps:$4 sm:$0xff]  }
  0x54   :  { %5145 = vmatpush1.bf16.msra.mxu1 %v7828_v23  ;;  %5103 = vmatprep.subr.bf16.mxu0 %v7833_v24  ;;  %v7926_v23 = vld [vmem:[%s11941_s1 + $0xa84] ss:$16 sps:$4 sm:$0xff]   ;;  %v7921_v24 = vld [vmem:[%s11941_s1 + $0x880] ss:$16 sps:$4 sm:$0xff]  }
  0x55   :  { %5146 = vmatprep.subr.bf16.mxu1 %v7836_v25  ;;  %v7924_v25 = vld [vmem:[%s11941_s1 + $0xa80] ss:$16 sps:$4 sm:$0xff]  }
  0x57   :  { %5104 = vmatpush1.bf16.msra.mxu0 %v7831_v26  ;;  %v7929_v26 = vld [vmem:[%s11941_s1 + $0x864] ss:$16 sps:$4 sm:$0xff]  }
  0x58   :  { %5147 = vmatpush1.bf16.msra.mxu1 %v7834_v27  ;;  %5105 = vmatprep.subr.bf16.mxu0 %v7839_v28  ;;  %v7932_v27 = vld [vmem:[%s11941_s1 + $0xa64] ss:$16 sps:$4 sm:$0xff]   ;;  %v7927_v28 = vld [vmem:[%s11941_s1 + $0x860] ss:$16 sps:$4 sm:$0xff]  }
  0x59   :  { %5148 = vmatprep.subr.bf16.mxu1 %v7842_v29  ;;  %v7930_v29 = vld [vmem:[%s11941_s1 + $0xa60] ss:$16 sps:$4 sm:$0xff]  }
  0x5b   :  { %5106 = vmatpush1.bf16.msra.mxu0 %v7837_v30  ;;  %v7935_v30 = vld [vmem:[%s11941_s1 + $0x844] ss:$16 sps:$4 sm:$0xff]  }
  0x5c   :  { %5149 = vmatpush1.bf16.msra.mxu1 %v7840_v31  ;;  %5107 = vmatprep.subr.bf16.mxu0 %v7845_v32  ;;  %v7938_v31 = vld [vmem:[%s11941_s1 + $0xa44] ss:$16 sps:$4 sm:$0xff]   ;;  %v7933_v32 = vld [vmem:[%s11941_s1 + $0x840] ss:$16 sps:$4 sm:$0xff]  }
  0x5d   :  { %5150 = vmatprep.subr.bf16.mxu1 %v7848_v33  ;;  %v7936_v33 = vld [vmem:[%s11941_s1 + $0xa40] ss:$16 sps:$4 sm:$0xff]  }
  0x5f   :  { %5108 = vmatpush1.bf16.msra.mxu0 %v7843_v36  ;;  %v7939_v36 = vld [vmem:[%s11941_s1 + $0x820] ss:$16 sps:$4 sm:$0xff]  }
  0x60   :  { %5151 = vmatpush1.bf16.msra.mxu1 %v7846_v37  ;;  %5109 = vmatprep.subr.bf16.mxu0 %v7851_v38  ;;  %v7942_v37 = vld [vmem:[%s11941_s1 + $0xa20] ss:$16 sps:$4 sm:$0xff]   ;;  %v7947_v38 = vld [vmem:[%s11941_s1 + $0x804] ss:$16 sps:$4 sm:$0xff]  }
  0x61   :  { %5152 = vmatprep.subr.bf16.mxu1 %v7854_v39  ;;  %v7950_v39 = vld [vmem:[%s11941_s1 + $0xa04] ss:$16 sps:$4 sm:$0xff]  }
  0x63   :  { %5110 = vmatpush2.bf16.msra.mxu0 %v7849_v40  ;;  %v7945_v40 = vld [vmem:[%s11941_s1 + $0x800] ss:$16 sps:$4 sm:$0xff]  }
  0x64   :  { %5153 = vmatpush2.bf16.msra.mxu1 %v7852_v41  ;;  %5111 = vmatprep.subr.bf16.mxu0 %v7857_v42  ;;  %v7948_v41 = vld [vmem:[%s11941_s1 + $0xa00] ss:$16 sps:$4 sm:$0xff]   ;;  %v7953_v42 = vld [vmem:[%s11941_s1 + $0x9e4] ss:$16 sps:$4 sm:$0xff]  }
  0x65   :  { %5154 = vmatprep.subr.bf16.mxu1 %v7860_v43  ;;  %v7956_v43 = vld [vmem:[%s11941_s1 + $0xbe4] ss:$16 sps:$4 sm:$0xff]  }
  0x67   :  { %5112 = vmatpush2.bf16.msra.mxu0 %v7855_v44  ;;  %v7951_v44 = vld [vmem:[%s11941_s1 + $0x9e0] ss:$16 sps:$4 sm:$0xff]  }
  0x68   :  { %5155 = vmatpush2.bf16.msra.mxu1 %v7858_v45  ;;  %5113 = vmatprep.subr.bf16.mxu0 %v7863_v46  ;;  %v7954_v45 = vld [vmem:[%s11941_s1 + $0xbe0] ss:$16 sps:$4 sm:$0xff]   ;;  %v7959_v46 = vld [vmem:[%s11941_s1 + $0x9c4] ss:$16 sps:$4 sm:$0xff]  }
  0x69   :  { %5156 = vmatprep.subr.bf16.mxu1 %v7866_v47  ;;  %v7962_v47 = vld [vmem:[%s11941_s1 + $0xbc4] ss:$16 sps:$4 sm:$0xff]  }
  0x6b   :  { %5114 = vmatpush2.bf16.msra.mxu0 %v7861_v48  ;;  %v7957_v48 = vld [vmem:[%s11941_s1 + $0x9c0] ss:$16 sps:$4 sm:$0xff]  }
  0x6c   :  { %5157 = vmatpush2.bf16.msra.mxu1 %v7864_v49  ;;  %5115 = vmatprep.subr.bf16.mxu0 %v7869_v50  ;;  %v7960_v49 = vld [vmem:[%s11941_s1 + $0xbc0] ss:$16 sps:$4 sm:$0xff]   ;;  %v7965_v50 = vld [vmem:[%s11941_s1 + $0x9a4] ss:$16 sps:$4 sm:$0xff]  }
  0x6d   :  { %5158 = vmatprep.subr.bf16.mxu1 %v7872_v51  ;;  %v7968_v51 = vld [vmem:[%s11941_s1 + $0xba4] ss:$16 sps:$4 sm:$0xff]  }
  0x6f   :  { %5116 = vmatpush2.bf16.msra.mxu0 %v7867_v52  ;;  %v7963_v52 = vld [vmem:[%s11941_s1 + $0x9a0] ss:$16 sps:$4 sm:$0xff]  }
  0x70   :  { %5159 = vmatpush2.bf16.msra.mxu1 %v7870_v53  ;;  %5117 = vmatprep.subr.bf16.mxu0 %v7875_v54  ;;  %v7966_v53 = vld [vmem:[%s11941_s1 + $0xba0] ss:$16 sps:$4 sm:$0xff]   ;;  %v7971_v54 = vld [vmem:[%s11941_s1 + $0x984] ss:$16 sps:$4 sm:$0xff]  }
  0x71   :  { %5160 = vmatprep.subr.bf16.mxu1 %v7878_v55  ;;  %v7974_v55 = vld [vmem:[%s11941_s1 + $0xb84] ss:$16 sps:$4 sm:$0xff]  }
  0x73   :  { %5118 = vmatpush2.bf16.msra.mxu0 %v7873_v56  ;;  %v7969_v56 = vld [vmem:[%s11941_s1 + $0x980] ss:$16 sps:$4 sm:$0xff]  }
  0x74   :  { %5161 = vmatpush2.bf16.msra.mxu1 %v7876_v57  ;;  %5119 = vmatprep.subr.bf16.mxu0 %v7881_v58  ;;  %v7972_v57 = vld [vmem:[%s11941_s1 + $0xb80] ss:$16 sps:$4 sm:$0xff]   ;;  %v7977_v58 = vld [vmem:[%s11941_s1 + $0x964] ss:$16 sps:$4 sm:$0xff]  }
  0x75   :  { %5162 = vmatprep.subr.bf16.mxu1 %v7884_v59  ;;  %v7980_v59 = vld [vmem:[%s11941_s1 + $0xb64] ss:$16 sps:$4 sm:$0xff]  }
  0x77   :  { %5120 = vmatpush2.bf16.msra.mxu0 %v7879_v60  ;;  %v7975_v60 = vld [vmem:[%s11941_s1 + $0x960] ss:$16 sps:$4 sm:$0xff]  }
  0x78   :  { %5163 = vmatpush2.bf16.msra.mxu1 %v7882_v61  ;;  %5121 = vmatprep.subr.bf16.mxu0 %v7887_v62  ;;  %v7978_v61 = vld [vmem:[%s11941_s1 + $0xb60] ss:$16 sps:$4 sm:$0xff]   ;;  %v7983_v62 = vld [vmem:[%s11941_s1 + $0x944] ss:$16 sps:$4 sm:$0xff]  }
  0x79   :  { %5164 = vmatprep.subr.bf16.mxu1 %v7890_v63  ;;  %v7986_v63 = vld [vmem:[%s11941_s1 + $0xb44] ss:$16 sps:$4 sm:$0xff]  }
  0x7b   :  { %5122 = vmatpush2.bf16.msra.mxu0 %v7885_v0  ;;  %v7981_v0 = vld [vmem:[%s11941_s1 + $0x940] ss:$16 sps:$4 sm:$0xff]  }
  0x7c   :  { %5165 = vmatpush2.bf16.msra.mxu1 %v7888_v1  ;;  %5123 = vmatprep.subr.bf16.mxu0 %v7893_v2  ;;  %v7984_v1 = vld [vmem:[%s11941_s1 + $0xb40] ss:$16 sps:$4 sm:$0xff]   ;;  %v7989_v2 = vld [vmem:[%s11941_s1 + $0x924] ss:$16 sps:$4 sm:$0xff]  }
  0x7d   :  { %5166 = vmatprep.subr.bf16.mxu1 %v7896_v3  ;;  %v7992_v3 = vld [vmem:[%s11941_s1 + $0xb24] ss:$16 sps:$4 sm:$0xff]  }
  0x7f   :  { %5124 = vmatpush2.bf16.msra.mxu0 %v7891_v4  ;;  %v7987_v4 = vld [vmem:[%s11941_s1 + $0x920] ss:$16 sps:$4 sm:$0xff]  }
  0x80   :  { %5167 = vmatpush2.bf16.msra.mxu1 %v7894_v5  ;;  %5179 = vmatprep.subr.bf16.mxu0 %v7905_v6  ;;  %v7990_v5 = vld [vmem:[%s11941_s1 + $0xb20] ss:$16 sps:$4 sm:$0xff]   ;;  %v7995_v6 = vld [vmem:[%s11941_s1 + $0x904] ss:$16 sps:$4 sm:$0xff]  }
  0x81   :  { %5222 = vmatprep.subr.bf16.mxu1 %v7908_v7  ;;  %v7998_v7 = vld [vmem:[%s11941_s1 + $0xb04] ss:$16 sps:$4 sm:$0xff]  }
  0x82   :  { %5126 = vmatmul.mubr.bf16.vlgmr.msra.gmra.mxu0 %v7897_v8  ;;  %v7993_v8 = vld [vmem:[%s11941_s1 + $0x900] ss:$16 sps:$4 sm:$0xff]  }
  0x83   :  { %5169 = vmatmul.mubr.bf16.vlgmr.msra.gmra.mxu1 %v7900_v9  ;;  %5180 = vmatpush1.bf16.msra.mxu0 %v7903_v10  ;;  %v7996_v9 = vld [vmem:[%s11941_s1 + $0xb00] ss:$16 sps:$4 sm:$0xff]   ;;  %v8007_v10 = vld [vmem:[%s11941_s1 + $0xce4] ss:$16 sps:$4 sm:$0xff]  }
  0x84   :  { %5223 = vmatpush1.bf16.msra.mxu1 %v7906_v11  ;;  %5181 = vmatprep.subr.bf16.mxu0 %v7911_v12  ;;  %v8010_v11 = vld [vmem:[%s11941_s1 + $0xee4] ss:$16 sps:$4 sm:$0xff]  }
  0x85   :  { %5224 = vmatprep.subr.bf16.mxu1 %v7914_v13  ;;  %5211 = vmatprep.mubr.bf16.mxu0 %v8001_v19  ;;  %v7999_v12 = vld [vmem:[%s11942_s0 + $0x20] ss:$100 sps:$4 sm:$0xff]   ;;  %v8002_v13 = vld [vmem:[%s11942_s0 + $0x28] ss:$100 sps:$4 sm:$0xff]  }
  0x86   :  { %5254 = vmatprep.mubr.bf16.mxu1 %v8004_v21  ;;  %v8106_v19 = vld [vmem:[%s11942_s0 + $0x3c] ss:$100 sps:$4 sm:$0xff]  }
  0x87   :  { %5182 = vmatpush1.bf16.msra.mxu0 %v7909_v14  ;;  %v8005_v14 = vld [vmem:[%s11941_s1 + $0xce0] ss:$16 sps:$4 sm:$0xff]  }
  0x88   :  { %5225 = vmatpush1.bf16.msra.mxu1 %v7912_v15  ;;  %5183 = vmatprep.subr.bf16.mxu0 %v7917_v16  ;;  %v8008_v15 = vld [vmem:[%s11941_s1 + $0xee0] ss:$16 sps:$4 sm:$0xff]   ;;  %v8013_v16 = vld [vmem:[%s11941_s1 + $0xcc4] ss:$16 sps:$4 sm:$0xff]  }
  0x89   :  { %5226 = vmatprep.subr.bf16.mxu1 %v7920_v17  ;;  %v8016_v17 = vld [vmem:[%s11941_s1 + $0xec4] ss:$16 sps:$4 sm:$0xff]   ;;  %v8014_v21 = vld [vmem:[%s11941_s1 + $0xec0] ss:$16 sps:$4 sm:$0xff]  }
  0x8b   :  { %5184 = vmatpush1.bf16.msra.mxu0 %v7915_v18  ;;  %v8103_v18 = vld [vmem:[%s11942_s0 + $0x34] ss:$100 sps:$4 sm:$0xff]  }
  0x8c   :  { %5227 = vmatpush1.bf16.msra.mxu1 %v7918_v20  ;;  %5185 = vmatprep.subr.bf16.mxu0 %v7923_v22  ;;  %v8011_v20 = vld [vmem:[%s11941_s1 + $0xcc0] ss:$16 sps:$4 sm:$0xff]   ;;  %v8019_v22 = vld [vmem:[%s11941_s1 + $0xca4] ss:$16 sps:$4 sm:$0xff]  }
  0x8d   :  { %5228 = vmatprep.subr.bf16.mxu1 %v7926_v23  ;;  %v8022_v23 = vld [vmem:[%s11941_s1 + $0xea4] ss:$16 sps:$4 sm:$0xff]  }
  0x8f   :  { %5186 = vmatpush1.bf16.msra.mxu0 %v7921_v24  ;;  %v8017_v24 = vld [vmem:[%s11941_s1 + $0xca0] ss:$16 sps:$4 sm:$0xff]  }
  0x90   :  { %5229 = vmatpush1.bf16.msra.mxu1 %v7924_v25  ;;  %5187 = vmatprep.subr.bf16.mxu0 %v7929_v26  ;;  %v8020_v25 = vld [vmem:[%s11941_s1 + $0xea0] ss:$16 sps:$4 sm:$0xff]   ;;  %v8025_v26 = vld [vmem:[%s11941_s1 + $0xc84] ss:$16 sps:$4 sm:$0xff]  }
  0x91   :  { %5230 = vmatprep.subr.bf16.mxu1 %v7932_v27  ;;  %v8028_v27 = vld [vmem:[%s11941_s1 + $0xe84] ss:$16 sps:$4 sm:$0xff]  }
  0x93   :  { %5188 = vmatpush1.bf16.msra.mxu0 %v7927_v28  ;;  %v8023_v28 = vld [vmem:[%s11941_s1 + $0xc80] ss:$16 sps:$4 sm:$0xff]  }
  0x94   :  { %5231 = vmatpush1.bf16.msra.mxu1 %v7930_v29  ;;  %5189 = vmatprep.subr.bf16.mxu0 %v7935_v30  ;;  %v8026_v29 = vld [vmem:[%s11941_s1 + $0xe80] ss:$16 sps:$4 sm:$0xff]   ;;  %v8031_v30 = vld [vmem:[%s11941_s1 + $0xc64] ss:$16 sps:$4 sm:$0xff]  }
  0x95   :  { %5232 = vmatprep.subr.bf16.mxu1 %v7938_v31  ;;  %v8034_v31 = vld [vmem:[%s11941_s1 + $0xe64] ss:$16 sps:$4 sm:$0xff]  }
  0x97   :  { %5190 = vmatpush1.bf16.msra.mxu0 %v7933_v32  ;;  %v8029_v32 = vld [vmem:[%s11941_s1 + $0xc60] ss:$16 sps:$4 sm:$0xff]  }
  0x98   :  { %5233 = vmatpush1.bf16.msra.mxu1 %v7936_v33  ;;  %5191 = vmatprep.subr.bf16.mxu0 %v7941_v34  ;;  %v8032_v33 = vld [vmem:[%s11941_s1 + $0xe60] ss:$16 sps:$4 sm:$0xff]   ;;  %v8037_v34 = vld [vmem:[%s11941_s1 + $0xc44] ss:$16 sps:$4 sm:$0xff]  }
  0x99   :  { %5234 = vmatprep.subr.bf16.mxu1 %v7944_v35  ;;  %v8040_v35 = vld [vmem:[%s11941_s1 + $0xe44] ss:$16 sps:$4 sm:$0xff]  }
  0x9b   :  { %5192 = vmatpush1.bf16.msra.mxu0 %v7939_v36  ;;  %v8035_v36 = vld [vmem:[%s11941_s1 + $0xc40] ss:$16 sps:$4 sm:$0xff]  }
  0x9c   :  { %5235 = vmatpush1.bf16.msra.mxu1 %v7942_v37  ;;  %5193 = vmatprep.subr.bf16.mxu0 %v7947_v38  ;;  %v8038_v37 = vld [vmem:[%s11941_s1 + $0xe40] ss:$16 sps:$4 sm:$0xff]   ;;  %v8043_v38 = vld [vmem:[%s11941_s1 + $0xc24] ss:$16 sps:$4 sm:$0xff]  }
  0x9d   :  { %5236 = vmatprep.subr.bf16.mxu1 %v7950_v39  ;;  %v8046_v39 = vld [vmem:[%s11941_s1 + $0xe24] ss:$16 sps:$4 sm:$0xff]  }
  0x9f   :  { %5194 = vmatpush1.bf16.msra.mxu0 %v7945_v40  ;;  %v8041_v40 = vld [vmem:[%s11941_s1 + $0xc20] ss:$16 sps:$4 sm:$0xff]  }
  0xa0   :  { %5237 = vmatpush1.bf16.msra.mxu1 %v7948_v41  ;;  %5195 = vmatprep.subr.bf16.mxu0 %v7953_v42  ;;  %v8044_v41 = vld [vmem:[%s11941_s1 + $0xe20] ss:$16 sps:$4 sm:$0xff]   ;;  %v8049_v42 = vld [vmem:[%s11941_s1 + $0xc04] ss:$16 sps:$4 sm:$0xff]  }
  0xa1   :  { %5238 = vmatprep.subr.bf16.mxu1 %v7956_v43  ;;  %v8052_v43 = vld [vmem:[%s11941_s1 + $0xe04] ss:$16 sps:$4 sm:$0xff]  }
  0xa3   :  { %5196 = vmatpush2.bf16.msra.mxu0 %v7951_v44  ;;  %v8047_v44 = vld [vmem:[%s11941_s1 + $0xc00] ss:$16 sps:$4 sm:$0xff]  }
  0xa4   :  { %5239 = vmatpush2.bf16.msra.mxu1 %v7954_v45  ;;  %5197 = vmatprep.subr.bf16.mxu0 %v7959_v46  ;;  %v8050_v45 = vld [vmem:[%s11941_s1 + $0xe00] ss:$16 sps:$4 sm:$0xff]   ;;  %v8055_v46 = vld [vmem:[%s11941_s1 + $0xde4] ss:$16 sps:$4 sm:$0xff]  }
  0xa5   :  { %5240 = vmatprep.subr.bf16.mxu1 %v7962_v47  ;;  %v8058_v47 = vld [vmem:[%s11941_s1 + $0xfe4] ss:$16 sps:$4 sm:$0xff]  }
  0xa7   :  { %5198 = vmatpush2.bf16.msra.mxu0 %v7957_v48  ;;  %v8053_v48 = vld [vmem:[%s11941_s1 + $0xde0] ss:$16 sps:$4 sm:$0xff]  }
  0xa8   :  { %5241 = vmatpush2.bf16.msra.mxu1 %v7960_v49  ;;  %5199 = vmatprep.subr.bf16.mxu0 %v7965_v50  ;;  %v8056_v49 = vld [vmem:[%s11941_s1 + $0xfe0] ss:$16 sps:$4 sm:$0xff]   ;;  %v8061_v50 = vld [vmem:[%s11941_s1 + $0xdc4] ss:$16 sps:$4 sm:$0xff]  }
  0xa9   :  { %5242 = vmatprep.subr.bf16.mxu1 %v7968_v51  ;;  %v8064_v51 = vld [vmem:[%s11941_s1 + $0xfc4] ss:$16 sps:$4 sm:$0xff]  }
  0xab   :  { %5200 = vmatpush2.bf16.msra.mxu0 %v7963_v52  ;;  %v8059_v52 = vld [vmem:[%s11941_s1 + $0xdc0] ss:$16 sps:$4 sm:$0xff]  }
  0xac   :  { %5243 = vmatpush2.bf16.msra.mxu1 %v7966_v53  ;;  %5201 = vmatprep.subr.bf16.mxu0 %v7971_v54  ;;  %v8062_v53 = vld [vmem:[%s11941_s1 + $0xfc0] ss:$16 sps:$4 sm:$0xff]   ;;  %v8067_v54 = vld [vmem:[%s11941_s1 + $0xda4] ss:$16 sps:$4 sm:$0xff]  }
  0xad   :  { %5244 = vmatprep.subr.bf16.mxu1 %v7974_v55  ;;  %v8070_v55 = vld [vmem:[%s11941_s1 + $0xfa4] ss:$16 sps:$4 sm:$0xff]  }
  0xaf   :  { %5202 = vmatpush2.bf16.msra.mxu0 %v7969_v56  ;;  %v8065_v56 = vld [vmem:[%s11941_s1 + $0xda0] ss:$16 sps:$4 sm:$0xff]  }
  0xb0   :  { %5245 = vmatpush2.bf16.msra.mxu1 %v7972_v57  ;;  %5203 = vmatprep.subr.bf16.mxu0 %v7977_v58  ;;  %v8068_v57 = vld [vmem:[%s11941_s1 + $0xfa0] ss:$16 sps:$4 sm:$0xff]   ;;  %v8073_v58 = vld [vmem:[%s11941_s1 + $0xd84] ss:$16 sps:$4 sm:$0xff]  }
  0xb1   :  { %5246 = vmatprep.subr.bf16.mxu1 %v7980_v59  ;;  %v8076_v59 = vld [vmem:[%s11941_s1 + $0xf84] ss:$16 sps:$4 sm:$0xff]  }
  0xb3   :  { %5204 = vmatpush2.bf16.msra.mxu0 %v7975_v60  ;;  %v8071_v60 = vld [vmem:[%s11941_s1 + $0xd80] ss:$16 sps:$4 sm:$0xff]  }
  0xb4   :  { %5247 = vmatpush2.bf16.msra.mxu1 %v7978_v61  ;;  %5205 = vmatprep.subr.bf16.mxu0 %v7983_v62  ;;  %v8074_v61 = vld [vmem:[%s11941_s1 + $0xf80] ss:$16 sps:$4 sm:$0xff]   ;;  %v8079_v62 = vld [vmem:[%s11941_s1 + $0xd64] ss:$16 sps:$4 sm:$0xff]  }
  0xb5   :  { %5248 = vmatprep.subr.bf16.mxu1 %v7986_v63  ;;  %v8082_v63 = vld [vmem:[%s11941_s1 + $0xf64] ss:$16 sps:$4 sm:$0xff]  }
  0xb7   :  { %5206 = vmatpush2.bf16.msra.mxu0 %v7981_v0  ;;  %v8077_v0 = vld [vmem:[%s11941_s1 + $0xd60] ss:$16 sps:$4 sm:$0xff]  }
  0xb8   :  { %5249 = vmatpush2.bf16.msra.mxu1 %v7984_v1  ;;  %5207 = vmatprep.subr.bf16.mxu0 %v7989_v2  ;;  %v8080_v1 = vld [vmem:[%s11941_s1 + $0xf60] ss:$16 sps:$4 sm:$0xff]   ;;  %v8085_v2 = vld [vmem:[%s11941_s1 + $0xd44] ss:$16 sps:$4 sm:$0xff]  }
  0xb9   :  { %5250 = vmatprep.subr.bf16.mxu1 %v7992_v3  ;;  %v8088_v3 = vld [vmem:[%s11941_s1 + $0xf44] ss:$16 sps:$4 sm:$0xff]  }
  0xbb   :  { %5208 = vmatpush2.bf16.msra.mxu0 %v7987_v4  ;;  %v8083_v4 = vld [vmem:[%s11941_s1 + $0xd40] ss:$16 sps:$4 sm:$0xff]  }
  0xbc   :  { %5251 = vmatpush2.bf16.msra.mxu1 %v7990_v5  ;;  %5209 = vmatprep.subr.bf16.mxu0 %v7995_v6  ;;  %v8086_v5 = vld [vmem:[%s11941_s1 + $0xf40] ss:$16 sps:$4 sm:$0xff]   ;;  %v8091_v6 = vld [vmem:[%s11941_s1 + $0xd24] ss:$16 sps:$4 sm:$0xff]  }
  0xbd   :  { %5252 = vmatprep.subr.bf16.mxu1 %v7998_v7  ;;  %v8094_v7 = vld [vmem:[%s11941_s1 + $0xf24] ss:$16 sps:$4 sm:$0xff]  }
  0xbf   :  { %5210 = vmatpush2.bf16.msra.mxu0 %v7993_v8  ;;  %v8089_v8 = vld [vmem:[%s11941_s1 + $0xd20] ss:$16 sps:$4 sm:$0xff]  }
  0xc0   :  { %5253 = vmatpush2.bf16.msra.mxu1 %v7996_v9  ;;  %5265 = vmatprep.subr.bf16.mxu0 %v8007_v10  ;;  %v8092_v9 = vld [vmem:[%s11941_s1 + $0xf20] ss:$16 sps:$4 sm:$0xff]   ;;  %v8097_v10 = vld [vmem:[%s11941_s1 + $0xd04] ss:$16 sps:$4 sm:$0xff]  }
  0xc1   :  { %5308 = vmatprep.subr.bf16.mxu1 %v8010_v11  ;;  %v8100_v11 = vld [vmem:[%s11941_s1 + $0xf04] ss:$16 sps:$4 sm:$0xff]  }
  0xc2   :  { %5212 = vmatmul.mubr.bf16.vlgmr.msra.gmra.mxu0 %v7999_v12  ;;  %v8095_v12 = vld [vmem:[%s11941_s1 + $0xd00] ss:$16 sps:$4 sm:$0xff]  }
  0xc3   :  { %5255 = vmatmul.mubr.bf16.vlgmr.msra.gmra.mxu1 %v8002_v13  ;;  %5266 = vmatpush1.bf16.msra.mxu0 %v8005_v14  ;;  %v8098_v13 = vld [vmem:[%s11941_s1 + $0xf00] ss:$16 sps:$4 sm:$0xff]   ;;  %v8109_v14 = vld [vmem:[%s11941_s1 + $0x10e4] ss:$16 sps:$4 sm:$0xff]  }
  0xc4   :  { %5309 = vmatpush1.bf16.msra.mxu1 %v8008_v15  ;;  %5267 = vmatprep.subr.bf16.mxu0 %v8013_v16  ;;  %v8112_v15 = vld [vmem:[%s11941_s1 + $0x12e4] ss:$16 sps:$4 sm:$0xff]  }
  0xc5   :  { %5310 = vmatprep.subr.bf16.mxu1 %v8016_v17  ;;  %5297 = vmatprep.mubr.bf16.mxu0 %v8103_v18  ;;  %v8101_v16 = vld [vmem:[%s11942_s0 + $0x30] ss:$100 sps:$4 sm:$0xff]   ;;  %v8104_v17 = vld [vmem:[%s11942_s0 + $0x38] ss:$100 sps:$4 sm:$0xff]  }
  0xc6   :  { %5340 = vmatprep.mubr.bf16.mxu1 %v8106_v19  ;;  %v8107_v18 = vld [vmem:[%s11941_s1 + $0x10e0] ss:$16 sps:$4 sm:$0xff]  }
  0xc7   :  { %5268 = vmatpush1.bf16.msra.mxu0 %v8011_v20  ;;  %v8110_v19 = vld [vmem:[%s11941_s1 + $0x12e0] ss:$16 sps:$4 sm:$0xff]   ;;  %v8115_v20 = vld [vmem:[%s11941_s1 + $0x10c4] ss:$16 sps:$4 sm:$0xff]  }
  0xc8   :  { %5311 = vmatpush1.bf16.msra.mxu1 %v8014_v21  ;;  %5269 = vmatprep.subr.bf16.mxu0 %v8019_v22  ;;  %v8118_v21 = vld [vmem:[%s11941_s1 + $0x12c4] ss:$16 sps:$4 sm:$0xff]  }
  0xc9   :  { %5312 = vmatprep.subr.bf16.mxu1 %v8022_v23  ;;  %v8205_v22 = vld [vmem:[%s11942_s0 + $0x44] ss:$100 sps:$4 sm:$0xff]   ;;  %v8208_v23 = vld [vmem:[%s11942_s0 + $0x4c] ss:$100 sps:$4 sm:$0xff]  }
  0xcb   :  { %5270 = vmatpush1.bf16.msra.mxu0 %v8017_v24  ;;  %v8113_v24 = vld [vmem:[%s11941_s1 + $0x10c0] ss:$16 sps:$4 sm:$0xff]  }
  0xcc   :  { %5313 = vmatpush1.bf16.msra.mxu1 %v8020_v25  ;;  %5271 = vmatprep.subr.bf16.mxu0 %v8025_v26  ;;  %v8116_v25 = vld [vmem:[%s11941_s1 + $0x12c0] ss:$16 sps:$4 sm:$0xff]   ;;  %v8121_v26 = vld [vmem:[%s11941_s1 + $0x10a4] ss:$16 sps:$4 sm:$0xff]  }
  0xcd   :  { %5314 = vmatprep.subr.bf16.mxu1 %v8028_v27  ;;  %v8124_v27 = vld [vmem:[%s11941_s1 + $0x12a4] ss:$16 sps:$4 sm:$0xff]  }
  0xcf   :  { %5272 = vmatpush1.bf16.msra.mxu0 %v8023_v28  ;;  %v8119_v28 = vld [vmem:[%s11941_s1 + $0x10a0] ss:$16 sps:$4 sm:$0xff]  }
  0xd0   :  { %5315 = vmatpush1.bf16.msra.mxu1 %v8026_v29  ;;  %5273 = vmatprep.subr.bf16.mxu0 %v8031_v30  ;;  %v8122_v29 = vld [vmem:[%s11941_s1 + $0x12a0] ss:$16 sps:$4 sm:$0xff]   ;;  %v8127_v30 = vld [vmem:[%s11941_s1 + $0x1084] ss:$16 sps:$4 sm:$0xff]  }
  0xd1   :  { %5316 = vmatprep.subr.bf16.mxu1 %v8034_v31  ;;  %v8130_v31 = vld [vmem:[%s11941_s1 + $0x1284] ss:$16 sps:$4 sm:$0xff]  }
  0xd3   :  { %5274 = vmatpush1.bf16.msra.mxu0 %v8029_v32  ;;  %v8125_v32 = vld [vmem:[%s11941_s1 + $0x1080] ss:$16 sps:$4 sm:$0xff]  }
  0xd4   :  { %5317 = vmatpush1.bf16.msra.mxu1 %v8032_v33  ;;  %5275 = vmatprep.subr.bf16.mxu0 %v8037_v34  ;;  %v8128_v33 = vld [vmem:[%s11941_s1 + $0x1280] ss:$16 sps:$4 sm:$0xff]   ;;  %v8133_v34 = vld [vmem:[%s11941_s1 + $0x1064] ss:$16 sps:$4 sm:$0xff]  }
  0xd5   :  { %5318 = vmatprep.subr.bf16.mxu1 %v8040_v35  ;;  %v8136_v35 = vld [vmem:[%s11941_s1 + $0x1264] ss:$16 sps:$4 sm:$0xff]  }
  0xd7   :  { %5276 = vmatpush1.bf16.msra.mxu0 %v8035_v36  ;;  %v8131_v36 = vld [vmem:[%s11941_s1 + $0x1060] ss:$16 sps:$4 sm:$0xff]  }
  0xd8   :  { %5319 = vmatpush1.bf16.msra.mxu1 %v8038_v37  ;;  %5277 = vmatprep.subr.bf16.mxu0 %v8043_v38  ;;  %v8134_v37 = vld [vmem:[%s11941_s1 + $0x1260] ss:$16 sps:$4 sm:$0xff]   ;;  %v8139_v38 = vld [vmem:[%s11941_s1 + $0x1044] ss:$16 sps:$4 sm:$0xff]  }
  0xd9   :  { %5320 = vmatprep.subr.bf16.mxu1 %v8046_v39  ;;  %v8142_v39 = vld [vmem:[%s11941_s1 + $0x1244] ss:$16 sps:$4 sm:$0xff]  }
  0xdb   :  { %5278 = vmatpush1.bf16.msra.mxu0 %v8041_v40  ;;  %v8137_v40 = vld [vmem:[%s11941_s1 + $0x1040] ss:$16 sps:$4 sm:$0xff]  }
  0xdc   :  { %5321 = vmatpush1.bf16.msra.mxu1 %v8044_v41  ;;  %5279 = vmatprep.subr.bf16.mxu0 %v8049_v42  ;;  %v8140_v41 = vld [vmem:[%s11941_s1 + $0x1240] ss:$16 sps:$4 sm:$0xff]   ;;  %v8145_v42 = vld [vmem:[%s11941_s1 + $0x1024] ss:$16 sps:$4 sm:$0xff]  }
  0xdd   :  { %5322 = vmatprep.subr.bf16.mxu1 %v8052_v43  ;;  %v8148_v43 = vld [vmem:[%s11941_s1 + $0x1224] ss:$16 sps:$4 sm:$0xff]  }
  0xdf   :  { %5280 = vmatpush1.bf16.msra.mxu0 %v8047_v44  ;;  %v8143_v44 = vld [vmem:[%s11941_s1 + $0x1020] ss:$16 sps:$4 sm:$0xff]  }
  0xe0   :  { %5323 = vmatpush1.bf16.msra.mxu1 %v8050_v45  ;;  %5281 = vmatprep.subr.bf16.mxu0 %v8055_v46  ;;  %v8146_v45 = vld [vmem:[%s11941_s1 + $0x1220] ss:$16 sps:$4 sm:$0xff]   ;;  %v8151_v46 = vld [vmem:[%s11941_s1 + $0x1004] ss:$16 sps:$4 sm:$0xff]  }
  0xe1   :  { %5324 = vmatprep.subr.bf16.mxu1 %v8058_v47  ;;  %v8154_v47 = vld [vmem:[%s11941_s1 + $0x1204] ss:$16 sps:$4 sm:$0xff]  }
  0xe3   :  { %5282 = vmatpush2.bf16.msra.mxu0 %v8053_v48  ;;  %v8149_v48 = vld [vmem:[%s11941_s1 + $0x1000] ss:$16 sps:$4 sm:$0xff]  }
  0xe4   :  { %5325 = vmatpush2.bf16.msra.mxu1 %v8056_v49  ;;  %5283 = vmatprep.subr.bf16.mxu0 %v8061_v50  ;;  %v8152_v49 = vld [vmem:[%s11941_s1 + $0x1200] ss:$16 sps:$4 sm:$0xff]   ;;  %v8157_v50 = vld [vmem:[%s11941_s1 + $0x11e4] ss:$16 sps:$4 sm:$0xff]  }
  0xe5   :  { %5326 = vmatprep.subr.bf16.mxu1 %v8064_v51  ;;  %v8160_v51 = vld [vmem:[%s11941_s1 + $0x13e4] ss:$16 sps:$4 sm:$0xff]  }
  0xe7   :  { %5284 = vmatpush2.bf16.msra.mxu0 %v8059_v52  ;;  %v8155_v52 = vld [vmem:[%s11941_s1 + $0x11e0] ss:$16 sps:$4 sm:$0xff]  }
  0xe8   :  { %5327 = vmatpush2.bf16.msra.mxu1 %v8062_v53  ;;  %5285 = vmatprep.subr.bf16.mxu0 %v8067_v54  ;;  %v8158_v53 = vld [vmem:[%s11941_s1 + $0x13e0] ss:$16 sps:$4 sm:$0xff]   ;;  %v8163_v54 = vld [vmem:[%s11941_s1 + $0x11c4] ss:$16 sps:$4 sm:$0xff]  }
  0xe9   :  { %5328 = vmatprep.subr.bf16.mxu1 %v8070_v55  ;;  %v8166_v55 = vld [vmem:[%s11941_s1 + $0x13c4] ss:$16 sps:$4 sm:$0xff]  }
  0xeb   :  { %5286 = vmatpush2.bf16.msra.mxu0 %v8065_v56  ;;  %v8161_v56 = vld [vmem:[%s11941_s1 + $0x11c0] ss:$16 sps:$4 sm:$0xff]  }
  0xec   :  { %5329 = vmatpush2.bf16.msra.mxu1 %v8068_v57  ;;  %5287 = vmatprep.subr.bf16.mxu0 %v8073_v58  ;;  %v8164_v57 = vld [vmem:[%s11941_s1 + $0x13c0] ss:$16 sps:$4 sm:$0xff]   ;;  %v8169_v58 = vld [vmem:[%s11941_s1 + $0x11a4] ss:$16 sps:$4 sm:$0xff]  }
  0xed   :  { %5330 = vmatprep.subr.bf16.mxu1 %v8076_v59  ;;  %v8172_v59 = vld [vmem:[%s11941_s1 + $0x13a4] ss:$16 sps:$4 sm:$0xff]  }
  0xef   :  { %5288 = vmatpush2.bf16.msra.mxu0 %v8071_v60  ;;  %v8167_v60 = vld [vmem:[%s11941_s1 + $0x11a0] ss:$16 sps:$4 sm:$0xff]  }
  0xf0   :  { %5331 = vmatpush2.bf16.msra.mxu1 %v8074_v61  ;;  %5289 = vmatprep.subr.bf16.mxu0 %v8079_v62  ;;  %v8170_v61 = vld [vmem:[%s11941_s1 + $0x13a0] ss:$16 sps:$4 sm:$0xff]   ;;  %v8175_v62 = vld [vmem:[%s11941_s1 + $0x1184] ss:$16 sps:$4 sm:$0xff]  }
  0xf1   :  { %5332 = vmatprep.subr.bf16.mxu1 %v8082_v63  ;;  %v8178_v63 = vld [vmem:[%s11941_s1 + $0x1384] ss:$16 sps:$4 sm:$0xff]  }
  0xf3   :  { %5290 = vmatpush2.bf16.msra.mxu0 %v8077_v0  ;;  %v8173_v0 = vld [vmem:[%s11941_s1 + $0x1180] ss:$16 sps:$4 sm:$0xff]  }
  0xf4   :  { %5333 = vmatpush2.bf16.msra.mxu1 %v8080_v1  ;;  %5291 = vmatprep.subr.bf16.mxu0 %v8085_v2  ;;  %v8176_v1 = vld [vmem:[%s11941_s1 + $0x1380] ss:$16 sps:$4 sm:$0xff]   ;;  %v8181_v2 = vld [vmem:[%s11941_s1 + $0x1164] ss:$16 sps:$4 sm:$0xff]  }
  0xf5   :  { %5334 = vmatprep.subr.bf16.mxu1 %v8088_v3  ;;  %v8184_v3 = vld [vmem:[%s11941_s1 + $0x1364] ss:$16 sps:$4 sm:$0xff]  }
  0xf7   :  { %5292 = vmatpush2.bf16.msra.mxu0 %v8083_v4  ;;  %v8179_v4 = vld [vmem:[%s11941_s1 + $0x1160] ss:$16 sps:$4 sm:$0xff]  }
  0xf8   :  { %5335 = vmatpush2.bf16.msra.mxu1 %v8086_v5  ;;  %5293 = vmatprep.subr.bf16.mxu0 %v8091_v6  ;;  %v8182_v5 = vld [vmem:[%s11941_s1 + $0x1360] ss:$16 sps:$4 sm:$0xff]   ;;  %v8187_v6 = vld [vmem:[%s11941_s1 + $0x1144] ss:$16 sps:$4 sm:$0xff]  }
  0xf9   :  { %5336 = vmatprep.subr.bf16.mxu1 %v8094_v7  ;;  %v8190_v7 = vld [vmem:[%s11941_s1 + $0x1344] ss:$16 sps:$4 sm:$0xff]  }
  0xfb   :  { %5294 = vmatpush2.bf16.msra.mxu0 %v8089_v8  ;;  %v8185_v8 = vld [vmem:[%s11941_s1 + $0x1140] ss:$16 sps:$4 sm:$0xff]  }
  0xfc   :  { %5337 = vmatpush2.bf16.msra.mxu1 %v8092_v9  ;;  %5295 = vmatprep.subr.bf16.mxu0 %v8097_v10  ;;  %v8188_v9 = vld [vmem:[%s11941_s1 + $0x1340] ss:$16 sps:$4 sm:$0xff]   ;;  %v8193_v10 = vld [vmem:[%s11941_s1 + $0x1124] ss:$16 sps:$4 sm:$0xff]  }
  0xfd   :  { %5338 = vmatprep.subr.bf16.mxu1 %v8100_v11  ;;  %v8196_v11 = vld [vmem:[%s11941_s1 + $0x1324] ss:$16 sps:$4 sm:$0xff]  }
  0xff   :  { %5296 = vmatpush2.bf16.msra.mxu0 %v8095_v12  ;;  %v8191_v12 = vld [vmem:[%s11941_s1 + $0x1120] ss:$16 sps:$4 sm:$0xff]  }
 0x100   :  { %5339 = vmatpush2.bf16.msra.mxu1 %v8098_v13  ;;  %5351 = vmatprep.subr.bf16.mxu0 %v8109_v14  ;;  %v8194_v13 = vld [vmem:[%s11941_s1 + $0x1320] ss:$16 sps:$4 sm:$0xff]   ;;  %v8199_v14 = vld [vmem:[%s11941_s1 + $0x1104] ss:$16 sps:$4 sm:$0xff]  }
 0x101   :  { %5394 = vmatprep.subr.bf16.mxu1 %v8112_v15  ;;  %v8202_v15 = vld [vmem:[%s11941_s1 + $0x1304] ss:$16 sps:$4 sm:$0xff]  }
 0x102   :  { %5298 = vmatmul.mubr.bf16.vlgmr.msra.gmra.mxu0 %v8101_v16  ;;  %v8197_v16 = vld [vmem:[%s11941_s1 + $0x1100] ss:$16 sps:$4 sm:$0xff]  }
 0x103   :  { %5341 = vmatmul.mubr.bf16.vlgmr.msra.gmra.mxu1 %v8104_v17  ;;  %5352 = vmatpush1.bf16.msra.mxu0 %v8107_v18  ;;  %v8200_v17 = vld [vmem:[%s11941_s1 + $0x1300] ss:$16 sps:$4 sm:$0xff]  }
 0x104   :  { %5395 = vmatpush1.bf16.msra.mxu1 %v8110_v19  ;;  %5353 = vmatprep.subr.bf16.mxu0 %v8115_v20  ;;  %v8203_v18 = vld [vmem:[%s11942_s0 + $0x40] ss:$100 sps:$4 sm:$0xff]   ;;  %v8206_v19 = vld [vmem:[%s11942_s0 + $0x48] ss:$100 sps:$4 sm:$0xff]  }
 0x105   :  { %5396 = vmatprep.subr.bf16.mxu1 %v8118_v21  ;;  %5383 = vmatprep.mubr.bf16.mxu0 %v8205_v22  ;;  %v8211_v20 = vld [vmem:[%s11941_s1 + $0x14e4] ss:$16 sps:$4 sm:$0xff]   ;;  %v8209_v22 = vld [vmem:[%s11941_s1 + $0x14e0] ss:$16 sps:$4 sm:$0xff]  }
 0x106   :  { %5426 = vmatprep.mubr.bf16.mxu1 %v8208_v23  ;;  %v8214_v21 = vld [vmem:[%s11941_s1 + $0x16e4] ss:$16 sps:$4 sm:$0xff]   ;;  %v8212_v23 = vld [vmem:[%s11941_s1 + $0x16e0] ss:$16 sps:$4 sm:$0xff]  }
 0x107   :  { %5354 = vmatpush1.bf16.msra.mxu0 %v8113_v24  ;;  %v8217_v24 = vld [vmem:[%s11941_s1 + $0x14c4] ss:$16 sps:$4 sm:$0xff]  }
 0x108   :  { %5397 = vmatpush1.bf16.msra.mxu1 %v8116_v25  ;;  %5355 = vmatprep.subr.bf16.mxu0 %v8121_v26  ;;  %v8220_v25 = vld [vmem:[%s11941_s1 + $0x16c4] ss:$16 sps:$4 sm:$0xff]   ;;  %v8215_v26 = vld [vmem:[%s11941_s1 + $0x14c0] ss:$16 sps:$4 sm:$0xff]  }
 0x109   :  { %5398 = vmatprep.subr.bf16.mxu1 %v8124_v27  ;;  %v8218_v27 = vld [vmem:[%s11941_s1 + $0x16c0] ss:$16 sps:$4 sm:$0xff]  }
 0x10b   :  { %5356 = vmatpush1.bf16.msra.mxu0 %v8119_v28  ;;  %v8307_v28 = vld [vmem:[%s11942_s0 + $0x54] ss:$100 sps:$4 sm:$0xff]  }
 0x10c   :  { %5399 = vmatpush1.bf16.msra.mxu1 %v8122_v29  ;;  %5357 = vmatprep.subr.bf16.mxu0 %v8127_v30  ;;  %v8310_v29 = vld [vmem:[%s11942_s0 + $0x5c] ss:$100 sps:$4 sm:$0xff]   ;;  %v8223_v30 = vld [vmem:[%s11941_s1 + $0x14a4] ss:$16 sps:$4 sm:$0xff]  }
 0x10d   :  { %5400 = vmatprep.subr.bf16.mxu1 %v8130_v31  ;;  %v8226_v31 = vld [vmem:[%s11941_s1 + $0x16a4] ss:$16 sps:$4 sm:$0xff]  }
 0x10f   :  { %5358 = vmatpush1.bf16.msra.mxu0 %v8125_v32  ;;  %v8221_v32 = vld [vmem:[%s11941_s1 + $0x14a0] ss:$16 sps:$4 sm:$0xff]  }
 0x110   :  { %5401 = vmatpush1.bf16.msra.mxu1 %v8128_v33  ;;  %5359 = vmatprep.subr.bf16.mxu0 %v8133_v34  ;;  %v8224_v33 = vld [vmem:[%s11941_s1 + $0x16a0] ss:$16 sps:$4 sm:$0xff]   ;;  %v8229_v34 = vld [vmem:[%s11941_s1 + $0x1484] ss:$16 sps:$4 sm:$0xff]  }
 0x111   :  { %5402 = vmatprep.subr.bf16.mxu1 %v8136_v35  ;;  %v8232_v35 = vld [vmem:[%s11941_s1 + $0x1684] ss:$16 sps:$4 sm:$0xff]  }
 0x113   :  { %5360 = vmatpush1.bf16.msra.mxu0 %v8131_v36  ;;  %v8227_v36 = vld [vmem:[%s11941_s1 + $0x1480] ss:$16 sps:$4 sm:$0xff]  }
 0x114   :  { %5403 = vmatpush1.bf16.msra.mxu1 %v8134_v37  ;;  %5361 = vmatprep.subr.bf16.mxu0 %v8139_v38  ;;  %v8230_v37 = vld [vmem:[%s11941_s1 + $0x1680] ss:$16 sps:$4 sm:$0xff]   ;;  %v8235_v38 = vld [vmem:[%s11941_s1 + $0x1464] ss:$16 sps:$4 sm:$0xff]  }
 0x115   :  { %5404 = vmatprep.subr.bf16.mxu1 %v8142_v39  ;;  %v8238_v39 = vld [vmem:[%s11941_s1 + $0x1664] ss:$16 sps:$4 sm:$0xff]  }
 0x117   :  { %5362 = vmatpush1.bf16.msra.mxu0 %v8137_v40  ;;  %v8233_v40 = vld [vmem:[%s11941_s1 + $0x1460] ss:$16 sps:$4 sm:$0xff]  }
 0x118   :  { %5405 = vmatpush1.bf16.msra.mxu1 %v8140_v41  ;;  %5363 = vmatprep.subr.bf16.mxu0 %v8145_v42  ;;  %v8236_v41 = vld [vmem:[%s11941_s1 + $0x1660] ss:$16 sps:$4 sm:$0xff]   ;;  %v8241_v42 = vld [vmem:[%s11941_s1 + $0x1444] ss:$16 sps:$4 sm:$0xff]  }
 0x119   :  { %5406 = vmatprep.subr.bf16.mxu1 %v8148_v43  ;;  %v8244_v43 = vld [vmem:[%s11941_s1 + $0x1644] ss:$16 sps:$4 sm:$0xff]  }
 0x11b   :  { %5364 = vmatpush1.bf16.msra.mxu0 %v8143_v44  ;;  %v8239_v44 = vld [vmem:[%s11941_s1 + $0x1440] ss:$16 sps:$4 sm:$0xff]  }
 0x11c   :  { %5407 = vmatpush1.bf16.msra.mxu1 %v8146_v45  ;;  %5365 = vmatprep.subr.bf16.mxu0 %v8151_v46  ;;  %v8242_v45 = vld [vmem:[%s11941_s1 + $0x1640] ss:$16 sps:$4 sm:$0xff]   ;;  %v8247_v46 = vld [vmem:[%s11941_s1 + $0x1424] ss:$16 sps:$4 sm:$0xff]  }
 0x11d   :  { %5408 = vmatprep.subr.bf16.mxu1 %v8154_v47  ;;  %v8250_v47 = vld [vmem:[%s11941_s1 + $0x1624] ss:$16 sps:$4 sm:$0xff]  }
 0x11f   :  { %5366 = vmatpush1.bf16.msra.mxu0 %v8149_v48  ;;  %v8245_v48 = vld [vmem:[%s11941_s1 + $0x1420] ss:$16 sps:$4 sm:$0xff]  }
 0x120   :  { %5409 = vmatpush1.bf16.msra.mxu1 %v8152_v49  ;;  %5367 = vmatprep.subr.bf16.mxu0 %v8157_v50  ;;  %v8248_v49 = vld [vmem:[%s11941_s1 + $0x1620] ss:$16 sps:$4 sm:$0xff]   ;;  %v8253_v50 = vld [vmem:[%s11941_s1 + $0x1404] ss:$16 sps:$4 sm:$0xff]  }
 0x121   :  { %5410 = vmatprep.subr.bf16.mxu1 %v8160_v51  ;;  %v8256_v51 = vld [vmem:[%s11941_s1 + $0x1604] ss:$16 sps:$4 sm:$0xff]  }
 0x123   :  { %5368 = vmatpush2.bf16.msra.mxu0 %v8155_v52  ;;  %v8251_v52 = vld [vmem:[%s11941_s1 + $0x1400] ss:$16 sps:$4 sm:$0xff]  }
 0x124   :  { %5411 = vmatpush2.bf16.msra.mxu1 %v8158_v53  ;;  %5369 = vmatprep.subr.bf16.mxu0 %v8163_v54  ;;  %v8254_v53 = vld [vmem:[%s11941_s1 + $0x1600] ss:$16 sps:$4 sm:$0xff]   ;;  %v8259_v54 = vld [vmem:[%s11941_s1 + $0x15e4] ss:$16 sps:$4 sm:$0xff]  }
 0x125   :  { %5412 = vmatprep.subr.bf16.mxu1 %v8166_v55  ;;  %v8262_v55 = vld [vmem:[%s11941_s1 + $0x17e4] ss:$16 sps:$4 sm:$0xff]  }
 0x127   :  { %5370 = vmatpush2.bf16.msra.mxu0 %v8161_v56  ;;  %v8257_v56 = vld [vmem:[%s11941_s1 + $0x15e0] ss:$16 sps:$4 sm:$0xff]  }
 0x128   :  { %5413 = vmatpush2.bf16.msra.mxu1 %v8164_v57  ;;  %5371 = vmatprep.subr.bf16.mxu0 %v8169_v58  ;;  %v8260_v57 = vld [vmem:[%s11941_s1 + $0x17e0] ss:$16 sps:$4 sm:$0xff]   ;;  %v8265_v58 = vld [vmem:[%s11941_s1 + $0x15c4] ss:$16 sps:$4 sm:$0xff]  }
 0x129   :  { %5414 = vmatprep.subr.bf16.mxu1 %v8172_v59  ;;  %v8268_v59 = vld [vmem:[%s11941_s1 + $0x17c4] ss:$16 sps:$4 sm:$0xff]  }
 0x12b   :  { %5372 = vmatpush2.bf16.msra.mxu0 %v8167_v60  ;;  %v8263_v60 = vld [vmem:[%s11941_s1 + $0x15c0] ss:$16 sps:$4 sm:$0xff]  }
 0x12c   :  { %5415 = vmatpush2.bf16.msra.mxu1 %v8170_v61  ;;  %5373 = vmatprep.subr.bf16.mxu0 %v8175_v62  ;;  %v8266_v61 = vld [vmem:[%s11941_s1 + $0x17c0] ss:$16 sps:$4 sm:$0xff]   ;;  %v8271_v62 = vld [vmem:[%s11941_s1 + $0x15a4] ss:$16 sps:$4 sm:$0xff]  }
 0x12d   :  { %5416 = vmatprep.subr.bf16.mxu1 %v8178_v63  ;;  %v8274_v63 = vld [vmem:[%s11941_s1 + $0x17a4] ss:$16 sps:$4 sm:$0xff]  }
 0x12f   :  { %5374 = vmatpush2.bf16.msra.mxu0 %v8173_v0  ;;  %v8269_v0 = vld [vmem:[%s11941_s1 + $0x15a0] ss:$16 sps:$4 sm:$0xff]  }
 0x130   :  { %5417 = vmatpush2.bf16.msra.mxu1 %v8176_v1  ;;  %5375 = vmatprep.subr.bf16.mxu0 %v8181_v2  ;;  %v8272_v1 = vld [vmem:[%s11941_s1 + $0x17a0] ss:$16 sps:$4 sm:$0xff]   ;;  %v8277_v2 = vld [vmem:[%s11941_s1 + $0x1584] ss:$16 sps:$4 sm:$0xff]  }
 0x131   :  { %5418 = vmatprep.subr.bf16.mxu1 %v8184_v3  ;;  %v8280_v3 = vld [vmem:[%s11941_s1 + $0x1784] ss:$16 sps:$4 sm:$0xff]  }
 0x133   :  { %5376 = vmatpush2.bf16.msra.mxu0 %v8179_v4  ;;  %v8275_v4 = vld [vmem:[%s11941_s1 + $0x1580] ss:$16 sps:$4 sm:$0xff]  }
 0x134   :  { %5419 = vmatpush2.bf16.msra.mxu1 %v8182_v5  ;;  %5377 = vmatprep.subr.bf16.mxu0 %v8187_v6  ;;  %v8278_v5 = vld [vmem:[%s11941_s1 + $0x1780] ss:$16 sps:$4 sm:$0xff]   ;;  %v8283_v6 = vld [vmem:[%s11941_s1 + $0x1564] ss:$16 sps:$4 sm:$0xff]  }
 0x135   :  { %5420 = vmatprep.subr.bf16.mxu1 %v8190_v7  ;;  %v8286_v7 = vld [vmem:[%s11941_s1 + $0x1764] ss:$16 sps:$4 sm:$0xff]  }
 0x137   :  { %5378 = vmatpush2.bf16.msra.mxu0 %v8185_v8  ;;  %v8281_v8 = vld [vmem:[%s11941_s1 + $0x1560] ss:$16 sps:$4 sm:$0xff]  }
 0x138   :  { %5421 = vmatpush2.bf16.msra.mxu1 %v8188_v9  ;;  %5379 = vmatprep.subr.bf16.mxu0 %v8193_v10  ;;  %v8284_v9 = vld [vmem:[%s11941_s1 + $0x1760] ss:$16 sps:$4 sm:$0xff]   ;;  %v8289_v10 = vld [vmem:[%s11941_s1 + $0x1544] ss:$16 sps:$4 sm:$0xff]  }
 0x139   :  { %5422 = vmatprep.subr.bf16.mxu1 %v8196_v11  ;;  %v8292_v11 = vld [vmem:[%s11941_s1 + $0x1744] ss:$16 sps:$4 sm:$0xff]  }
 0x13b   :  { %5380 = vmatpush2.bf16.msra.mxu0 %v8191_v12  ;;  %v8287_v12 = vld [vmem:[%s11941_s1 + $0x1540] ss:$16 sps:$4 sm:$0xff]  }
 0x13c   :  { %5423 = vmatpush2.bf16.msra.mxu1 %v8194_v13  ;;  %5381 = vmatprep.subr.bf16.mxu0 %v8199_v14  ;;  %v8290_v13 = vld [vmem:[%s11941_s1 + $0x1740] ss:$16 sps:$4 sm:$0xff]   ;;  %v8295_v14 = vld [vmem:[%s11941_s1 + $0x1524] ss:$16 sps:$4 sm:$0xff]  }
 0x13d   :  { %5424 = vmatprep.subr.bf16.mxu1 %v8202_v15  ;;  %v8298_v15 = vld [vmem:[%s11941_s1 + $0x1724] ss:$16 sps:$4 sm:$0xff]  }
 0x13f   :  { %5382 = vmatpush2.bf16.msra.mxu0 %v8197_v16  ;;  %v8293_v16 = vld [vmem:[%s11941_s1 + $0x1520] ss:$16 sps:$4 sm:$0xff]  }
 0x140   :  { %5425 = vmatpush2.bf16.msra.mxu1 %v8200_v17  ;;  %5437 = vmatprep.subr.bf16.mxu0 %v8211_v20  ;;  %v8296_v17 = vld [vmem:[%s11941_s1 + $0x1720] ss:$16 sps:$4 sm:$0xff]  }
 0x141   :  { %5480 = vmatprep.subr.bf16.mxu1 %v8214_v21  ;;  %v8299_v20 = vld [vmem:[%s11941_s1 + $0x1500] ss:$16 sps:$4 sm:$0xff]  }
 0x142   :  { %5384 = vmatmul.mubr.bf16.vlgmr.msra.gmra.mxu0 %v8203_v18  ;;  %v8301_v18 = vld [vmem:[%s11941_s1 + $0x1504] ss:$16 sps:$4 sm:$0xff]   ;;  %v8302_v21 = vld [vmem:[%s11941_s1 + $0x1700] ss:$16 sps:$4 sm:$0xff]  }
 0x143   :  { %5427 = vmatmul.mubr.bf16.vlgmr.msra.gmra.mxu1 %v8206_v19  ;;  %5438 = vmatpush1.bf16.msra.mxu0 %v8209_v22  ;;  %v8304_v19 = vld [vmem:[%s11941_s1 + $0x1704] ss:$16 sps:$4 sm:$0xff]  }
 0x144   :  { %5481 = vmatpush1.bf16.msra.mxu1 %v8212_v23  ;;  %5439 = vmatprep.subr.bf16.mxu0 %v8217_v24  ;;  %v8305_v22 = vld [vmem:[%s11942_s0 + $0x50] ss:$100 sps:$4 sm:$0xff]   ;;  %v8308_v23 = vld [vmem:[%s11942_s0 + $0x58] ss:$100 sps:$4 sm:$0xff]  }
 0x145   :  { %5482 = vmatprep.subr.bf16.mxu1 %v8220_v25  ;;  %5469 = vmatprep.mubr.bf16.mxu0 %v8307_v28  ;;  %v8313_v24 = vld [vmem:[%s11941_s1 + $0x18e4] ss:$16 sps:$4 sm:$0xff]   ;;  %v8316_v25 = vld [vmem:[%s11941_s1 + $0xec] ss:$16 sps:$4 sm:$0xff]  }
 0x146   :  { %5512 = vmatprep.mubr.bf16.mxu1 %v8310_v29  ;;  %v8319_v28 = vld [vmem:[%s11941_s1 + $0x18c4] ss:$16 sps:$4 sm:$0xff]   ;;  %v8322_v29 = vld [vmem:[%s11941_s1 + $0xcc] ss:$16 sps:$4 sm:$0xff]  }
 0x147   :  { %5440 = vmatpush1.bf16.msra.mxu0 %v8215_v26  ;;  %v8311_v26 = vld [vmem:[%s11941_s1 + $0x18e0] ss:$16 sps:$4 sm:$0xff]  }
 0x148   :  { %5483 = vmatpush1.bf16.msra.mxu1 %v8218_v27  ;;  %5441 = vmatprep.subr.bf16.mxu0 %v8223_v30  ;;  %v8314_v27 = vld [vmem:[%s11941_s1 + $0xe8] ss:$16 sps:$4 sm:$0xff]   ;;  %v8317_v30 = vld [vmem:[%s11941_s1 + $0x18c0] ss:$16 sps:$4 sm:$0xff]  }
 0x149   :  { %5484 = vmatprep.subr.bf16.mxu1 %v8226_v31  ;;  %v8320_v31 = vld [vmem:[%s11941_s1 + $0xc8] ss:$16 sps:$4 sm:$0xff]  }
 0x14b   :  { %5442 = vmatpush1.bf16.msra.mxu0 %v8221_v32  ;;  %v8325_v32 = vld [vmem:[%s11941_s1 + $0x18a4] ss:$16 sps:$4 sm:$0xff]  }
 0x14c   :  { %5485 = vmatpush1.bf16.msra.mxu1 %v8224_v33  ;;  %5443 = vmatprep.subr.bf16.mxu0 %v8229_v34  ;;  %v8328_v33 = vld [vmem:[%s11941_s1 + $0xac] ss:$16 sps:$4 sm:$0xff]   ;;  %v8323_v34 = vld [vmem:[%s11941_s1 + $0x18a0] ss:$16 sps:$4 sm:$0xff]  }
 0x14d   :  { %5486 = vmatprep.subr.bf16.mxu1 %v8232_v35  ;;  %v8326_v35 = vld [vmem:[%s11941_s1 + $0xa8] ss:$16 sps:$4 sm:$0xff]  }
 0x14f   :  { %5444 = vmatpush1.bf16.msra.mxu0 %v8227_v36  ;;  %v9009_v36 = vmov 0  }
 0x150   :  { %5487 = vmatpush1.bf16.msra.mxu1 %v8230_v37  ;;  %5445 = vmatprep.subr.bf16.mxu0 %v8235_v38  ;;  %v8984_v37 = vld [vmem:[%s11942_s0 + $0x4] ss:$100 sps:$4 sm:$0xff]  }
 0x151   :  { %5488 = vmatprep.subr.bf16.mxu1 %v8238_v39  ;;  %v8331_v38 = vld [vmem:[%s11941_s1 + $0x1884] ss:$16 sps:$4 sm:$0xff]   ;;  %v8334_v39 = vld [vmem:[%s11941_s1 + $0x8c] ss:$16 sps:$4 sm:$0xff]  }
 0x153   :  { %5446 = vmatpush1.bf16.msra.mxu0 %v8233_v40  ;;  %v8329_v40 = vld [vmem:[%s11941_s1 + $0x1880] ss:$16 sps:$4 sm:$0xff]  }
 0x154   :  { %5489 = vmatpush1.bf16.msra.mxu1 %v8236_v41  ;;  %5447 = vmatprep.subr.bf16.mxu0 %v8241_v42  ;;  %v8332_v41 = vld [vmem:[%s11941_s1 + $0x88] ss:$16 sps:$4 sm:$0xff]   ;;  %v8337_v42 = vld [vmem:[%s11941_s1 + $0x1864] ss:$16 sps:$4 sm:$0xff]  }
 0x155   :  { %5490 = vmatprep.subr.bf16.mxu1 %v8244_v43  ;;  %v8340_v43 = vld [vmem:[%s11941_s1 + $0x6c] ss:$16 sps:$4 sm:$0xff]  }
 0x157   :  { %5448 = vmatpush1.bf16.msra.mxu0 %v8239_v44  ;;  %v8335_v44 = vld [vmem:[%s11941_s1 + $0x1860] ss:$16 sps:$4 sm:$0xff]  }
 0x158   :  { %5491 = vmatpush1.bf16.msra.mxu1 %v8242_v45  ;;  %5449 = vmatprep.subr.bf16.mxu0 %v8247_v46  ;;  %v8338_v45 = vld [vmem:[%s11941_s1 + $0x68] ss:$16 sps:$4 sm:$0xff]   ;;  %v8343_v46 = vld [vmem:[%s11941_s1 + $0x1844] ss:$16 sps:$4 sm:$0xff]  }
 0x159   :  { %5492 = vmatprep.subr.bf16.mxu1 %v8250_v47  ;;  %v8346_v47 = vld [vmem:[%s11941_s1 + $0x4c] ss:$16 sps:$4 sm:$0xff]  }
 0x15b   :  { %5450 = vmatpush1.bf16.msra.mxu0 %v8245_v48  ;;  %v8341_v48 = vld [vmem:[%s11941_s1 + $0x1840] ss:$16 sps:$4 sm:$0xff]  }
 0x15c   :  { %5493 = vmatpush1.bf16.msra.mxu1 %v8248_v49  ;;  %5451 = vmatprep.subr.bf16.mxu0 %v8253_v50  ;;  %v8344_v49 = vld [vmem:[%s11941_s1 + $0x48] ss:$16 sps:$4 sm:$0xff]   ;;  %v8349_v50 = vld [vmem:[%s11941_s1 + $0x1824] ss:$16 sps:$4 sm:$0xff]  }
 0x15d   :  { %5494 = vmatprep.subr.bf16.mxu1 %v8256_v51  ;;  %v8352_v51 = vld [vmem:[%s11941_s1 + $0x2c] ss:$16 sps:$4 sm:$0xff]  }
 0x15f   :  { %5452 = vmatpush1.bf16.msra.mxu0 %v8251_v52  ;;  %v8347_v52 = vld [vmem:[%s11941_s1 + $0x1820] ss:$16 sps:$4 sm:$0xff]  }
 0x160   :  { %5495 = vmatpush1.bf16.msra.mxu1 %v8254_v53  ;;  %5453 = vmatprep.subr.bf16.mxu0 %v8259_v54  ;;  %v8350_v53 = vld [vmem:[%s11941_s1 + $0x28] ss:$16 sps:$4 sm:$0xff]   ;;  %v8355_v54 = vld [vmem:[%s11941_s1 + $0x1804] ss:$16 sps:$4 sm:$0xff]  }
 0x161   :  { %5496 = vmatprep.subr.bf16.mxu1 %v8262_v55  ;;  %v8358_v55 = vld [vmem:[%s11941_s1 + $0xc] ss:$16 sps:$4 sm:$0xff]  }
 0x163   :  { %5454 = vmatpush2.bf16.msra.mxu0 %v8257_v56  ;;  %v8353_v56 = vld [vmem:[%s11941_s1 + $0x1800] ss:$16 sps:$4 sm:$0xff]  }
 0x164   :  { %5497 = vmatpush2.bf16.msra.mxu1 %v8260_v57  ;;  %5455 = vmatprep.subr.bf16.mxu0 %v8265_v58  ;;  %v8356_v57 = vld [vmem:[%s11941_s1 + $0x8] ss:$16 sps:$4 sm:$0xff]   ;;  %v8359_v58 = vld [vmem:[%s11942_s0 + $0x60] ss:$100 sps:$4 sm:$0xff]  }
 0x165   :  { %5498 = vmatprep.subr.bf16.mxu1 %v8268_v59  ;;  %v8362_v59 = vld [vmem:[%s11941_s1 + $0x1ec] ss:$16 sps:$4 sm:$0xff]  }
 0x167   :  { %5456 = vmatpush2.bf16.msra.mxu0 %v8263_v60  ;;  %v8365_v60 = vld [vmem:[%s11941_s1 + $0x2ec] ss:$16 sps:$4 sm:$0xff]  }
 0x168   :  { %5499 = vmatpush2.bf16.msra.mxu1 %v8266_v61  ;;  %5457 = vmatprep.subr.bf16.mxu0 %v8271_v62  ;;  %v8360_v61 = vld [vmem:[%s11941_s1 + $0x1e8] ss:$16 sps:$4 sm:$0xff]  }
 0x169   :  { %5500 = vmatprep.subr.bf16.mxu1 %v8274_v63  ;;  %v8363_v62 = vld [vmem:[%s11941_s1 + $0x2e8] ss:$16 sps:$4 sm:$0xff]   ;;  %v8368_v63 = vld [vmem:[%s11941_s1 + $0x1cc] ss:$16 sps:$4 sm:$0xff]  }
 0x16b   :  { %5458 = vmatpush2.bf16.msra.mxu0 %v8269_v0  ;;  %v8371_v0 = vld [vmem:[%s11941_s1 + $0x2cc] ss:$16 sps:$4 sm:$0xff]  }
 0x16c   :  { %5501 = vmatpush2.bf16.msra.mxu1 %v8272_v1  ;;  %5459 = vmatprep.subr.bf16.mxu0 %v8277_v2  ;;  %v8366_v1 = vld [vmem:[%s11941_s1 + $0x1c8] ss:$16 sps:$4 sm:$0xff]  }
 0x16d   :  { %5502 = vmatprep.subr.bf16.mxu1 %v8280_v3  ;;  %v8369_v2 = vld [vmem:[%s11941_s1 + $0x2c8] ss:$16 sps:$4 sm:$0xff]   ;;  %v8374_v3 = vld [vmem:[%s11941_s1 + $0x1ac] ss:$16 sps:$4 sm:$0xff]  }
 0x16f   :  { %5460 = vmatpush2.bf16.msra.mxu0 %v8275_v4  ;;  %v8377_v4 = vld [vmem:[%s11941_s1 + $0x2ac] ss:$16 sps:$4 sm:$0xff]  }
 0x170   :  { %5503 = vmatpush2.bf16.msra.mxu1 %v8278_v5  ;;  %5461 = vmatprep.subr.bf16.mxu0 %v8283_v6  ;;  %v8985_v5 = vld [vmem:[%s11942_s0 + $0xc] ss:$100 sps:$4 sm:$0xff]   ;;  %v8372_v6 = vld [vmem:[%s11941_s1 + $0x1a8] ss:$16 sps:$4 sm:$0xff]  }
 0x171   :  { %5504 = vmatprep.subr.bf16.mxu1 %v8286_v7  ;;  %v8375_v7 = vld [vmem:[%s11941_s1 + $0x2a8] ss:$16 sps:$4 sm:$0xff]  }
 0x173   :  { %5462 = vmatpush2.bf16.msra.mxu0 %v8281_v8  ;;  %v8380_v8 = vld [vmem:[%s11941_s1 + $0x18c] ss:$16 sps:$4 sm:$0xff]  }
 0x174   :  { %5505 = vmatpush2.bf16.msra.mxu1 %v8284_v9  ;;  %5463 = vmatprep.subr.bf16.mxu0 %v8289_v10  ;;  %v8383_v9 = vld [vmem:[%s11941_s1 + $0x28c] ss:$16 sps:$4 sm:$0xff]   ;;  %v8378_v10 = vld [vmem:[%s11941_s1 + $0x188] ss:$16 sps:$4 sm:$0xff]  }
 0x175   :  { %5506 = vmatprep.subr.bf16.mxu1 %v8292_v11  ;;  %v8381_v11 = vld [vmem:[%s11941_s1 + $0x288] ss:$16 sps:$4 sm:$0xff]  }
 0x177   :  { %5464 = vmatpush2.bf16.msra.mxu0 %v8287_v12  ;;  %v8386_v12 = vld [vmem:[%s11941_s1 + $0x16c] ss:$16 sps:$4 sm:$0xff]  }
 0x178   :  { %5507 = vmatpush2.bf16.msra.mxu1 %v8290_v13  ;;  %5465 = vmatprep.subr.bf16.mxu0 %v8295_v14  ;;  %v8389_v13 = vld [vmem:[%s11941_s1 + $0x26c] ss:$16 sps:$4 sm:$0xff]   ;;  %v8384_v14 = vld [vmem:[%s11941_s1 + $0x168] ss:$16 sps:$4 sm:$0xff]  }
 0x179   :  { %5508 = vmatprep.subr.bf16.mxu1 %v8298_v15  ;;  %v8387_v15 = vld [vmem:[%s11941_s1 + $0x268] ss:$16 sps:$4 sm:$0xff]  }
 0x17b   :  { %5466 = vmatpush2.bf16.msra.mxu0 %v8293_v16  ;;  %v8392_v16 = vld [vmem:[%s11941_s1 + $0x14c] ss:$16 sps:$4 sm:$0xff]  }
 0x17c   :  { %5509 = vmatpush2.bf16.msra.mxu1 %v8296_v17  ;;  %5467 = vmatprep.subr.bf16.mxu0 %v8301_v18  ;;  %v8395_v17 = vld [vmem:[%s11941_s1 + $0x24c] ss:$16 sps:$4 sm:$0xff]   ;;  %v8390_v18 = vld [vmem:[%s11941_s1 + $0x148] ss:$16 sps:$4 sm:$0xff]  }
 0x17d   :  { %5510 = vmatprep.subr.bf16.mxu1 %v8304_v19  ;;  %v8393_v19 = vld [vmem:[%s11941_s1 + $0x248] ss:$16 sps:$4 sm:$0xff]  }
 0x17f   :  { %5468 = vmatpush2.bf16.msra.mxu0 %v8299_v20  ;;  %v8398_v20 = vld [vmem:[%s11941_s1 + $0x12c] ss:$16 sps:$4 sm:$0xff]  }
 0x180   :  { %5511 = vmatpush2.bf16.msra.mxu1 %v8302_v21  ;;  %5523 = vmatprep.subr.bf16.mxu0 %v8313_v24  ;;  %v8401_v21 = vld [vmem:[%s11941_s1 + $0x22c] ss:$16 sps:$4 sm:$0xff]  }
 0x181   :  { %5566 = vmatprep.subr.bf16.mxu1 %v8316_v25  ;;  %v8404_v24 = vld [vmem:[%s11941_s1 + $0x10c] ss:$16 sps:$4 sm:$0xff]  }
 0x182   :  { %5470 = vmatmul.mubr.bf16.vlgmr.msra.gmra.mxu0 %v8305_v22  ;;  %v8396_v22 = vld [vmem:[%s11941_s1 + $0x128] ss:$16 sps:$4 sm:$0xff]   ;;  %v8407_v25 = vld [vmem:[%s11941_s1 + $0x20c] ss:$16 sps:$4 sm:$0xff]  }
 0x183   :  { %5513 = vmatmul.mubr.bf16.vlgmr.msra.gmra.mxu1 %v8308_v23  ;;  %5524 = vmatpush1.bf16.msra.mxu0 %v8311_v26  ;;  %v8399_v23 = vld [vmem:[%s11941_s1 + $0x228] ss:$16 sps:$4 sm:$0xff]  }
 0x184   :  { %5567 = vmatpush1.bf16.msra.mxu1 %v8314_v27  ;;  %5525 = vmatprep.subr.bf16.mxu0 %v8319_v28  ;;  %v8402_v26 = vld [vmem:[%s11941_s1 + $0x108] ss:$16 sps:$4 sm:$0xff]   ;;  %v8410_v28 = vld [vmem:[%s11941_s1 + $0x3ec] ss:$16 sps:$4 sm:$0xff]  }
 0x185   :  { %5568 = vmatprep.subr.bf16.mxu1 %v8322_v29  ;;  %5555 = vmatprep.mubr.bf16.mxu0 %v9009_v36  ;;  %v8405_v27 = vld [vmem:[%s11941_s1 + $0x208] ss:$16 sps:$4 sm:$0xff]   ;;  %v8413_v29 = vld [vmem:[%s11941_s1 + $0x4ec] ss:$16 sps:$4 sm:$0xff]  }
 0x186   :  { %5598 = vmatprep.mubr.bf16.mxu1 %v8984_v37  ;;  %v8986_v37 = vld [vmem:[%s11942_s0] ss:$100 sps:$4 sm:$0xff]  }
 0x187   :  { %5526 = vmatpush1.bf16.msra.mxu0 %v8317_v30  ;;  %v8408_v30 = vld [vmem:[%s11941_s1 + $0x3e8] ss:$16 sps:$4 sm:$0xff]  }
 0x188   :  { %5569 = vmatpush1.bf16.msra.mxu1 %v8320_v31  ;;  %5527 = vmatprep.subr.bf16.mxu0 %v8325_v32  ;;  %v8411_v31 = vld [vmem:[%s11941_s1 + $0x4e8] ss:$16 sps:$4 sm:$0xff]   ;;  %v8416_v32 = vld [vmem:[%s11941_s1 + $0x3cc] ss:$16 sps:$4 sm:$0xff]  }
 0x189   :  { %5570 = vmatprep.subr.bf16.mxu1 %v8328_v33  ;;  %v8419_v33 = vld [vmem:[%s11941_s1 + $0x4cc] ss:$16 sps:$4 sm:$0xff]  }
 0x18b   :  { %5528 = vmatpush1.bf16.msra.mxu0 %v8323_v34  ;;  %v8414_v34 = vld [vmem:[%s11941_s1 + $0x3c8] ss:$16 sps:$4 sm:$0xff]  }
 0x18c   :  { %5571 = vmatpush1.bf16.msra.mxu1 %v8326_v35  ;;  %5529 = vmatprep.subr.bf16.mxu0 %v8331_v38  ;;  %v8417_v35 = vld [vmem:[%s11941_s1 + $0x4c8] ss:$16 sps:$4 sm:$0xff]   ;;  %v8422_v38 = vld [vmem:[%s11941_s1 + $0x3ac] ss:$16 sps:$4 sm:$0xff]  }
 0x18d   :  { %5572 = vmatprep.subr.bf16.mxu1 %v8334_v39  ;;  %v8425_v39 = vld [vmem:[%s11941_s1 + $0x4ac] ss:$16 sps:$4 sm:$0xff]  }
 0x18f   :  { %5530 = vmatpush1.bf16.msra.mxu0 %v8329_v40  ;;  %v8420_v40 = vld [vmem:[%s11941_s1 + $0x3a8] ss:$16 sps:$4 sm:$0xff]  }
 0x190   :  { %5573 = vmatpush1.bf16.msra.mxu1 %v8332_v41  ;;  %5531 = vmatprep.subr.bf16.mxu0 %v8337_v42  ;;  %v8423_v41 = vld [vmem:[%s11941_s1 + $0x4a8] ss:$16 sps:$4 sm:$0xff]  }
 0x191   :  { %5574 = vmatprep.subr.bf16.mxu1 %v8340_v43  ;;  %v8987_v42 = vld [vmem:[%s11942_s0 + $0x14] ss:$100 sps:$4 sm:$0xff]   ;;  %v8428_v43 = vld [vmem:[%s11941_s1 + $0x38c] ss:$16 sps:$4 sm:$0xff]  }
 0x193   :  { %5532 = vmatpush1.bf16.msra.mxu0 %v8335_v44  ;;  %v8431_v44 = vld [vmem:[%s11941_s1 + $0x48c] ss:$16 sps:$4 sm:$0xff]  }
 0x194   :  { %5575 = vmatpush1.bf16.msra.mxu1 %v8338_v45  ;;  %5533 = vmatprep.subr.bf16.mxu0 %v8343_v46  ;;  %v8426_v45 = vld [vmem:[%s11941_s1 + $0x388] ss:$16 sps:$4 sm:$0xff]  }
 0x195   :  { %5576 = vmatprep.subr.bf16.mxu1 %v8346_v47  ;;  %v8429_v46 = vld [vmem:[%s11941_s1 + $0x488] ss:$16 sps:$4 sm:$0xff]   ;;  %v8434_v47 = vld [vmem:[%s11941_s1 + $0x36c] ss:$16 sps:$4 sm:$0xff]  }
 0x197   :  { %5534 = vmatpush1.bf16.msra.mxu0 %v8341_v48  ;;  %v8437_v48 = vld [vmem:[%s11941_s1 + $0x46c] ss:$16 sps:$4 sm:$0xff]  }
 0x198   :  { %5577 = vmatpush1.bf16.msra.mxu1 %v8344_v49  ;;  %5535 = vmatprep.subr.bf16.mxu0 %v8349_v50  ;;  %v8432_v49 = vld [vmem:[%s11941_s1 + $0x368] ss:$16 sps:$4 sm:$0xff]  }
 0x199   :  { %5578 = vmatprep.subr.bf16.mxu1 %v8352_v51  ;;  %v8435_v50 = vld [vmem:[%s11941_s1 + $0x468] ss:$16 sps:$4 sm:$0xff]   ;;  %v8440_v51 = vld [vmem:[%s11941_s1 + $0x34c] ss:$16 sps:$4 sm:$0xff]  }
 0x19b   :  { %5536 = vmatpush1.bf16.msra.mxu0 %v8347_v52  ;;  %v8443_v52 = vld [vmem:[%s11941_s1 + $0x44c] ss:$16 sps:$4 sm:$0xff]  }
 0x19c   :  { %5579 = vmatpush1.bf16.msra.mxu1 %v8350_v53  ;;  %5537 = vmatprep.subr.bf16.mxu0 %v8355_v54  ;;  %v8438_v53 = vld [vmem:[%s11941_s1 + $0x348] ss:$16 sps:$4 sm:$0xff]  }
 0x19d   :  { %5580 = vmatprep.subr.bf16.mxu1 %v8358_v55  ;;  %v8441_v54 = vld [vmem:[%s11941_s1 + $0x448] ss:$16 sps:$4 sm:$0xff]   ;;  %v8446_v55 = vld [vmem:[%s11941_s1 + $0x32c] ss:$16 sps:$4 sm:$0xff]  }
 0x19f   :  { %5538 = vmatpush1.bf16.msra.mxu0 %v8353_v56  ;;  %v8449_v56 = vld [vmem:[%s11941_s1 + $0x42c] ss:$16 sps:$4 sm:$0xff]  }
 0x1a0   :  { %5581 = vmatpush1.bf16.msra.mxu1 %v8356_v57  ;;  %5609 = vmatprep.subr.bf16.mxu0 %v8365_v60  ;;  %v8444_v57 = vld [vmem:[%s11941_s1 + $0x328] ss:$16 sps:$4 sm:$0xff]   ;;  %v8455_v60 = vld [vmem:[%s11941_s1 + $0x40c] ss:$16 sps:$4 sm:$0xff]  }
 0x1a1   :  { %5582 = vmatprep.subr.bf16.mxu1 %v8362_v59  ;;  %v8452_v59 = vld [vmem:[%s11941_s1 + $0x30c] ss:$16 sps:$4 sm:$0xff]  }
 0x1a2   :  { %5556 = vmatmul.mubr.bf16.vlgmr.msra.gmra.mxu0 %v8359_v58  ;;  %v8447_v58 = vld [vmem:[%s11941_s1 + $0x428] ss:$16 sps:$4 sm:$0xff]  }
 0x1a3   :  { %5610 = vmatpush1.bf16.msra.mxu0 %v8363_v62  ;;  %5641 = vmatprep.mubr.bf16.mxu0 %v8985_v5  ;;  %v8453_v62 = vld [vmem:[%s11941_s1 + $0x408] ss:$16 sps:$4 sm:$0xff]  }
 0x1a4   :  { %5583 = vmatpush2.bf16.msra.mxu1 %v8360_v61  ;;  %5611 = vmatprep.subr.bf16.mxu0 %v8371_v0  ;;  %v8450_v61 = vld [vmem:[%s11941_s1 + $0x308] ss:$16 sps:$4 sm:$0xff]   ;;  %v8461_v0 = vld [vmem:[%s11941_s1 + $0x6ec] ss:$16 sps:$4 sm:$0xff]  }
 0x1a5   :  { %5584 = vmatprep.subr.bf16.mxu1 %v8368_v63  ;;  %v8458_v63 = vld [vmem:[%s11941_s1 + $0x5ec] ss:$16 sps:$4 sm:$0xff]   ;;  %v8462_v5 = vld [vmem:[%s11941_s1 + $0x5c8] ss:$16 sps:$4 sm:$0xff]  }
 0x1a7   :  { %5612 = vmatpush1.bf16.msra.mxu0 %v8369_v2  ;;  %v8459_v2 = vld [vmem:[%s11941_s1 + $0x6e8] ss:$16 sps:$4 sm:$0xff]  }
 0x1a8   :  { %5585 = vmatpush2.bf16.msra.mxu1 %v8366_v1  ;;  %5613 = vmatprep.subr.bf16.mxu0 %v8377_v4  ;;  %v8456_v1 = vld [vmem:[%s11941_s1 + $0x5e8] ss:$16 sps:$4 sm:$0xff]   ;;  %v8467_v4 = vld [vmem:[%s11941_s1 + $0x6cc] ss:$16 sps:$4 sm:$0xff]  }
 0x1a9   :  { %5586 = vmatprep.subr.bf16.mxu1 %v8374_v3  ;;  %v8464_v3 = vld [vmem:[%s11941_s1 + $0x5cc] ss:$16 sps:$4 sm:$0xff]  }
 0x1ab   :  { %5614 = vmatpush1.bf16.msra.mxu0 %v8375_v7  ;;  %v8988_v7 = vld [vmem:[%s11942_s0 + $0x8] ss:$100 sps:$4 sm:$0xff]  }
 0x1ac   :  { %5587 = vmatpush2.bf16.msra.mxu1 %v8372_v6  ;;  %5615 = vmatprep.subr.bf16.mxu0 %v8383_v9  ;;  %v8465_v6 = vld [vmem:[%s11941_s1 + $0x6c8] ss:$16 sps:$4 sm:$0xff]   ;;  %v8473_v9 = vld [vmem:[%s11941_s1 + $0x6ac] ss:$16 sps:$4 sm:$0xff]  }
 0x1ad   :  { %5588 = vmatprep.subr.bf16.mxu1 %v8380_v8  ;;  %v8470_v8 = vld [vmem:[%s11941_s1 + $0x5ac] ss:$16 sps:$4 sm:$0xff]  }
 0x1af   :  { %5616 = vmatpush1.bf16.msra.mxu0 %v8381_v11  ;;  %v8471_v11 = vld [vmem:[%s11941_s1 + $0x6a8] ss:$16 sps:$4 sm:$0xff]  }
 0x1b0   :  { %5589 = vmatpush2.bf16.msra.mxu1 %v8378_v10  ;;  %5617 = vmatprep.subr.bf16.mxu0 %v8389_v13  ;;  %v8468_v10 = vld [vmem:[%s11941_s1 + $0x5a8] ss:$16 sps:$4 sm:$0xff]   ;;  %v8476_v13 = vld [vmem:[%s11941_s1 + $0x58c] ss:$16 sps:$4 sm:$0xff]  }
 0x1b1   :  { %5590 = vmatprep.subr.bf16.mxu1 %v8386_v12  ;;  %v8989_v12 = vld [vmem:[%s11942_s0 + $0x1c] ss:$100 sps:$4 sm:$0xff]  }
 0x1b3   :  { %5618 = vmatpush1.bf16.msra.mxu0 %v8387_v15  ;;  %v8474_v15 = vld [vmem:[%s11941_s1 + $0x588] ss:$16 sps:$4 sm:$0xff]  }
 0x1b4   :  { %5591 = vmatpush2.bf16.msra.mxu1 %v8384_v14  ;;  %5619 = vmatprep.subr.bf16.mxu0 %v8395_v17  ;;  %v8479_v14 = vld [vmem:[%s11941_s1 + $0x68c] ss:$16 sps:$4 sm:$0xff]  }
 0x1b5   :  { %5592 = vmatprep.subr.bf16.mxu1 %v8392_v16  ;;  %v8477_v16 = vld [vmem:[%s11941_s1 + $0x688] ss:$16 sps:$4 sm:$0xff]   ;;  %v8482_v17 = vld [vmem:[%s11941_s1 + $0x56c] ss:$16 sps:$4 sm:$0xff]  }
 0x1b7   :  { %5620 = vmatpush1.bf16.msra.mxu0 %v8393_v19  ;;  %v8480_v19 = vld [vmem:[%s11941_s1 + $0x568] ss:$16 sps:$4 sm:$0xff]  }
 0x1b8   :  { %5593 = vmatpush2.bf16.msra.mxu1 %v8390_v18  ;;  %5621 = vmatprep.subr.bf16.mxu0 %v8401_v21  ;;  %v8485_v18 = vld [vmem:[%s11941_s1 + $0x66c] ss:$16 sps:$4 sm:$0xff]  }
 0x1b9   :  { %5594 = vmatprep.subr.bf16.mxu1 %v8398_v20  ;;  %v8483_v20 = vld [vmem:[%s11941_s1 + $0x668] ss:$16 sps:$4 sm:$0xff]   ;;  %v8488_v21 = vld [vmem:[%s11941_s1 + $0x54c] ss:$16 sps:$4 sm:$0xff]  }
 0x1bb   :  { %5622 = vmatpush1.bf16.msra.mxu0 %v8399_v23  ;;  %v8486_v23 = vld [vmem:[%s11941_s1 + $0x548] ss:$16 sps:$4 sm:$0xff]  }
 0x1bc   :  { %5595 = vmatpush2.bf16.msra.mxu1 %v8396_v22  ;;  %5623 = vmatprep.subr.bf16.mxu0 %v8407_v25  ;;  %v8491_v22 = vld [vmem:[%s11941_s1 + $0x64c] ss:$16 sps:$4 sm:$0xff]  }
 0x1bd   :  { %5596 = vmatprep.subr.bf16.mxu1 %v8404_v24  ;;  %v8489_v24 = vld [vmem:[%s11941_s1 + $0x648] ss:$16 sps:$4 sm:$0xff]   ;;  %v8494_v25 = vld [vmem:[%s11941_s1 + $0x52c] ss:$16 sps:$4 sm:$0xff]  }
 0x1bf   :  { %5624 = vmatpush1.bf16.msra.mxu0 %v8405_v27  ;;  %v8492_v27 = vld [vmem:[%s11941_s1 + $0x528] ss:$16 sps:$4 sm:$0xff]  }
 0x1c0   :  { %5597 = vmatpush2.bf16.msra.mxu1 %v8402_v26  ;;  %5625 = vmatprep.subr.bf16.mxu0 %v8410_v28  ;;  %v8497_v26 = vld [vmem:[%s11941_s1 + $0x62c] ss:$16 sps:$4 sm:$0xff]   ;;  %v8495_v28 = vld [vmem:[%s11941_s1 + $0x628] ss:$16 sps:$4 sm:$0xff]  }
 0x1c1   :  { %5652 = vmatprep.subr.bf16.mxu1 %v8413_v29  ;;  %v8500_v29 = vld [vmem:[%s11941_s1 + $0x50c] ss:$16 sps:$4 sm:$0xff]  }
 0x1c3   :  { %5599 = vmatmul.mubr.bf16.vlgmr.msra.gmra.mxu1 %v8986_v37  ;;  %5626 = vmatpush2.bf16.msra.mxu0 %v8408_v30  ;;  %v8503_v30 = vld [vmem:[%s11941_s1 + $0x60c] ss:$16 sps:$4 sm:$0xff]   ;;  %v8507_v37 = vld [vmem:[%s11941_s1 + $0x8e8] ss:$16 sps:$4 sm:$0xff]  }
 0x1c4   :  { %5653 = vmatpush1.bf16.msra.mxu1 %v8411_v31  ;;  %5627 = vmatprep.subr.bf16.mxu0 %v8416_v32  ;;  %v8498_v31 = vld [vmem:[%s11941_s1 + $0x508] ss:$16 sps:$4 sm:$0xff]  }
 0x1c5   :  { %5654 = vmatprep.subr.bf16.mxu1 %v8419_v33  ;;  %5684 = vmatprep.mubr.bf16.mxu1 %v8987_v42  ;;  %v8501_v32 = vld [vmem:[%s11941_s1 + $0x608] ss:$16 sps:$4 sm:$0xff]   ;;  %v8506_v33 = vld [vmem:[%s11941_s1 + $0x7ec] ss:$16 sps:$4 sm:$0xff]  }
 0x1c6   :  { %v8513_v42 = vld [vmem:[%s11941_s1 + $0x8c8] ss:$16 sps:$4 sm:$0xff]  }
 0x1c7   :  { %5628 = vmatpush2.bf16.msra.mxu0 %v8414_v34  ;;  %v8509_v34 = vld [vmem:[%s11941_s1 + $0x8ec] ss:$16 sps:$4 sm:$0xff]  }
 0x1c8   :  { %5655 = vmatpush1.bf16.msra.mxu1 %v8417_v35  ;;  %5629 = vmatprep.subr.bf16.mxu0 %v8422_v38  ;;  %v8504_v35 = vld [vmem:[%s11941_s1 + $0x7e8] ss:$16 sps:$4 sm:$0xff]   ;;  %v8512_v38 = vld [vmem:[%s11941_s1 + $0x7cc] ss:$16 sps:$4 sm:$0xff]  }
 0x1c9   :  { %5656 = vmatprep.subr.bf16.mxu1 %v8425_v39  ;;  %v8515_v39 = vld [vmem:[%s11941_s1 + $0x8cc] ss:$16 sps:$4 sm:$0xff]  }
 0x1cb   :  { %5630 = vmatpush2.bf16.msra.mxu0 %v8420_v40  ;;  %v8990_v40 = vld [vmem:[%s11942_s0 + $0x10] ss:$100 sps:$4 sm:$0xff]  }
 0x1cc   :  { %5657 = vmatpush1.bf16.msra.mxu1 %v8423_v41  ;;  %5631 = vmatprep.subr.bf16.mxu0 %v8428_v43  ;;  %v8510_v41 = vld [vmem:[%s11941_s1 + $0x7c8] ss:$16 sps:$4 sm:$0xff]   ;;  %v8518_v43 = vld [vmem:[%s11941_s1 + $0x7ac] ss:$16 sps:$4 sm:$0xff]  }
 0x1cd   :  { %5658 = vmatprep.subr.bf16.mxu1 %v8431_v44  ;;  %v8521_v44 = vld [vmem:[%s11941_s1 + $0x8ac] ss:$16 sps:$4 sm:$0xff]  }
 0x1cf   :  { %5632 = vmatpush2.bf16.msra.mxu0 %v8426_v45  ;;  %v8991_v45 = vld [vmem:[%s11942_s0 + $0x24] ss:$100 sps:$4 sm:$0xff]  }
 0x1d0   :  { %5659 = vmatpush1.bf16.msra.mxu1 %v8429_v46  ;;  %5633 = vmatprep.subr.bf16.mxu0 %v8434_v47  ;;  %v8516_v46 = vld [vmem:[%s11941_s1 + $0x7a8] ss:$16 sps:$4 sm:$0xff]  }
 0x1d1   :  { %5660 = vmatprep.subr.bf16.mxu1 %v8437_v48  ;;  %v8519_v47 = vld [vmem:[%s11941_s1 + $0x8a8] ss:$16 sps:$4 sm:$0xff]   ;;  %v8524_v48 = vld [vmem:[%s11941_s1 + $0x78c] ss:$16 sps:$4 sm:$0xff]  }
 0x1d3   :  { %5634 = vmatpush2.bf16.msra.mxu0 %v8432_v49  ;;  %v8527_v49 = vld [vmem:[%s11941_s1 + $0x88c] ss:$16 sps:$4 sm:$0xff]  }
 0x1d4   :  { %5661 = vmatpush1.bf16.msra.mxu1 %v8435_v50  ;;  %5635 = vmatprep.subr.bf16.mxu0 %v8440_v51  ;;  %v8522_v50 = vld [vmem:[%s11941_s1 + $0x788] ss:$16 sps:$4 sm:$0xff]  }
 0x1d5   :  { %5662 = vmatprep.subr.bf16.mxu1 %v8443_v52  ;;  %v8525_v51 = vld [vmem:[%s11941_s1 + $0x888] ss:$16 sps:$4 sm:$0xff]   ;;  %v8530_v52 = vld [vmem:[%s11941_s1 + $0x76c] ss:$16 sps:$4 sm:$0xff]  }
 0x1d7   :  { %5636 = vmatpush2.bf16.msra.mxu0 %v8438_v53  ;;  %v8533_v53 = vld [vmem:[%s11941_s1 + $0x86c] ss:$16 sps:$4 sm:$0xff]  }
 0x1d8   :  { %5663 = vmatpush1.bf16.msra.mxu1 %v8441_v54  ;;  %5637 = vmatprep.subr.bf16.mxu0 %v8446_v55  ;;  %v8528_v54 = vld [vmem:[%s11941_s1 + $0x768] ss:$16 sps:$4 sm:$0xff]  }
 0x1d9   :  { %5664 = vmatprep.subr.bf16.mxu1 %v8449_v56  ;;  %v8531_v55 = vld [vmem:[%s11941_s1 + $0x868] ss:$16 sps:$4 sm:$0xff]   ;;  %v8536_v56 = vld [vmem:[%s11941_s1 + $0x74c] ss:$16 sps:$4 sm:$0xff]  }
 0x1db   :  { %5638 = vmatpush2.bf16.msra.mxu0 %v8444_v57  ;;  %v8539_v57 = vld [vmem:[%s11941_s1 + $0x84c] ss:$16 sps:$4 sm:$0xff]  }
 0x1dc   :  { %5665 = vmatpush1.bf16.msra.mxu1 %v8447_v58  ;;  %5639 = vmatprep.subr.bf16.mxu0 %v8452_v59  ;;  %v8534_v58 = vld [vmem:[%s11941_s1 + $0x748] ss:$16 sps:$4 sm:$0xff]  }
 0x1dd   :  { %5666 = vmatprep.subr.bf16.mxu1 %v8455_v60  ;;  %v8537_v59 = vld [vmem:[%s11941_s1 + $0x848] ss:$16 sps:$4 sm:$0xff]   ;;  %v8542_v60 = vld [vmem:[%s11941_s1 + $0x72c] ss:$16 sps:$4 sm:$0xff]  }
 0x1df   :  { %5640 = vmatpush2.bf16.msra.mxu0 %v8450_v61  ;;  %v8545_v61 = vld [vmem:[%s11941_s1 + $0x82c] ss:$16 sps:$4 sm:$0xff]  }
 0x1e0   :  { %5667 = vmatpush1.bf16.msra.mxu1 %v8453_v62  ;;  %5695 = vmatprep.subr.bf16.mxu0 %v8461_v0  ;;  %v8540_v62 = vld [vmem:[%s11941_s1 + $0x728] ss:$16 sps:$4 sm:$0xff]   ;;  %v8548_v0 = vld [vmem:[%s11941_s1 + $0x70c] ss:$16 sps:$4 sm:$0xff]  }
 0x1e1   :  { %5668 = vmatprep.subr.bf16.mxu1 %v8458_v63  ;;  %v8543_v63 = vld [vmem:[%s11941_s1 + $0x828] ss:$16 sps:$4 sm:$0xff]  }
 0x1e2   :  { %5642 = vmatmul.mubr.bf16.vlgmr.msra.gmra.mxu0 %v8988_v7  ;;  %v8555_v7 = vld [vmem:[%s11941_s1 + $0xae8] ss:$16 sps:$4 sm:$0xff]  }
 0x1e3   :  { %5696 = vmatpush1.bf16.msra.mxu0 %v8459_v2  ;;  %5727 = vmatprep.mubr.bf16.mxu0 %v8989_v12  ;;  %v8546_v2 = vld [vmem:[%s11941_s1 + $0x708] ss:$16 sps:$4 sm:$0xff]  }
 0x1e4   :  { %5669 = vmatpush2.bf16.msra.mxu1 %v8456_v1  ;;  %5697 = vmatprep.subr.bf16.mxu0 %v8467_v4  ;;  %v8551_v1 = vld [vmem:[%s11941_s1 + $0x80c] ss:$16 sps:$4 sm:$0xff]   ;;  %v8561_v12 = vld [vmem:[%s11941_s1 + $0xac8] ss:$16 sps:$4 sm:$0xff]  }
 0x1e5   :  { %5670 = vmatprep.subr.bf16.mxu1 %v8464_v3  ;;  %v8549_v3 = vld [vmem:[%s11941_s1 + $0x808] ss:$16 sps:$4 sm:$0xff]   ;;  %v8554_v4 = vld [vmem:[%s11941_s1 + $0x9ec] ss:$16 sps:$4 sm:$0xff]  }
 0x1e7   :  { %5698 = vmatpush1.bf16.msra.mxu0 %v8465_v6  ;;  %v8552_v6 = vld [vmem:[%s11941_s1 + $0x9e8] ss:$16 sps:$4 sm:$0xff]  }
 0x1e8   :  { %5671 = vmatpush2.bf16.msra.mxu1 %v8462_v5  ;;  %5699 = vmatprep.subr.bf16.mxu0 %v8473_v9  ;;  %v8557_v5 = vld [vmem:[%s11941_s1 + $0xaec] ss:$16 sps:$4 sm:$0xff]  }
 0x1e9   :  { %5672 = vmatprep.subr.bf16.mxu1 %v8470_v8  ;;  %v8560_v8 = vld [vmem:[%s11941_s1 + $0x9cc] ss:$16 sps:$4 sm:$0xff]  }
 0x1ea   :  { %v8563_v9 = vld [vmem:[%s11941_s1 + $0xacc] ss:$16 sps:$4 sm:$0xff]  }
 0x1eb   :  { %5700 = vmatpush1.bf16.msra.mxu0 %v8471_v11  ;;  %v8558_v11 = vld [vmem:[%s11941_s1 + $0x9c8] ss:$16 sps:$4 sm:$0xff]  }
 0x1ec   :  { %5673 = vmatpush2.bf16.msra.mxu1 %v8468_v10  ;;  %5701 = vmatprep.subr.bf16.mxu0 %v8479_v14  ;;  %v8992_v10 = vld [vmem:[%s11942_s0 + $0x18] ss:$100 sps:$4 sm:$0xff]  }
 0x1ed   :  { %5674 = vmatprep.subr.bf16.mxu1 %v8476_v13  ;;  %v8566_v13 = vld [vmem:[%s11941_s1 + $0x9ac] ss:$16 sps:$4 sm:$0xff]  }
 0x1ee   :  { %v8569_v14 = vld [vmem:[%s11941_s1 + $0xaac] ss:$16 sps:$4 sm:$0xff]  }
 0x1ef   :  { %5702 = vmatpush1.bf16.msra.mxu0 %v8477_v16  ;;  %v8564_v16 = vld [vmem:[%s11941_s1 + $0x9a8] ss:$16 sps:$4 sm:$0xff]  }
 0x1f0   :  { %5675 = vmatpush2.bf16.msra.mxu1 %v8474_v15  ;;  %5703 = vmatprep.subr.bf16.mxu0 %v8485_v18  ;;  %v8993_v15 = vld [vmem:[%s11942_s0 + $0x2c] ss:$100 sps:$4 sm:$0xff]  }
 0x1f1   :  { %5676 = vmatprep.subr.bf16.mxu1 %v8482_v17  ;;  %v8567_v17 = vld [vmem:[%s11941_s1 + $0xaa8] ss:$16 sps:$4 sm:$0xff]   ;;  %v8572_v18 = vld [vmem:[%s11941_s1 + $0x98c] ss:$16 sps:$4 sm:$0xff]  }
 0x1f3   :  { %5704 = vmatpush1.bf16.msra.mxu0 %v8483_v20  ;;  %v8570_v20 = vld [vmem:[%s11941_s1 + $0x988] ss:$16 sps:$4 sm:$0xff]  }
 0x1f4   :  { %5677 = vmatpush2.bf16.msra.mxu1 %v8480_v19  ;;  %5705 = vmatprep.subr.bf16.mxu0 %v8491_v22  ;;  %v8575_v19 = vld [vmem:[%s11941_s1 + $0xa8c] ss:$16 sps:$4 sm:$0xff]  }
 0x1f5   :  { %5678 = vmatprep.subr.bf16.mxu1 %v8488_v21  ;;  %v8573_v21 = vld [vmem:[%s11941_s1 + $0xa88] ss:$16 sps:$4 sm:$0xff]   ;;  %v8578_v22 = vld [vmem:[%s11941_s1 + $0x96c] ss:$16 sps:$4 sm:$0xff]  }
 0x1f7   :  { %5706 = vmatpush1.bf16.msra.mxu0 %v8489_v24  ;;  %v8576_v24 = vld [vmem:[%s11941_s1 + $0x968] ss:$16 sps:$4 sm:$0xff]  }
 0x1f8   :  { %5679 = vmatpush2.bf16.msra.mxu1 %v8486_v23  ;;  %5707 = vmatprep.subr.bf16.mxu0 %v8497_v26  ;;  %v8581_v23 = vld [vmem:[%s11941_s1 + $0xa6c] ss:$16 sps:$4 sm:$0xff]  }
 0x1f9   :  { %5680 = vmatprep.subr.bf16.mxu1 %v8494_v25  ;;  %v8579_v25 = vld [vmem:[%s11941_s1 + $0xa68] ss:$16 sps:$4 sm:$0xff]   ;;  %v8584_v26 = vld [vmem:[%s11941_s1 + $0x94c] ss:$16 sps:$4 sm:$0xff]  }
 0x1fb   :  { %5708 = vmatpush1.bf16.msra.mxu0 %v8495_v28  ;;  %v8582_v28 = vld [vmem:[%s11941_s1 + $0x948] ss:$16 sps:$4 sm:$0xff]  }
 0x1fc   :  { %5681 = vmatpush2.bf16.msra.mxu1 %v8492_v27  ;;  %5709 = vmatprep.subr.bf16.mxu0 %v8503_v30  ;;  %v8587_v27 = vld [vmem:[%s11941_s1 + $0xa4c] ss:$16 sps:$4 sm:$0xff]  }
 0x1fd   :  { %5682 = vmatprep.subr.bf16.mxu1 %v8500_v29  ;;  %v8585_v29 = vld [vmem:[%s11941_s1 + $0xa48] ss:$16 sps:$4 sm:$0xff]   ;;  %v8590_v30 = vld [vmem:[%s11941_s1 + $0x92c] ss:$16 sps:$4 sm:$0xff]  }
 0x1ff   :  { %5710 = vmatpush1.bf16.msra.mxu0 %v8501_v32  ;;  %v8588_v32 = vld [vmem:[%s11941_s1 + $0x928] ss:$16 sps:$4 sm:$0xff]  }
 0x200   :  { %5683 = vmatpush2.bf16.msra.mxu1 %v8498_v31  ;;  %5711 = vmatprep.subr.bf16.mxu0 %v8506_v33  ;;  %v8593_v31 = vld [vmem:[%s11941_s1 + $0xa2c] ss:$16 sps:$4 sm:$0xff]   ;;  %v8591_v33 = vld [vmem:[%s11941_s1 + $0xa28] ss:$16 sps:$4 sm:$0xff]  }
 0x201   :  { %5738 = vmatprep.subr.bf16.mxu1 %v8509_v34  ;;  %v8596_v34 = vld [vmem:[%s11941_s1 + $0x90c] ss:$16 sps:$4 sm:$0xff]  }
 0x203   :  { %5685 = vmatmul.mubr.bf16.vlgmr.msra.gmra.mxu1 %v8990_v40  ;;  %5712 = vmatpush2.bf16.msra.mxu0 %v8504_v35  ;;  %v8599_v35 = vld [vmem:[%s11941_s1 + $0xa0c] ss:$16 sps:$4 sm:$0xff]  }
 0x204   :  { %5739 = vmatpush1.bf16.msra.mxu1 %v8507_v37  ;;  %5713 = vmatprep.subr.bf16.mxu0 %v8512_v38  ;;  %v8594_v37 = vld [vmem:[%s11941_s1 + $0x908] ss:$16 sps:$4 sm:$0xff]   ;;  %v8605_v40 = vld [vmem:[%s11941_s1 + $0xcec] ss:$16 sps:$4 sm:$0xff]  }
 0x205   :  { %5740 = vmatprep.subr.bf16.mxu1 %v8515_v39  ;;  %5770 = vmatprep.mubr.bf16.mxu1 %v8991_v45  ;;  %v8597_v38 = vld [vmem:[%s11941_s1 + $0xa08] ss:$16 sps:$4 sm:$0xff]   ;;  %v8602_v39 = vld [vmem:[%s11941_s1 + $0xbec] ss:$16 sps:$4 sm:$0xff]   ;;  %v8994_v45 = vld [vmem:[%s11942_s0 + $0x20] ss:$100 sps:$4 sm:$0xff]  }
 0x207   :  { %5714 = vmatpush2.bf16.msra.mxu0 %v8510_v41  ;;  %v8600_v41 = vld [vmem:[%s11941_s1 + $0xbe8] ss:$16 sps:$4 sm:$0xff]  }
 0x208   :  { %5741 = vmatpush1.bf16.msra.mxu1 %v8513_v42  ;;  %5715 = vmatprep.subr.bf16.mxu0 %v8518_v43  ;;  %v8603_v42 = vld [vmem:[%s11941_s1 + $0xce8] ss:$16 sps:$4 sm:$0xff]   ;;  %v8608_v43 = vld [vmem:[%s11941_s1 + $0xbcc] ss:$16 sps:$4 sm:$0xff]  }
 0x209   :  { %5742 = vmatprep.subr.bf16.mxu1 %v8521_v44  ;;  %v8611_v44 = vld [vmem:[%s11941_s1 + $0xccc] ss:$16 sps:$4 sm:$0xff]  }
 0x20b   :  { %5716 = vmatpush2.bf16.msra.mxu0 %v8516_v46  ;;  %v8606_v46 = vld [vmem:[%s11941_s1 + $0xbc8] ss:$16 sps:$4 sm:$0xff]  }
 0x20c   :  { %5743 = vmatpush1.bf16.msra.mxu1 %v8519_v47  ;;  %5717 = vmatprep.subr.bf16.mxu0 %v8524_v48  ;;  %v8609_v47 = vld [vmem:[%s11941_s1 + $0xcc8] ss:$16 sps:$4 sm:$0xff]   ;;  %v8614_v48 = vld [vmem:[%s11941_s1 + $0xbac] ss:$16 sps:$4 sm:$0xff]  }
 0x20d   :  { %5744 = vmatprep.subr.bf16.mxu1 %v8527_v49  ;;  %v8617_v49 = vld [vmem:[%s11941_s1 + $0xcac] ss:$16 sps:$4 sm:$0xff]  }
 0x20f   :  { %5718 = vmatpush2.bf16.msra.mxu0 %v8522_v50  ;;  %v8995_v50 = vld [vmem:[%s11942_s0 + $0x34] ss:$100 sps:$4 sm:$0xff]  }
 0x210   :  { %5745 = vmatpush1.bf16.msra.mxu1 %v8525_v51  ;;  %5719 = vmatprep.subr.bf16.mxu0 %v8530_v52  ;;  %v8612_v51 = vld [vmem:[%s11941_s1 + $0xba8] ss:$16 sps:$4 sm:$0xff]  }
 0x211   :  { %5746 = vmatprep.subr.bf16.mxu1 %v8533_v53  ;;  %v8615_v52 = vld [vmem:[%s11941_s1 + $0xca8] ss:$16 sps:$4 sm:$0xff]   ;;  %v8620_v53 = vld [vmem:[%s11941_s1 + $0xb8c] ss:$16 sps:$4 sm:$0xff]  }
 0x213   :  { %5720 = vmatpush2.bf16.msra.mxu0 %v8528_v54  ;;  %v8623_v54 = vld [vmem:[%s11941_s1 + $0xc8c] ss:$16 sps:$4 sm:$0xff]  }
 0x214   :  { %5747 = vmatpush1.bf16.msra.mxu1 %v8531_v55  ;;  %5721 = vmatprep.subr.bf16.mxu0 %v8536_v56  ;;  %v8618_v55 = vld [vmem:[%s11941_s1 + $0xb88] ss:$16 sps:$4 sm:$0xff]  }
 0x215   :  { %5748 = vmatprep.subr.bf16.mxu1 %v8539_v57  ;;  %v8621_v56 = vld [vmem:[%s11941_s1 + $0xc88] ss:$16 sps:$4 sm:$0xff]   ;;  %v8626_v57 = vld [vmem:[%s11941_s1 + $0xb6c] ss:$16 sps:$4 sm:$0xff]  }
 0x217   :  { %5722 = vmatpush2.bf16.msra.mxu0 %v8534_v58  ;;  %v8629_v58 = vld [vmem:[%s11941_s1 + $0xc6c] ss:$16 sps:$4 sm:$0xff]  }
 0x218   :  { %5749 = vmatpush1.bf16.msra.mxu1 %v8537_v59  ;;  %5723 = vmatprep.subr.bf16.mxu0 %v8542_v60  ;;  %v8624_v59 = vld [vmem:[%s11941_s1 + $0xb68] ss:$16 sps:$4 sm:$0xff]  }
 0x219   :  { %5750 = vmatprep.subr.bf16.mxu1 %v8545_v61  ;;  %v8627_v60 = vld [vmem:[%s11941_s1 + $0xc68] ss:$16 sps:$4 sm:$0xff]   ;;  %v8632_v61 = vld [vmem:[%s11941_s1 + $0xb4c] ss:$16 sps:$4 sm:$0xff]  }
 0x21b   :  { %5724 = vmatpush2.bf16.msra.mxu0 %v8540_v62  ;;  %v8635_v62 = vld [vmem:[%s11941_s1 + $0xc4c] ss:$16 sps:$4 sm:$0xff]  }
 0x21c   :  { %5751 = vmatpush1.bf16.msra.mxu1 %v8543_v63  ;;  %5725 = vmatprep.subr.bf16.mxu0 %v8548_v0  ;;  %v8630_v63 = vld [vmem:[%s11941_s1 + $0xb48] ss:$16 sps:$4 sm:$0xff]  }
 0x21d   :  { %5752 = vmatprep.subr.bf16.mxu1 %v8551_v1  ;;  %v8633_v0 = vld [vmem:[%s11941_s1 + $0xc48] ss:$16 sps:$4 sm:$0xff]   ;;  %v8638_v1 = vld [vmem:[%s11941_s1 + $0xb2c] ss:$16 sps:$4 sm:$0xff]  }
 0x21f   :  { %5726 = vmatpush2.bf16.msra.mxu0 %v8546_v2  ;;  %v8641_v2 = vld [vmem:[%s11941_s1 + $0xc2c] ss:$16 sps:$4 sm:$0xff]  }
 0x220   :  { %5753 = vmatpush1.bf16.msra.mxu1 %v8549_v3  ;;  %5781 = vmatprep.subr.bf16.mxu0 %v8557_v5  ;;  %v8636_v3 = vld [vmem:[%s11941_s1 + $0xb28] ss:$16 sps:$4 sm:$0xff]   ;;  %v8644_v5 = vld [vmem:[%s11941_s1 + $0xb0c] ss:$16 sps:$4 sm:$0xff]  }
 0x221   :  { %5754 = vmatprep.subr.bf16.mxu1 %v8554_v4  ;;  %v8639_v4 = vld [vmem:[%s11941_s1 + $0xc28] ss:$16 sps:$4 sm:$0xff]  }
 0x222   :  { %5728 = vmatmul.mubr.bf16.vlgmr.msra.gmra.mxu0 %v8992_v10  ;;  %v8653_v10 = vld [vmem:[%s11941_s1 + $0xeec] ss:$16 sps:$4 sm:$0xff]  }
 0x223   :  { %5782 = vmatpush1.bf16.msra.mxu0 %v8555_v7  ;;  %5813 = vmatprep.mubr.bf16.mxu0 %v8993_v15  ;;  %v8642_v7 = vld [vmem:[%s11941_s1 + $0xb08] ss:$16 sps:$4 sm:$0xff]  }
 0x224   :  { %5755 = vmatpush2.bf16.msra.mxu1 %v8552_v6  ;;  %5783 = vmatprep.subr.bf16.mxu0 %v8563_v9  ;;  %v8647_v6 = vld [vmem:[%s11941_s1 + $0xc0c] ss:$16 sps:$4 sm:$0xff]  }
 0x225   :  { %5756 = vmatprep.subr.bf16.mxu1 %v8560_v8  ;;  %v8645_v8 = vld [vmem:[%s11941_s1 + $0xc08] ss:$16 sps:$4 sm:$0xff]   ;;  %v8650_v9 = vld [vmem:[%s11941_s1 + $0xdec] ss:$16 sps:$4 sm:$0xff]  }
 0x226   :  { %v8996_v15 = vld [vmem:[%s11942_s0 + $0x28] ss:$100 sps:$4 sm:$0xff]  }
 0x227   :  { %5784 = vmatpush1.bf16.msra.mxu0 %v8561_v12  ;;  %v8651_v12 = vld [vmem:[%s11941_s1 + $0xee8] ss:$16 sps:$4 sm:$0xff]  }
 0x228   :  { %5757 = vmatpush2.bf16.msra.mxu1 %v8558_v11  ;;  %5785 = vmatprep.subr.bf16.mxu0 %v8569_v14  ;;  %v8648_v11 = vld [vmem:[%s11941_s1 + $0xde8] ss:$16 sps:$4 sm:$0xff]   ;;  %v8659_v14 = vld [vmem:[%s11941_s1 + $0xecc] ss:$16 sps:$4 sm:$0xff]  }
 0x229   :  { %5758 = vmatprep.subr.bf16.mxu1 %v8566_v13  ;;  %v8656_v13 = vld [vmem:[%s11941_s1 + $0xdcc] ss:$16 sps:$4 sm:$0xff]  }
 0x22b   :  { %5786 = vmatpush1.bf16.msra.mxu0 %v8567_v17  ;;  %v8657_v17 = vld [vmem:[%s11941_s1 + $0xec8] ss:$16 sps:$4 sm:$0xff]  }
 0x22c   :  { %5759 = vmatpush2.bf16.msra.mxu1 %v8564_v16  ;;  %5787 = vmatprep.subr.bf16.mxu0 %v8575_v19  ;;  %v8654_v16 = vld [vmem:[%s11941_s1 + $0xdc8] ss:$16 sps:$4 sm:$0xff]   ;;  %v8665_v19 = vld [vmem:[%s11941_s1 + $0xeac] ss:$16 sps:$4 sm:$0xff]  }
 0x22d   :  { %5760 = vmatprep.subr.bf16.mxu1 %v8572_v18  ;;  %v8662_v18 = vld [vmem:[%s11941_s1 + $0xdac] ss:$16 sps:$4 sm:$0xff]  }
 0x22f   :  { %5788 = vmatpush1.bf16.msra.mxu0 %v8573_v21  ;;  %v8660_v21 = vld [vmem:[%s11941_s1 + $0xda8] ss:$16 sps:$4 sm:$0xff]  }
 0x230   :  { %5761 = vmatpush2.bf16.msra.mxu1 %v8570_v20  ;;  %5789 = vmatprep.subr.bf16.mxu0 %v8581_v23  ;;  %v8997_v20 = vld [vmem:[%s11942_s0 + $0x3c] ss:$100 sps:$4 sm:$0xff]  }
 0x231   :  { %5762 = vmatprep.subr.bf16.mxu1 %v8578_v22  ;;  %v8663_v22 = vld [vmem:[%s11941_s1 + $0xea8] ss:$16 sps:$4 sm:$0xff]   ;;  %v8668_v23 = vld [vmem:[%s11941_s1 + $0xd8c] ss:$16 sps:$4 sm:$0xff]  }
 0x233   :  { %5790 = vmatpush1.bf16.msra.mxu0 %v8579_v25  ;;  %v8666_v25 = vld [vmem:[%s11941_s1 + $0xd88] ss:$16 sps:$4 sm:$0xff]  }
 0x234   :  { %5763 = vmatpush2.bf16.msra.mxu1 %v8576_v24  ;;  %5791 = vmatprep.subr.bf16.mxu0 %v8587_v27  ;;  %v8671_v24 = vld [vmem:[%s11941_s1 + $0xe8c] ss:$16 sps:$4 sm:$0xff]  }
 0x235   :  { %5764 = vmatprep.subr.bf16.mxu1 %v8584_v26  ;;  %v8669_v26 = vld [vmem:[%s11941_s1 + $0xe88] ss:$16 sps:$4 sm:$0xff]   ;;  %v8674_v27 = vld [vmem:[%s11941_s1 + $0xd6c] ss:$16 sps:$4 sm:$0xff]  }
 0x237   :  { %5792 = vmatpush1.bf16.msra.mxu0 %v8585_v29  ;;  %v8672_v29 = vld [vmem:[%s11941_s1 + $0xd68] ss:$16 sps:$4 sm:$0xff]  }
 0x238   :  { %5765 = vmatpush2.bf16.msra.mxu1 %v8582_v28  ;;  %5793 = vmatprep.subr.bf16.mxu0 %v8593_v31  ;;  %v8677_v28 = vld [vmem:[%s11941_s1 + $0xe6c] ss:$16 sps:$4 sm:$0xff]  }
 0x239   :  { %5766 = vmatprep.subr.bf16.mxu1 %v8590_v30  ;;  %v8675_v30 = vld [vmem:[%s11941_s1 + $0xe68] ss:$16 sps:$4 sm:$0xff]   ;;  %v8680_v31 = vld [vmem:[%s11941_s1 + $0xd4c] ss:$16 sps:$4 sm:$0xff]  }
 0x23b   :  { %5794 = vmatpush1.bf16.msra.mxu0 %v8591_v33  ;;  %v8678_v33 = vld [vmem:[%s11941_s1 + $0xd48] ss:$16 sps:$4 sm:$0xff]  }
 0x23c   :  { %5767 = vmatpush2.bf16.msra.mxu1 %v8588_v32  ;;  %5795 = vmatprep.subr.bf16.mxu0 %v8599_v35  ;;  %v8683_v32 = vld [vmem:[%s11941_s1 + $0xe4c] ss:$16 sps:$4 sm:$0xff]  }
 0x23d   :  { %5768 = vmatprep.subr.bf16.mxu1 %v8596_v34  ;;  %v8681_v34 = vld [vmem:[%s11941_s1 + $0xe48] ss:$16 sps:$4 sm:$0xff]   ;;  %v8686_v35 = vld [vmem:[%s11941_s1 + $0xd2c] ss:$16 sps:$4 sm:$0xff]  }
 0x23f   :  { %5796 = vmatpush1.bf16.msra.mxu0 %v8597_v38  ;;  %v8684_v38 = vld [vmem:[%s11941_s1 + $0xd28] ss:$16 sps:$4 sm:$0xff]  }
 0x240   :  { %5769 = vmatpush2.bf16.msra.mxu1 %v8594_v37  ;;  %5797 = vmatprep.subr.bf16.mxu0 %v8602_v39  ;;  %v8689_v37 = vld [vmem:[%s11941_s1 + $0xe2c] ss:$16 sps:$4 sm:$0xff]   ;;  %v8687_v39 = vld [vmem:[%s11941_s1 + $0xe28] ss:$16 sps:$4 sm:$0xff]  }
 0x241   :  { %5824 = vmatprep.subr.bf16.mxu1 %v8605_v40  ;;  %v8692_v40 = vld [vmem:[%s11941_s1 + $0xd0c] ss:$16 sps:$4 sm:$0xff]  }
 0x243   :  { %5771 = vmatmul.mubr.bf16.vlgmr.msra.gmra.mxu1 %v8994_v45  ;;  %5798 = vmatpush2.bf16.msra.mxu0 %v8600_v41  ;;  %v8695_v41 = vld [vmem:[%s11941_s1 + $0xe0c] ss:$16 sps:$4 sm:$0xff]  }
 0x244   :  { %5825 = vmatpush1.bf16.msra.mxu1 %v8603_v42  ;;  %5799 = vmatprep.subr.bf16.mxu0 %v8608_v43  ;;  %v8690_v42 = vld [vmem:[%s11941_s1 + $0xd08] ss:$16 sps:$4 sm:$0xff]   ;;  %v8701_v45 = vld [vmem:[%s11941_s1 + $0x10ec] ss:$16 sps:$4 sm:$0xff]  }
 0x245   :  { %5826 = vmatprep.subr.bf16.mxu1 %v8611_v44  ;;  %5856 = vmatprep.mubr.bf16.mxu1 %v8995_v50  ;;  %v8693_v43 = vld [vmem:[%s11941_s1 + $0xe08] ss:$16 sps:$4 sm:$0xff]   ;;  %v8698_v44 = vld [vmem:[%s11941_s1 + $0xfec] ss:$16 sps:$4 sm:$0xff]   ;;  %v8998_v50 = vld [vmem:[%s11942_s0 + $0x30] ss:$100 sps:$4 sm:$0xff]  }
 0x247   :  { %5800 = vmatpush2.bf16.msra.mxu0 %v8606_v46  ;;  %v8696_v46 = vld [vmem:[%s11941_s1 + $0xfe8] ss:$16 sps:$4 sm:$0xff]  }
 0x248   :  { %5827 = vmatpush1.bf16.msra.mxu1 %v8609_v47  ;;  %5801 = vmatprep.subr.bf16.mxu0 %v8614_v48  ;;  %v8699_v47 = vld [vmem:[%s11941_s1 + $0x10e8] ss:$16 sps:$4 sm:$0xff]   ;;  %v8704_v48 = vld [vmem:[%s11941_s1 + $0xfcc] ss:$16 sps:$4 sm:$0xff]  }
 0x249   :  { %5828 = vmatprep.subr.bf16.mxu1 %v8617_v49  ;;  %v8707_v49 = vld [vmem:[%s11941_s1 + $0x10cc] ss:$16 sps:$4 sm:$0xff]  }
 0x24b   :  { %5802 = vmatpush2.bf16.msra.mxu0 %v8612_v51  ;;  %v8702_v51 = vld [vmem:[%s11941_s1 + $0xfc8] ss:$16 sps:$4 sm:$0xff]  }
 0x24c   :  { %5829 = vmatpush1.bf16.msra.mxu1 %v8615_v52  ;;  %5803 = vmatprep.subr.bf16.mxu0 %v8620_v53  ;;  %v8705_v52 = vld [vmem:[%s11941_s1 + $0x10c8] ss:$16 sps:$4 sm:$0xff]   ;;  %v8710_v53 = vld [vmem:[%s11941_s1 + $0xfac] ss:$16 sps:$4 sm:$0xff]  }
 0x24d   :  { %5830 = vmatprep.subr.bf16.mxu1 %v8623_v54  ;;  %v8713_v54 = vld [vmem:[%s11941_s1 + $0x10ac] ss:$16 sps:$4 sm:$0xff]  }
 0x24f   :  { %5804 = vmatpush2.bf16.msra.mxu0 %v8618_v55  ;;  %v8999_v55 = vld [vmem:[%s11942_s0 + $0x44] ss:$100 sps:$4 sm:$0xff]  }
 0x250   :  { %5831 = vmatpush1.bf16.msra.mxu1 %v8621_v56  ;;  %5805 = vmatprep.subr.bf16.mxu0 %v8626_v57  ;;  %v8708_v56 = vld [vmem:[%s11941_s1 + $0xfa8] ss:$16 sps:$4 sm:$0xff]  }
 0x251   :  { %5832 = vmatprep.subr.bf16.mxu1 %v8629_v58  ;;  %v8711_v57 = vld [vmem:[%s11941_s1 + $0x10a8] ss:$16 sps:$4 sm:$0xff]   ;;  %v8716_v58 = vld [vmem:[%s11941_s1 + $0xf8c] ss:$16 sps:$4 sm:$0xff]  }
 0x253   :  { %5806 = vmatpush2.bf16.msra.mxu0 %v8624_v59  ;;  %v8719_v59 = vld [vmem:[%s11941_s1 + $0x108c] ss:$16 sps:$4 sm:$0xff]  }
 0x254   :  { %5833 = vmatpush1.bf16.msra.mxu1 %v8627_v60  ;;  %5807 = vmatprep.subr.bf16.mxu0 %v8632_v61  ;;  %v8714_v60 = vld [vmem:[%s11941_s1 + $0xf88] ss:$16 sps:$4 sm:$0xff]  }
 0x255   :  { %5834 = vmatprep.subr.bf16.mxu1 %v8635_v62  ;;  %v8717_v61 = vld [vmem:[%s11941_s1 + $0x1088] ss:$16 sps:$4 sm:$0xff]   ;;  %v8722_v62 = vld [vmem:[%s11941_s1 + $0xf6c] ss:$16 sps:$4 sm:$0xff]  }
 0x257   :  { %5808 = vmatpush2.bf16.msra.mxu0 %v8630_v63  ;;  %v8725_v63 = vld [vmem:[%s11941_s1 + $0x106c] ss:$16 sps:$4 sm:$0xff]  }
 0x258   :  { %5835 = vmatpush1.bf16.msra.mxu1 %v8633_v0  ;;  %5809 = vmatprep.subr.bf16.mxu0 %v8638_v1  ;;  %v8720_v0 = vld [vmem:[%s11941_s1 + $0xf68] ss:$16 sps:$4 sm:$0xff]  }
 0x259   :  { %5836 = vmatprep.subr.bf16.mxu1 %v8641_v2  ;;  %v8723_v1 = vld [vmem:[%s11941_s1 + $0x1068] ss:$16 sps:$4 sm:$0xff]   ;;  %v8728_v2 = vld [vmem:[%s11941_s1 + $0xf4c] ss:$16 sps:$4 sm:$0xff]  }
 0x25b   :  { %5810 = vmatpush2.bf16.msra.mxu0 %v8636_v3  ;;  %v8731_v3 = vld [vmem:[%s11941_s1 + $0x104c] ss:$16 sps:$4 sm:$0xff]  }
 0x25c   :  { %5837 = vmatpush1.bf16.msra.mxu1 %v8639_v4  ;;  %5811 = vmatprep.subr.bf16.mxu0 %v8644_v5  ;;  %v8726_v4 = vld [vmem:[%s11941_s1 + $0xf48] ss:$16 sps:$4 sm:$0xff]  }
 0x25d   :  { %5838 = vmatprep.subr.bf16.mxu1 %v8647_v6  ;;  %v8729_v5 = vld [vmem:[%s11941_s1 + $0x1048] ss:$16 sps:$4 sm:$0xff]   ;;  %v8734_v6 = vld [vmem:[%s11941_s1 + $0xf2c] ss:$16 sps:$4 sm:$0xff]  }
 0x25f   :  { %5812 = vmatpush2.bf16.msra.mxu0 %v8642_v7  ;;  %v8737_v7 = vld [vmem:[%s11941_s1 + $0x102c] ss:$16 sps:$4 sm:$0xff]  }
 0x260   :  { %5839 = vmatpush1.bf16.msra.mxu1 %v8645_v8  ;;  %5867 = vmatprep.subr.bf16.mxu0 %v8653_v10  ;;  %v8732_v8 = vld [vmem:[%s11941_s1 + $0xf28] ss:$16 sps:$4 sm:$0xff]   ;;  %v8740_v10 = vld [vmem:[%s11941_s1 + $0xf0c] ss:$16 sps:$4 sm:$0xff]  }
 0x261   :  { %5840 = vmatprep.subr.bf16.mxu1 %v8650_v9  ;;  %v8735_v9 = vld [vmem:[%s11941_s1 + $0x1028] ss:$16 sps:$4 sm:$0xff]  }
 0x262   :  { %5814 = vmatmul.mubr.bf16.vlgmr.msra.gmra.mxu0 %v8996_v15  ;;  %v8749_v15 = vld [vmem:[%s11941_s1 + $0x12ec] ss:$16 sps:$4 sm:$0xff]  }
 0x263   :  { %5868 = vmatpush1.bf16.msra.mxu0 %v8651_v12  ;;  %5899 = vmatprep.mubr.bf16.mxu0 %v8997_v20  ;;  %v8738_v12 = vld [vmem:[%s11941_s1 + $0xf08] ss:$16 sps:$4 sm:$0xff]  }
 0x264   :  { %5841 = vmatpush2.bf16.msra.mxu1 %v8648_v11  ;;  %5869 = vmatprep.subr.bf16.mxu0 %v8659_v14  ;;  %v8743_v11 = vld [vmem:[%s11941_s1 + $0x100c] ss:$16 sps:$4 sm:$0xff]   ;;  %v8750_v20 = vld [vmem:[%s11941_s1 + $0x11c8] ss:$16 sps:$4 sm:$0xff]  }
 0x265   :  { %5842 = vmatprep.subr.bf16.mxu1 %v8656_v13  ;;  %v8741_v13 = vld [vmem:[%s11941_s1 + $0x1008] ss:$16 sps:$4 sm:$0xff]   ;;  %v8746_v14 = vld [vmem:[%s11941_s1 + $0x11ec] ss:$16 sps:$4 sm:$0xff]  }
 0x267   :  { %5870 = vmatpush1.bf16.msra.mxu0 %v8657_v17  ;;  %v8747_v17 = vld [vmem:[%s11941_s1 + $0x12e8] ss:$16 sps:$4 sm:$0xff]  }
 0x268   :  { %5843 = vmatpush2.bf16.msra.mxu1 %v8654_v16  ;;  %5871 = vmatprep.subr.bf16.mxu0 %v8665_v19  ;;  %v8744_v16 = vld [vmem:[%s11941_s1 + $0x11e8] ss:$16 sps:$4 sm:$0xff]   ;;  %v8755_v19 = vld [vmem:[%s11941_s1 + $0x12cc] ss:$16 sps:$4 sm:$0xff]  }
 0x269   :  { %5844 = vmatprep.subr.bf16.mxu1 %v8662_v18  ;;  %v8752_v18 = vld [vmem:[%s11941_s1 + $0x11cc] ss:$16 sps:$4 sm:$0xff]  }
 0x26b   :  { %5872 = vmatpush1.bf16.msra.mxu0 %v8663_v22  ;;  %v9000_v22 = vld [vmem:[%s11942_s0 + $0x38] ss:$100 sps:$4 sm:$0xff]  }
 0x26c   :  { %5845 = vmatpush2.bf16.msra.mxu1 %v8660_v21  ;;  %5873 = vmatprep.subr.bf16.mxu0 %v8671_v24  ;;  %v8753_v21 = vld [vmem:[%s11941_s1 + $0x12c8] ss:$16 sps:$4 sm:$0xff]   ;;  %v8761_v24 = vld [vmem:[%s11941_s1 + $0x12ac] ss:$16 sps:$4 sm:$0xff]  }
 0x26d   :  { %5846 = vmatprep.subr.bf16.mxu1 %v8668_v23  ;;  %v8758_v23 = vld [vmem:[%s11941_s1 + $0x11ac] ss:$16 sps:$4 sm:$0xff]  }
 0x26f   :  { %5874 = vmatpush1.bf16.msra.mxu0 %v8669_v26  ;;  %v8759_v26 = vld [vmem:[%s11941_s1 + $0x12a8] ss:$16 sps:$4 sm:$0xff]  }
 0x270   :  { %5847 = vmatpush2.bf16.msra.mxu1 %v8666_v25  ;;  %5875 = vmatprep.subr.bf16.mxu0 %v8677_v28  ;;  %v8756_v25 = vld [vmem:[%s11941_s1 + $0x11a8] ss:$16 sps:$4 sm:$0xff]   ;;  %v8764_v28 = vld [vmem:[%s11941_s1 + $0x118c] ss:$16 sps:$4 sm:$0xff]  }
 0x271   :  { %5848 = vmatprep.subr.bf16.mxu1 %v8674_v27  ;;  %v9001_v27 = vld [vmem:[%s11942_s0 + $0x4c] ss:$100 sps:$4 sm:$0xff]  }
 0x273   :  { %5876 = vmatpush1.bf16.msra.mxu0 %v8675_v30  ;;  %v8762_v30 = vld [vmem:[%s11941_s1 + $0x1188] ss:$16 sps:$4 sm:$0xff]  }
 0x274   :  { %5849 = vmatpush2.bf16.msra.mxu1 %v8672_v29  ;;  %5877 = vmatprep.subr.bf16.mxu0 %v8683_v32  ;;  %v8767_v29 = vld [vmem:[%s11941_s1 + $0x128c] ss:$16 sps:$4 sm:$0xff]  }
 0x275   :  { %5850 = vmatprep.subr.bf16.mxu1 %v8680_v31  ;;  %v8765_v31 = vld [vmem:[%s11941_s1 + $0x1288] ss:$16 sps:$4 sm:$0xff]   ;;  %v8770_v32 = vld [vmem:[%s11941_s1 + $0x116c] ss:$16 sps:$4 sm:$0xff]  }
 0x277   :  { %5878 = vmatpush1.bf16.msra.mxu0 %v8681_v34  ;;  %v8768_v34 = vld [vmem:[%s11941_s1 + $0x1168] ss:$16 sps:$4 sm:$0xff]  }
 0x278   :  { %5851 = vmatpush2.bf16.msra.mxu1 %v8678_v33  ;;  %5879 = vmatprep.subr.bf16.mxu0 %v8689_v37  ;;  %v8773_v33 = vld [vmem:[%s11941_s1 + $0x126c] ss:$16 sps:$4 sm:$0xff]  }
 0x279   :  { %5852 = vmatprep.subr.bf16.mxu1 %v8686_v35  ;;  %v8771_v35 = vld [vmem:[%s11941_s1 + $0x1268] ss:$16 sps:$4 sm:$0xff]   ;;  %v8776_v37 = vld [vmem:[%s11941_s1 + $0x114c] ss:$16 sps:$4 sm:$0xff]  }
 0x27b   :  { %5880 = vmatpush1.bf16.msra.mxu0 %v8687_v39  ;;  %v8774_v39 = vld [vmem:[%s11941_s1 + $0x1148] ss:$16 sps:$4 sm:$0xff]  }
 0x27c   :  { %5853 = vmatpush2.bf16.msra.mxu1 %v8684_v38  ;;  %5881 = vmatprep.subr.bf16.mxu0 %v8695_v41  ;;  %v8779_v38 = vld [vmem:[%s11941_s1 + $0x124c] ss:$16 sps:$4 sm:$0xff]  }
 0x27d   :  { %5854 = vmatprep.subr.bf16.mxu1 %v8692_v40  ;;  %v8777_v40 = vld [vmem:[%s11941_s1 + $0x1248] ss:$16 sps:$4 sm:$0xff]   ;;  %v8782_v41 = vld [vmem:[%s11941_s1 + $0x112c] ss:$16 sps:$4 sm:$0xff]  }
 0x27f   :  { %5882 = vmatpush1.bf16.msra.mxu0 %v8693_v43  ;;  %v8780_v43 = vld [vmem:[%s11941_s1 + $0x1128] ss:$16 sps:$4 sm:$0xff]  }
 0x280   :  { %5855 = vmatpush2.bf16.msra.mxu1 %v8690_v42  ;;  %5883 = vmatprep.subr.bf16.mxu0 %v8698_v44  ;;  %v8785_v42 = vld [vmem:[%s11941_s1 + $0x122c] ss:$16 sps:$4 sm:$0xff]   ;;  %v8783_v44 = vld [vmem:[%s11941_s1 + $0x1228] ss:$16 sps:$4 sm:$0xff]  }
 0x281   :  { %5910 = vmatprep.subr.bf16.mxu1 %v8701_v45  ;;  %v11292_v45 = vpop.f32.mrf.mxu0 }
 0x283   :  { %5857 = vmatmul.mubr.bf16.vlgmr.msra.gmra.mxu1 %v8998_v50  ;;  %5884 = vmatpush2.bf16.msra.mxu0 %v8696_v46  ;;  %v8788_v46 = vld [vmem:[%s11941_s1 + $0x110c] ss:$16 sps:$4 sm:$0xff]   ;;  %v8789_v50 = vld [vmem:[%s11941_s1 + $0x1208] ss:$16 sps:$4 sm:$0xff]  }
 0x284   :  { %5911 = vmatpush1.bf16.msra.mxu1 %v8699_v47  ;;  %5885 = vmatprep.subr.bf16.mxu0 %v8704_v48  ;;  %v8791_v47 = vld [vmem:[%s11941_s1 + $0x120c] ss:$16 sps:$4 sm:$0xff]   ;;  %v11300_v48 = vpop.f32.mrf.mxu0 }
 0x285   :  { %5912 = vmatprep.subr.bf16.mxu1 %v8707_v49  ;;  %5942 = vmatprep.mubr.bf16.mxu1 %v8999_v55  ;;  %v8786_v49 = vld [vmem:[%s11941_s1 + $0x1108] ss:$16 sps:$4 sm:$0xff]  }
 0x286   :  { %v8795_v55 = vld [vmem:[%s11941_s1 + $0x14e8] ss:$16 sps:$4 sm:$0xff]  }
 0x287   :  { %5886 = vmatpush2.bf16.msra.mxu0 %v8702_v51  ;;  %v8794_v51 = vld [vmem:[%s11941_s1 + $0x13ec] ss:$16 sps:$4 sm:$0xff]  }
 0x288   :  { %5913 = vmatpush1.bf16.msra.mxu1 %v8705_v52  ;;  %5887 = vmatprep.subr.bf16.mxu0 %v8710_v53  ;;  %v8797_v52 = vld [vmem:[%s11941_s1 + $0x14ec] ss:$16 sps:$4 sm:$0xff]   ;;  %v11314_v53 = vpop.f32.mrf.mxu0 }
 0x289   :  { %5914 = vmatprep.subr.bf16.mxu1 %v8713_v54  ;;  %v8792_v54 = vld [vmem:[%s11941_s1 + $0x13e8] ss:$16 sps:$4 sm:$0xff]  }
 0x28b   :  { %5888 = vmatpush2.bf16.msra.mxu0 %v8708_v56  ;;  %v8800_v56 = vld [vmem:[%s11941_s1 + $0x13cc] ss:$16 sps:$4 sm:$0xff]  }
 0x28c   :  { %5915 = vmatpush1.bf16.msra.mxu1 %v8711_v57  ;;  %5889 = vmatprep.subr.bf16.mxu0 %v8716_v58  ;;  %v8803_v57 = vld [vmem:[%s11941_s1 + $0x14cc] ss:$16 sps:$4 sm:$0xff]   ;;  %v11328_v58 = vpop.f32.mrf.mxu0 }
 0x28d   :  { %5916 = vmatprep.subr.bf16.mxu1 %v8719_v59  ;;  %v9002_v59 = vld [vmem:[%s11942_s0 + $0x40] ss:$100 sps:$4 sm:$0xff]  }
 0x28f   :  { %5890 = vmatpush2.bf16.msra.mxu0 %v8714_v60  ;;  %v8798_v60 = vld [vmem:[%s11941_s1 + $0x13c8] ss:$16 sps:$4 sm:$0xff]  }
 0x290   :  { %5917 = vmatpush1.bf16.msra.mxu1 %v8717_v61  ;;  %5891 = vmatprep.subr.bf16.mxu0 %v8722_v62  ;;  %v8801_v61 = vld [vmem:[%s11941_s1 + $0x14c8] ss:$16 sps:$4 sm:$0xff]   ;;  %v11339_v62 = vpop.f32.mrf.mxu1 }
 0x291   :  { %5918 = vmatprep.subr.bf16.mxu1 %v8725_v63  ;;  %v11341_v63 = vpop.f32.mrf.mxu0 }
 0x293   :  { %5892 = vmatpush2.bf16.msra.mxu0 %v8720_v0  ;;  %v8806_v0 = vld [vmem:[%s11941_s1 + $0x13ac] ss:$16 sps:$4 sm:$0xff]  }
 0x294   :  { %5919 = vmatpush1.bf16.msra.mxu1 %v8723_v1  ;;  %5893 = vmatprep.subr.bf16.mxu0 %v8728_v2  ;;  %v8809_v1 = vld [vmem:[%s11941_s1 + $0x14ac] ss:$16 sps:$4 sm:$0xff]   ;;  %v9003_v2 = vld [vmem:[%s11942_s0 + $0x54] ss:$100 sps:$4 sm:$0xff]  }
 0x295   :  { %5920 = vmatprep.subr.bf16.mxu1 %v8731_v3  ;;  %v8804_v3 = vld [vmem:[%s11941_s1 + $0x13a8] ss:$16 sps:$4 sm:$0xff]  }
 0x297   :  { %5894 = vmatpush2.bf16.msra.mxu0 %v8726_v4  ;;  %v8807_v4 = vld [vmem:[%s11941_s1 + $0x14a8] ss:$16 sps:$4 sm:$0xff]  }
 0x298   :  { %5921 = vmatpush1.bf16.msra.mxu1 %v8729_v5  ;;  %5895 = vmatprep.subr.bf16.mxu0 %v8734_v6  ;;  %v11358_v5 = vpop.f32.mrf.mxu1  ;;  %v11360_v6 = vpop.f32.mrf.mxu0 }
 0x299   :  { %5922 = vmatprep.subr.bf16.mxu1 %v8737_v7  ;;  %v8812_v7 = vld [vmem:[%s11941_s1 + $0x138c] ss:$16 sps:$4 sm:$0xff]  }
 0x29b   :  { %5896 = vmatpush2.bf16.msra.mxu0 %v8732_v8  ;;  %v8815_v8 = vld [vmem:[%s11941_s1 + $0x148c] ss:$16 sps:$4 sm:$0xff]  }
 0x29c   :  { %5923 = vmatpush1.bf16.msra.mxu1 %v8735_v9  ;;  %5897 = vmatprep.subr.bf16.mxu0 %v8740_v10  ;;  %v8810_v9 = vld [vmem:[%s11941_s1 + $0x1388] ss:$16 sps:$4 sm:$0xff]  }
 0x29d   :  { %5924 = vmatprep.subr.bf16.mxu1 %v8743_v11  ;;  %v8813_v10 = vld [vmem:[%s11941_s1 + $0x1488] ss:$16 sps:$4 sm:$0xff]   ;;  %v11374_v11 = vpop.f32.mrf.mxu1 }
 0x29f   :  { %5898 = vmatpush2.bf16.msra.mxu0 %v8738_v12  ;;  %v11376_v12 = vpop.f32.mrf.mxu0 }
 0x2a0   :  { %5925 = vmatpush1.bf16.msra.mxu1 %v8741_v13  ;;  %5953 = vmatprep.subr.bf16.mxu0 %v8749_v15  ;;  %v8818_v13 = vld [vmem:[%s11941_s1 + $0x136c] ss:$16 sps:$4 sm:$0xff]   ;;  %v8816_v15 = vld [vmem:[%s11941_s1 + $0x1368] ss:$16 sps:$4 sm:$0xff]  }
 0x2a1   :  { %5926 = vmatprep.subr.bf16.mxu1 %v8746_v14  ;;  %v8821_v14 = vld [vmem:[%s11941_s1 + $0x146c] ss:$16 sps:$4 sm:$0xff]  }
 0x2a2   :  { %5900 = vmatmul.mubr.bf16.vlgmr.msra.gmra.mxu0 %v9000_v22 }
 0x2a3   :  { %5954 = vmatpush1.bf16.msra.mxu0 %v8747_v17  ;;  %5985 = vmatprep.mubr.bf16.mxu0 %v9001_v27  ;;  %v11390_v17 = vpop.f32.mrf.mxu1 }
 0x2a4   :  { %5927 = vmatpush2.bf16.msra.mxu1 %v8744_v16  ;;  %5955 = vmatprep.subr.bf16.mxu0 %v8755_v19  ;;  %v8819_v16 = vld [vmem:[%s11941_s1 + $0x1468] ss:$16 sps:$4 sm:$0xff]   ;;  %v8824_v19 = vld [vmem:[%s11941_s1 + $0x134c] ss:$16 sps:$4 sm:$0xff]  }
 0x2a5   :  { %5928 = vmatprep.subr.bf16.mxu1 %v8752_v18  ;;  %v11392_v18 = vpop.f32.mrf.mxu0 }
 0x2a7   :  { %5956 = vmatpush1.bf16.msra.mxu0 %v8753_v21  ;;  %v11400_v21 = vpop.f32.mrf.mxu1  ;;  %v11402_v22 = vpop.f32.mrf.mxu0 }
 0x2a8   :  { %5929 = vmatpush2.bf16.msra.mxu1 %v8750_v20  ;;  %5957 = vmatprep.subr.bf16.mxu0 %v8761_v24  ;;  %v8827_v20 = vld [vmem:[%s11941_s1 + $0x144c] ss:$16 sps:$4 sm:$0xff]   ;;  %v8825_v24 = vld [vmem:[%s11941_s1 + $0x1448] ss:$16 sps:$4 sm:$0xff]  }
 0x2a9   :  { %5930 = vmatprep.subr.bf16.mxu1 %v8758_v23  ;;  %v8822_v23 = vld [vmem:[%s11941_s1 + $0x1348] ss:$16 sps:$4 sm:$0xff]   ;;  %v11416_v27 = vpop.f32.mrf.mxu1 }
 0x2ab   :  { %5958 = vmatpush1.bf16.msra.mxu0 %v8759_v26  ;;  %v8833_v26 = vld [vmem:[%s11941_s1 + $0x142c] ss:$16 sps:$4 sm:$0xff]  }
 0x2ac   :  { %5931 = vmatpush2.bf16.msra.mxu1 %v8756_v25  ;;  %5959 = vmatprep.subr.bf16.mxu0 %v8767_v29  ;;  %v8830_v25 = vld [vmem:[%s11941_s1 + $0x132c] ss:$16 sps:$4 sm:$0xff]   ;;  %v8828_v29 = vld [vmem:[%s11941_s1 + $0x1328] ss:$16 sps:$4 sm:$0xff]  }
 0x2ad   :  { %5932 = vmatprep.subr.bf16.mxu1 %v8764_v28  ;;  %v11418_v28 = vpop.f32.mrf.mxu0 }
 0x2af   :  { %5960 = vmatpush1.bf16.msra.mxu0 %v8765_v31  ;;  %v8836_v31 = vld [vmem:[%s11941_s1 + $0x130c] ss:$16 sps:$4 sm:$0xff]  }
 0x2b0   :  { %5933 = vmatpush2.bf16.msra.mxu1 %v8762_v30  ;;  %5961 = vmatprep.subr.bf16.mxu0 %v8773_v33  ;;  %v8831_v30 = vld [vmem:[%s11941_s1 + $0x1428] ss:$16 sps:$4 sm:$0xff]   ;;  %v11432_v33 = vpop.f32.mrf.mxu1 }
 0x2b1   :  { %5934 = vmatprep.subr.bf16.mxu1 %v8770_v32  ;;  %v8839_v32 = vld [vmem:[%s11941_s1 + $0x140c] ss:$16 sps:$4 sm:$0xff]  }
 0x2b3   :  { %5962 = vmatpush1.bf16.msra.mxu0 %v8771_v35  ;;  %v8834_v35 = vld [vmem:[%s11941_s1 + $0x1308] ss:$16 sps:$4 sm:$0xff]  }
 0x2b4   :  { %5935 = vmatpush2.bf16.msra.mxu1 %v8768_v34  ;;  %5963 = vmatprep.subr.bf16.mxu0 %v8779_v38  ;;  %v11434_v34 = vpop.f32.mrf.mxu0  ;;  %v8842_v38 = vld [vmem:[%s11941_s1 + $0x15ec] ss:$16 sps:$4 sm:$0xff]  }
 0x2b5   :  { %5936 = vmatprep.subr.bf16.mxu1 %v8776_v37  ;;  %v8837_v37 = vld [vmem:[%s11941_s1 + $0x1408] ss:$16 sps:$4 sm:$0xff]  }
 0x2b7   :  { %5964 = vmatpush1.bf16.msra.mxu0 %v8777_v40  ;;  %v11448_v40 = vpop.f32.mrf.mxu1 }
 0x2b8   :  { %5937 = vmatpush2.bf16.msra.mxu1 %v8774_v39  ;;  %5965 = vmatprep.subr.bf16.mxu0 %v8785_v42  ;;  %v8845_v39 = vld [vmem:[%s11941_s1 + $0x16ec] ss:$16 sps:$4 sm:$0xff]   ;;  %v8840_v42 = vld [vmem:[%s11941_s1 + $0x15e8] ss:$16 sps:$4 sm:$0xff]  }
 0x2b9   :  { %5938 = vmatprep.subr.bf16.mxu1 %v8782_v41  ;;  %v11450_v41 = vpop.f32.mrf.mxu0 }
 0x2bb   :  { %5966 = vmatpush1.bf16.msra.mxu0 %v8783_v44  ;;  %v11458_v44 = vpop.f32.mrf.mxu1 }
 0x2bc   :  { %5939 = vmatpush2.bf16.msra.mxu1 %v8780_v43  ;;  %5967 = vmatprep.subr.bf16.mxu0 %v8791_v47  ;;  %v8843_v43 = vld [vmem:[%s11941_s1 + $0x16e8] ss:$16 sps:$4 sm:$0xff]   ;;  %v8848_v47 = vld [vmem:[%s11941_s1 + $0x15cc] ss:$16 sps:$4 sm:$0xff]  }
 0x2bd   :  { %5940 = vmatprep.subr.bf16.mxu1 %v8788_v46  ;;  %v11460_v46 = vpop.f32.mrf.mxu0 }
 0x2bf   :  { %5968 = vmatpush1.bf16.msra.mxu0 %v8789_v50  ;;  %v9004_v50 = vld [vmem:[%s11942_s0 + $0x48] ss:$100 sps:$4 sm:$0xff]  }
 0x2c0   :  { %5941 = vmatpush2.bf16.msra.mxu1 %v8786_v49  ;;  %5969 = vmatprep.subr.bf16.mxu0 %v8794_v51  ;;  %v8851_v49 = vld [vmem:[%s11941_s1 + $0x16cc] ss:$16 sps:$4 sm:$0xff]   ;;  %v8846_v51 = vld [vmem:[%s11941_s1 + $0x15c8] ss:$16 sps:$4 sm:$0xff]  }
 0x2c1   :  { %5996 = vmatprep.subr.bf16.mxu1 %v8797_v52  ;;  %v8849_v52 = vld [vmem:[%s11941_s1 + $0x16c8] ss:$16 sps:$4 sm:$0xff]  }
 0x2c3   :  { %5943 = vmatmul.mubr.bf16.vlgmr.msra.gmra.mxu1 %v9002_v59  ;;  %5970 = vmatpush2.bf16.msra.mxu0 %v8792_v54  ;;  %v11477_v54 = vpop.f32.mrf.mxu1  ;;  %v9005_v59 = vld [vmem:[%s11942_s0 + $0x5c] ss:$100 sps:$4 sm:$0xff]  }
 0x2c4   :  { %5997 = vmatpush1.bf16.msra.mxu1 %v8795_v55  ;;  %5971 = vmatprep.subr.bf16.mxu0 %v8800_v56  ;;  %v11479_v55 = vpop.f32.mrf.mxu0  ;;  %v8854_v56 = vld [vmem:[%s11941_s1 + $0x15ac] ss:$16 sps:$4 sm:$0xff]  }
 0x2c5   :  { %5998 = vmatprep.subr.bf16.mxu1 %v8803_v57  ;;  %6028 = vmatprep.mubr.bf16.mxu1 %v9003_v2  ;;  %v8857_v57 = vld [vmem:[%s11941_s1 + $0x16ac] ss:$16 sps:$4 sm:$0xff]  }
 0x2c6   :  { %v11498_v2 = vpop.f32.mrf.mxu0 }
 0x2c7   :  { %5972 = vmatpush2.bf16.msra.mxu0 %v8798_v60  ;;  %v861_v60 = vlaneseq }
 0x2c8   :  { %5999 = vmatpush1.bf16.msra.mxu1 %v8801_v61  ;;  %5973 = vmatprep.subr.bf16.mxu0 %v8806_v0  ;;  %v8852_v61 = vld [vmem:[%s11941_s1 + $0x15a8] ss:$16 sps:$4 sm:$0xff]  }
 0x2c9   :  { %6000 = vmatprep.subr.bf16.mxu1 %v8809_v1  ;;  %v8855_v0 = vld [vmem:[%s11941_s1 + $0x16a8] ss:$16 sps:$4 sm:$0xff]   ;;  %v11496_v1 = vpop.f32.mrf.mxu1 }
 0x2cb   :  { %5974 = vmatpush2.bf16.msra.mxu0 %v8804_v3  ;;  %v8860_v3 = vld [vmem:[%s11941_s1 + $0x158c] ss:$16 sps:$4 sm:$0xff]  }
 0x2cc   :  { %6001 = vmatpush1.bf16.msra.mxu1 %v8807_v4  ;;  %5975 = vmatprep.subr.bf16.mxu0 %v8812_v7  ;;  %v8863_v4 = vld [vmem:[%s11941_s1 + $0x168c] ss:$16 sps:$4 sm:$0xff]   ;;  %v11506_v7 = vshrl.u32 %v861_v60, 7 }
 0x2cd   :  { %6002 = vmatprep.subr.bf16.mxu1 %v8815_v8  ;;  %v8858_v8 = vld [vmem:[%s11941_s1 + $0x1588] ss:$16 sps:$4 sm:$0xff]  }
 0x2cf   :  { %5976 = vmatpush2.bf16.msra.mxu0 %v8810_v9  ;;  %v8861_v9 = vld [vmem:[%s11941_s1 + $0x1688] ss:$16 sps:$4 sm:$0xff]  }
 0x2d0   :  { %6003 = vmatpush1.bf16.msra.mxu1 %v8813_v10  ;;  %5977 = vmatprep.subr.bf16.mxu0 %v8818_v13  ;;  %v11514_v10 = vpop.f32.mrf.mxu1  ;;  %v11516_v13 = vpop.f32.mrf.mxu0 }
 0x2d1   :  { %6004 = vmatprep.subr.bf16.mxu1 %v8821_v14  ;;  %v8866_v14 = vld [vmem:[%s11941_s1 + $0x156c] ss:$16 sps:$4 sm:$0xff]  }
 0x2d3   :  { %5978 = vmatpush2.bf16.msra.mxu0 %v8816_v15  ;;  %v8869_v15 = vld [vmem:[%s11941_s1 + $0x166c] ss:$16 sps:$4 sm:$0xff]  }
 0x2d4   :  { %6005 = vmatpush1.bf16.msra.mxu1 %v8819_v16  ;;  %5979 = vmatprep.subr.bf16.mxu0 %v8824_v19  ;;  %v11524_v16 = vpop.f32.mrf.mxu1  ;;  %v11526_v19 = vpop.f32.mrf.mxu0 }
 0x2d5   :  { %6006 = vmatprep.subr.bf16.mxu1 %v8827_v20  ;;  %v867_v20 = vsub.s32 1, %v11506_v7 }
 0x2d7   :  { %5980 = vmatpush2.bf16.msra.mxu0 %v8822_v23  ;;  %v8864_v23 = vld [vmem:[%s11941_s1 + $0x1568] ss:$16 sps:$4 sm:$0xff]  }
 0x2d8   :  { %6007 = vmatpush1.bf16.msra.mxu1 %v8825_v24  ;;  %5981 = vmatprep.subr.bf16.mxu0 %v8830_v25  ;;  %v8867_v24 = vld [vmem:[%s11941_s1 + $0x1668] ss:$16 sps:$4 sm:$0xff]   ;;  %v11538_v25 = vld [vmem:[%s11944_s2] sm:$0xf] }
 0x2d9   :  { %6008 = vmatprep.subr.bf16.mxu1 %v8833_v26  ;;  %v8872_v26 = vld [vmem:[%s11941_s1 + $0x154c] ss:$16 sps:$4 sm:$0xff]  }
 0x2db   :  { %5982 = vmatpush2.bf16.msra.mxu0 %v8828_v29  ;;  %v8875_v29 = vld [vmem:[%s11941_s1 + $0x164c] ss:$16 sps:$4 sm:$0xff]  }
 0x2dc   :  { %6009 = vmatpush1.bf16.msra.mxu1 %v8831_v30  ;;  %5983 = vmatprep.subr.bf16.mxu0 %v8836_v31  ;;  %v11546_v30 = vpop.f32.mrf.mxu1  ;;  %v11548_v31 = vpop.f32.mrf.mxu0 }
 0x2dd   :  { %6010 = vmatprep.subr.bf16.mxu1 %v8839_v32  ;;  %v868_v32 = vrot.slane %v11538_v25, %v867_v20 }
 0x2df   :  { %5984 = vmatpush2.bf16.msra.mxu0 %v8834_v35  ;;  %v8870_v35 = vld [vmem:[%s11941_s1 + $0x1548] ss:$16 sps:$4 sm:$0xff]  }
 0x2e0   :  { %6011 = vmatpush1.bf16.msra.mxu1 %v8837_v37  ;;  %6039 = vmatprep.subr.bf16.mxu0 %v8845_v39  ;;  %v8873_v37 = vld [vmem:[%s11941_s1 + $0x1648] ss:$16 sps:$4 sm:$0xff]   ;;  %v8881_v39 = vld [vmem:[%s11941_s1 + $0x162c] ss:$16 sps:$4 sm:$0xff]  }
 0x2e1   :  { %6012 = vmatprep.subr.bf16.mxu1 %v8842_v38  ;;  %v8878_v38 = vld [vmem:[%s11941_s1 + $0x152c] ss:$16 sps:$4 sm:$0xff]  }
 0x2e2   :  { %5986 = vmatmul.mubr.bf16.vlgmr.msra.gmra.mxu0 %v9004_v50  ;;  %v8876_v50 = vld [vmem:[%s11941_s1 + $0x1528] ss:$16 sps:$4 sm:$0xff]  }
 0x2e3   :  { %6040 = vmatpush1.bf16.msra.mxu0 %v8843_v43  ;;  %6071 = vmatprep.mubr.bf16.mxu0 %v9005_v59  ;;  %v11564_v43 = vpop.f32.mrf.mxu1 }
 0x2e4   :  { %6013 = vmatpush2.bf16.msra.mxu1 %v8840_v42  ;;  %6041 = vmatprep.subr.bf16.mxu0 %v8851_v49  ;;  %v5048_v42 = vadd.f32 %v11328_v58, %v868_v32  ;;  %v5044_v49 = vadd.f32 %v11300_v48, %v868_v32  ;;  %v8884_v58 = vld [vmem:[%s11941_s1 + $0x150c] ss:$16 sps:$4 sm:$0xff]   ;;  %v8894_v32 = vld [vmem:[%s11941_s1 + $0x17c8] ss:$16 sps:$4 sm:$0xff]  }
 0x2e5   :  { %6014 = vmatprep.subr.bf16.mxu1 %v8848_v47  ;;  %v11566_v47 = vpop.f32.mrf.mxu0  ;;  %v8887_v48 = vld [vmem:[%s11941_s1 + $0x160c] ss:$16 sps:$4 sm:$0xff]  }
 0x2e6   :  { %v5087_v59 = vadd.f32 %v11358_v5, %v5044_v49  ;;  %v8890_v5 = vld [vmem:[%s11941_s1 + $0x17ec] ss:$16 sps:$4 sm:$0xff]   ;;  %v8900_v49 = vld [vmem:[%s11941_s1 + $0x17a8] ss:$16 sps:$4 sm:$0xff]  }
 0x2e7   :  { %6042 = vmatpush1.bf16.msra.mxu0 %v8849_v52  ;;  %v5091_v52 = vadd.f32 %v11390_v17, %v5048_v42 }
 0x2e8   :  { %6015 = vmatpush2.bf16.msra.mxu1 %v8846_v51  ;;  %6043 = vmatprep.subr.bf16.mxu0 %v8857_v57  ;;  %v8879_v51 = vld [vmem:[%s11941_s1 + $0x1628] ss:$16 sps:$4 sm:$0xff]   ;;  %v11582_v57 = vpop.f32.mrf.mxu0 }
 0x2e9   :  { %6016 = vmatprep.subr.bf16.mxu1 %v8854_v56  ;;  %v5348_v56 = vpop.f32.mrf.mxu1  ;;  %v5134_v60 = vadd.f32 %v11392_v18, %v5091_v52  ;;  %v8893_v18 = vld [vmem:[%s11941_s1 + $0x18ec] ss:$16 sps:$4 sm:$0xff]  }
 0x2ea   :  { %v11594_v17 = vpop.f32.mrf.mxu0 }
 0x2eb   :  { %6044 = vmatpush1.bf16.msra.mxu0 %v8855_v0  ;;  %v8885_v0 = vld [vmem:[%s11941_s1 + $0x1608] ss:$16 sps:$4 sm:$0xff]  }
 0x2ec   :  { %6017 = vmatpush2.bf16.msra.mxu1 %v8852_v61  ;;  %6045 = vmatprep.subr.bf16.mxu0 %v8863_v4  ;;  %v8882_v61 = vld [vmem:[%s11941_s1 + $0x1508] ss:$16 sps:$4 sm:$0xff]   ;;  %v5130_v4 = vadd.f32 %v11360_v6, %v5087_v59  ;;  %v11612_v20 = vpop.f32.mrf.mxu0  ;;  %v8896_v6 = vld [vmem:[%s11941_s1 + $0x17cc] ss:$16 sps:$4 sm:$0xff]  }
 0x2ed   :  { %6018 = vmatprep.subr.bf16.mxu1 %v8860_v3  ;;  %v11592_v3 = vpop.f32.mrf.mxu1  ;;  %v8906_v59 = vld [vmem:[%s11941_s1 + $0x1788] ss:$16 sps:$4 sm:$0xff]  }
 0x2ef   :  { %6046 = vmatpush1.bf16.msra.mxu0 %v8861_v9  ;;  %v8888_v9 = vld [vmem:[%s11941_s1 + $0x17e8] ss:$16 sps:$4 sm:$0xff]  }
 0x2f0   :  { %6019 = vmatpush2.bf16.msra.mxu1 %v8858_v8  ;;  %6047 = vmatprep.subr.bf16.mxu0 %v8869_v15  ;;  %v5177_v8 = vadd.f32 %v11448_v40, %v5134_v60  ;;  %v11610_v15 = vpop.f32.mrf.mxu1  ;;  %v8899_v40 = vld [vmem:[%s11941_s1 + $0x18cc] ss:$16 sps:$4 sm:$0xff]   ;;  %v8909_v60 = vld [vmem:[%s11941_s1 + $0x1888] ss:$16 sps:$4 sm:$0xff]  }
 0x2f1   :  { %6020 = vmatprep.subr.bf16.mxu1 %v8866_v14  ;;  %v8891_v14 = vld [vmem:[%s11941_s1 + $0x18e8] ss:$16 sps:$4 sm:$0xff]  }
 0x2f3   :  { %6048 = vmatpush1.bf16.msra.mxu0 %v8867_v24  ;;  %v5220_v24 = vadd.f32 %v11450_v41, %v5177_v8  ;;  %v11634_v41 = vpop.f32.mrf.mxu0 }
 0x2f4   :  { %6021 = vmatpush2.bf16.msra.mxu1 %v8864_v23  ;;  %6049 = vmatprep.subr.bf16.mxu0 %v8875_v29  ;;  %v5173_v23 = vadd.f32 %v11416_v27, %v5130_v4  ;;  %v11632_v27 = vpop.f32.mrf.mxu1 }
 0x2f5   :  { %6022 = vmatprep.subr.bf16.mxu1 %v8872_v26  ;;  %v9006_v26 = vld [vmem:[%s11942_s0 + $0x50] ss:$100 sps:$4 sm:$0xff]  }
 0x2f6   :  { %v5216_v29 = vadd.f32 %v11418_v28, %v5173_v23  ;;  %v8902_v28 = vld [vmem:[%s11941_s1 + $0x17ac] ss:$16 sps:$4 sm:$0xff]  }
 0x2f7   :  { %6050 = vmatpush1.bf16.msra.mxu0 %v8873_v37  ;;  %v8905_v37 = vld [vmem:[%s11941_s1 + $0x18ac] ss:$16 sps:$4 sm:$0xff]  }
 0x2f8   :  { %6023 = vmatpush2.bf16.msra.mxu1 %v8870_v35  ;;  %6051 = vmatprep.subr.bf16.mxu0 %v8881_v39  ;;  %v8897_v35 = vld [vmem:[%s11941_s1 + $0x18c8] ss:$16 sps:$4 sm:$0xff]   ;;  %v5259_v39 = vadd.f32 %v11477_v54, %v5216_v29  ;;  %v8911_v54 = vld [vmem:[%s11941_s1 + $0x188c] ss:$16 sps:$4 sm:$0xff]  }
 0x2f9   :  { %6024 = vmatprep.subr.bf16.mxu1 %v8878_v38  ;;  %v5263_v38 = vadd.f32 %v11514_v10, %v5220_v24  ;;  %v8918_v29 = vld [vmem:[%s11941_s1 + $0x1748] ss:$16 sps:$4 sm:$0xff]  }
 0x2fa   :  { %v5302_v10 = vadd.f32 %v11479_v55, %v5259_v39  ;;  %v8914_v55 = vld [vmem:[%s11941_s1 + $0x176c] ss:$16 sps:$4 sm:$0xff]  }
 0x2fb   :  { %6052 = vmatpush1.bf16.msra.mxu0 %v8879_v51  ;;  %v5306_v42 = vadd.f32 %v11516_v13, %v5263_v38  ;;  %v5434_v51 = vpop.f32.mrf.mxu1 }
 0x2fc   :  { %6025 = vmatpush2.bf16.msra.mxu1 %v8876_v50  ;;  %6053 = vmatprep.subr.bf16.mxu0 %v8887_v48  ;;  %v8903_v50 = vld [vmem:[%s11941_s1 + $0x18a8] ss:$16 sps:$4 sm:$0xff]  }
 0x2fd   :  { %6026 = vmatprep.subr.bf16.mxu1 %v8884_v58  ;;  %v5477_v58 = vpop.f32.mrf.mxu0  ;;  %v11659_v13 = vpop.f32.mrf.mxu1  ;;  %v5349_v52 = vadd.f32 %v5348_v56, %v5306_v42  ;;  %v8917_v56 = vld [vmem:[%s11941_s1 + $0x186c] ss:$16 sps:$4 sm:$0xff]  }
 0x2ff   :  { %6054 = vmatpush1.bf16.msra.mxu0 %v8885_v0  ;;  %v11661_v48 = vpop.f32.mrf.mxu0  ;;  %v5392_v0 = vadd.f32 %v11582_v57, %v5349_v52 }
 0x300   :  { %6027 = vmatpush2.bf16.msra.mxu1 %v8882_v61  ;;  %6055 = vmatprep.subr.bf16.mxu0 %v8890_v5  ;;  %v5345_v61 = vadd.f32 %v11546_v30, %v5302_v10  ;;  %v863_v5 = vsub.s32 0, %v11506_v7  ;;  %v8920_v30 = vld [vmem:[%s11941_s1 + $0x174c] ss:$16 sps:$4 sm:$0xff]  }
 0x301   :  { %6082 = vmatprep.subr.bf16.mxu1 %v8893_v18  ;;  %v5516_v18 = vpop.f32.mrf.mxu1  ;;  %v5559_v4 = vpop.f32.mrf.mxu0  ;;  %v5435_v57 = vadd.f32 %v5434_v51, %v5392_v0 }
 0x302   :  { %v5388_v8 = vadd.f32 %v11548_v31, %v5345_v61  ;;  %v8923_v31 = vld [vmem:[%s11941_s1 + $0x184c] ss:$16 sps:$4 sm:$0xff]  }
 0x303   :  { %6029 = vmatmul.mubr.bf16.vlgmr.msra.gmra.mxu1 %v9006_v26  ;;  %6056 = vmatpush2.bf16.msra.mxu0 %v8888_v9  ;;  %v8912_v9 = vld [vmem:[%s11941_s1 + $0x1768] ss:$16 sps:$4 sm:$0xff]   ;;  %v11694_v23 = vpop.f32.mrf.mxu0  ;;  %v5478_v26 = vadd.f32 %v5477_v58, %v5435_v57 }
 0x304   :  { %6083 = vmatpush1.bf16.msra.mxu1 %v8891_v14  ;;  %6057 = vmatprep.subr.bf16.mxu0 %v8896_v6  ;;  %v8915_v14 = vld [vmem:[%s11941_s1 + $0x1868] ss:$16 sps:$4 sm:$0xff]   ;;  %v864_v6 = vrot.slane %v11538_v25, %v863_v5  ;;  %v5431_v24 = vadd.f32 %v11610_v15, %v5388_v8  ;;  %v8929_v15 = vld [vmem:[%s11941_s1 + $0x182c] ss:$16 sps:$4 sm:$0xff]   ;;  %v8938_v5 = vld [vmem:[%s11943_s3 + $0x70] sm:$0xff]  }
 0x305   :  { %6084 = vmatprep.subr.bf16.mxu1 %v8899_v40  ;;  %6114 = vmatprep.mubr.bf16.mxu1 %v9009_v36  ;;  %v8908_v36 = vld [vmem:[%s11941_s1 + $0x178c] ss:$16 sps:$4 sm:$0xff]   ;;  %v11692_v40 = vpop.f32.mrf.mxu1  ;;  %v5563_v42 = vpop.f32.mrf.mxu0  ;;  %v9008_v8 = vld [vmem:[%s11942_s0 + $0x60] ss:$100 sps:$4 sm:$0xff]  }
 0x306   :  { %v5042_v38 = vadd.f32 %v11292_v45, %v864_v6  ;;  %v8932_v45 = vld [vmem:[%s11941_s1 + $0x170c] ss:$16 sps:$4 sm:$0xff]  }
 0x307   :  { %6058 = vmatpush2.bf16.msra.mxu0 %v8894_v32  ;;  %v8921_v32 = vld [vmem:[%s11941_s1 + $0x1848] ss:$16 sps:$4 sm:$0xff]   ;;  %v5520_v39 = vpop.f32.mrf.mxu1 }
 0x308   :  { %6085 = vmatpush1.bf16.msra.mxu1 %v8897_v35  ;;  %6059 = vmatprep.subr.bf16.mxu0 %v8902_v28  ;;  %v5046_v35 = vadd.f32 %v11314_v53, %v864_v6  ;;  %v8926_v28 = vld [vmem:[%s11941_s1 + $0x172c] ss:$16 sps:$4 sm:$0xff]   ;;  %v8924_v53 = vld [vmem:[%s11941_s1 + $0x1728] ss:$16 sps:$4 sm:$0xff]  }
 0x309   :  { %6086 = vmatprep.subr.bf16.mxu1 %v8905_v37  ;;  %v5474_v37 = vadd.f32 %v11612_v20, %v5431_v24  ;;  %v8935_v20 = vld [vmem:[%s11941_s1 + $0x180c] ss:$16 sps:$4 sm:$0xff]  }
 0x30a   :  { %v5089_v51 = vadd.f32 %v11374_v11, %v5046_v35  ;;  %v8930_v11 = vld [vmem:[%s11941_s1 + $0x1708] ss:$16 sps:$4 sm:$0xff]  }
 0x30b   :  { %6060 = vmatpush2.bf16.msra.mxu0 %v8900_v49  ;;  %v5521_v49 = vadd.f32 %v5520_v39, %v5478_v26  ;;  %v5517_v58 = vadd.f32 %v5516_v18, %v5474_v37  ;;  %v8937_v61 = vld [vmem:[%s11943_s3 + $0x38] sm:$0xff]  }
 0x30c   :  { %6087 = vmatpush1.bf16.msra.mxu1 %v8903_v50  ;;  %6061 = vmatprep.subr.bf16.mxu0 %v8908_v36  ;;  %v8927_v50 = vld [vmem:[%s11941_s1 + $0x1828] ss:$16 sps:$4 sm:$0xff]   ;;  %v5132_v10 = vadd.f32 %v11376_v12, %v5089_v51  ;;  %v8959_v51 = vld [vmem:[%s11943_s3 + $0xa0] sm:$0xff]  }
 0x30d   :  { %6088 = vmatprep.subr.bf16.mxu1 %v8911_v54  ;;  %v5564_v36 = vadd.f32 %v5563_v42, %v5521_v49  ;;  %v5085_v54 = vadd.f32 %v11339_v62, %v5042_v38  ;;  %v5560_v52 = vadd.f32 %v5559_v4, %v5517_v58  ;;  %v8936_v62 = vld [vmem:[%s11943_s3 + $0x78] sm:$0xff]   ;;  %v8955_v42 = vld [vmem:[%s11943_s3 + $0xb0] sm:$0xff]   ;;  %v8956_v49 = vld [vmem:[%s11943_s3 + $0xe8] sm:$0xff]  }
 0x30e   :  { %v8962_v58 = vld [vmem:[%s11943_s3 + $0xd0] sm:$0xff]  }
 0x30f   :  { %6062 = vmatpush2.bf16.msra.mxu0 %v8906_v59  ;;  %v8933_v59 = vld [vmem:[%s11941_s1 + $0x1808] ss:$16 sps:$4 sm:$0xff]   ;;  %v6130_v12 = vmax.f32 %v5564_v36, 0.0  ;;  %v8963_v36 = vld [vmem:[%s11943_s3 + $0x90] sm:$0xff]  }
 0x310   :  { %6089 = vmatpush1.bf16.msra.mxu1 %v8909_v60  ;;  %6063 = vmatprep.subr.bf16.mxu0 %v8914_v55  ;;  %v5128_v60 = vadd.f32 %v11341_v63, %v5085_v54  ;;  %v5175_v55 = vadd.f32 %v11432_v33, %v5132_v10  ;;  %v9007_v33 = vld [vmem:[%s11942_s0 + $0x58] ss:$100 sps:$4 sm:$0xff]   ;;  %v8964_v54 = vld [vmem:[%s11943_s3 + $0xc8] sm:$0xff]  }
 0x311   :  { %6090 = vmatprep.subr.bf16.mxu1 %v8917_v56  ;;  %v6126_v56 = vmax.f32 %v5560_v52, 0.0  ;;  %v8965_v10 = vld [vmem:[%s11943_s3 + $0x88] sm:$0xff]   ;;  %v8966_v52 = vld [vmem:[%s11943_s3 + $0xc0] sm:$0xff]  }
 0x312   :  { %v5171_v0 = vadd.f32 %v11400_v21, %v5128_v60  ;;  %v5218_v63 = vadd.f32 %v11434_v34, %v5175_v55  ;;  %v8939_v21 = vld [vmem:[%s11943_s3 + $0x30] sm:$0xff]   ;;  %v8968_v60 = vld [vmem:[%s11945_s5 + $0x38] sm:$0xff]  }
 0x313   :  { %6064 = vmatpush2.bf16.msra.mxu0 %v8912_v9  ;;  %v6134_v18 = vpack.c.bf16 %v6130_v12, %v6126_v56  ;;  %v8969_v12 = vld [vmem:[%s11945_s5 + $0x30] sm:$0xff]   ;;  %v8970_v56 = vld [vmem:[%s11945_s5 + $0x28] sm:$0xff]  }
 0x314   :  { %6091 = vmatpush1.bf16.msra.mxu1 %v8915_v14  ;;  %6065 = vmatprep.subr.bf16.mxu0 %v8920_v30  ;;  %v5214_v4 = vadd.f32 %v11402_v22, %v5171_v0  ;;  %v5261_v34 = vadd.f32 %v11496_v1, %v5218_v63  ;;  %v8940_v22 = vld [vmem:[%s11943_s3 + $0x68] sm:$0xff]   ;;  %v8942_v1 = vld [vmem:[%s11943_s3 + $0x60] sm:$0xff]  }
 0x315   :  { %6092 = vmatprep.subr.bf16.mxu1 %v8923_v31  ;;  %v8941_v30 = vld [vmem:[%s11943_s3 + $0x28] sm:$0xff]   ;;  %v8971_v0 = vld [vmem:[%s11945_s5 + $0x20] sm:$0xff]  }
 0x316   :  { %v5257_v9 = vadd.f32 %v11458_v44, %v5214_v4  ;;  %v5304_v14 = vadd.f32 %v11498_v2, %v5261_v34  ;;  %v8943_v44 = vld [vmem:[%s11943_s3 + $0x20] sm:$0xff]  }
 0x317   :  { %6066 = vmatpush2.bf16.msra.mxu0 %v8918_v29 }
 0x318   :  { %6093 = vmatpush1.bf16.msra.mxu1 %v8921_v32  ;;  %6067 = vmatprep.subr.bf16.mxu0 %v8926_v28  ;;  %v5300_v31 = vadd.f32 %v11460_v46, %v5257_v9  ;;  %v5347_v57 = vadd.f32 %v11564_v43, %v5304_v14  ;;  %v8944_v46 = vld [vmem:[%s11943_s3 + $0x58] sm:$0xff]  }
 0x319   :  { %6094 = vmatprep.subr.bf16.mxu1 %v8929_v15  ;;  %v8945_v43 = vld [vmem:[%s11943_s3 + $0x18] sm:$0xff]  }
 0x31a   :  { %v5343_v2 = vadd.f32 %v11524_v16, %v5300_v31  ;;  %v5390_v6 = vadd.f32 %v11566_v47, %v5347_v57  ;;  %v8946_v16 = vld [vmem:[%s11943_s3 + $0x50] sm:$0xff]  }
 0x31b   :  { %6068 = vmatpush2.bf16.msra.mxu0 %v8924_v53  ;;  %v8957_v53 = vld [vmem:[%s11943_s3 + $0xa8] sm:$0xff]  }
 0x31c   :  { %6095 = vmatpush1.bf16.msra.mxu1 %v8927_v50  ;;  %6069 = vmatprep.subr.bf16.mxu0 %v8932_v45  ;;  %v5386_v24 = vadd.f32 %v11526_v19, %v5343_v2  ;;  %v5433_v26 = vadd.f32 %v11632_v27, %v5390_v6  ;;  %v8947_v19 = vld [vmem:[%s11943_s3 + $0x10] sm:$0xff]   ;;  %v8948_v27 = vld [vmem:[%s11943_s3 + $0x48] sm:$0xff]   ;;  %v8958_v50 = vld [vmem:[%s11943_s3 + $0xe0] sm:$0xff]  }
 0x31d   :  { %6096 = vmatprep.subr.bf16.mxu1 %v8935_v20  ;;  %v8960_v45 = vld [vmem:[%s11943_s3 + $0xd8] sm:$0xff]  }
 0x31e   :  { %v5429_v47 = vadd.f32 %v11592_v3, %v5386_v24  ;;  %v5476_v29 = vadd.f32 %v11634_v41, %v5433_v26  ;;  %v8949_v3 = vld [vmem:[%s11943_s3 + $0x8] sm:$0xff]   ;;  %v8961_v20 = vld [vmem:[%s11943_s3 + $0x98] sm:$0xff]  }
 0x31f   :  { %6070 = vmatpush2.bf16.msra.mxu0 %v8930_v11  ;;  %v8967_v11 = vld [vmem:[%s11943_s3 + $0x80] sm:$0xff]  }
 0x320   :  { %6097 = vmatpush1.bf16.msra.mxu1 %v8933_v59  ;;  %7594 = vmatprep.subr.bf16.mxu0 %v8936_v62  ;;  %v5472_v32 = vadd.f32 %v11594_v17, %v5429_v47  ;;  %v5519_v35 = vadd.f32 %v11692_v40, %v5476_v29  ;;  %v8950_v17 = vld [vmem:[%s11943_s3 + $0x40] sm:$0xff]   ;;  %v9010_v59 = vmov 0.0   ;;  %v5600_v62 = vpop.f32.mrf.mxu1 }
 0x321   :  { %v8951_v40 = vld [vmem:[%s11943_s3] sm:$0xff]  }
 0x322   :  { %6072 = vmatmul.mubr.bf16.vlgmr.msra.gmra.mxu0 %v9007_v33  ;;  %v5515_v41 = vadd.f32 %v11659_v13, %v5472_v32  ;;  %v5562_v28 = vadd.f32 %v11694_v23, %v5519_v35  ;;  %v8952_v13 = vld [vmem:[%s11943_s3 + $0xf8] sm:$0xff]   ;;  %v5602_v55 = vpop.f32.mrf.mxu1  ;;  %v871_v35 = vsub.s32 2, %v11506_v7 }
 0x323   :  { %6115 = vmatmul.mubr.bf16.vlgmr.msra.gmra.mxu1 %v9008_v8  ;;  %7595 = vmatpush3.bf16.msra.mxu0 %v8937_v61  ;;  %v8953_v23 = vld [vmem:[%s11943_s3 + $0xb8] sm:$0xff]  }
 0x324   :  { %6432 = vmatprep.mubr.bf16.mxu0 %v6134_v18  ;;  %7596 = vmatprep.subr.bf16.mxu0 %v8938_v5  ;;  %v5558_v15 = vadd.f32 %v11661_v48, %v5515_v41  ;;  %v6129_v37 = vmax.f32 %v5562_v28, 0.0  ;;  %v8954_v48 = vld [vmem:[%s11943_s3 + $0xf0] sm:$0xff]   ;;  %v5604_v61 = vpop.f32.mrf.mxu1  ;;  %v5643_v5 = vpop.f32.mrf.mxu0 }
 0x325   :  { %7616 = vmatprep.subr.bf16.mxu1 %v8952_v13 }
 0x326   :  { %v6125_v38 = vmax.f32 %v5558_v15, 0.0  ;;  %7617 = vmatpush3.bf16.msra.mxu1 %v8953_v23  ;;  %v5606_v63 = vpop.f32.mrf.mxu1  ;;  %v5645_v4 = vpop.f32.mrf.mxu0 }
 0x327   :  { %7597 = vmatpush3.bf16.msra.mxu0 %v8939_v21  ;;  %7618 = vmatprep.subr.bf16.mxu1 %v8954_v48 }
 0x328   :  { %7598 = vmatprep.subr.bf16.mxu0 %v8940_v22  ;;  %v6133_v39 = vpack.c.bf16 %v6129_v37, %v6125_v38  ;;  %v5686_v18 = vpop.f32.mrf.mxu1  ;;  %v5647_v8 = vpop.f32.mrf.mxu0 }
 0x32a   :  { %7619 = vmatpush3.bf16.msra.mxu1 %v8955_v42  ;;  %v5688_v33 = vpop.f32.mrf.mxu1  ;;  %v5649_v34 = vpop.f32.mrf.mxu0 }
 0x32b   :  { %7599 = vmatpush3.bf16.msra.mxu0 %v8941_v30  ;;  %7620 = vmatprep.subr.bf16.mxu1 %v8956_v49 }
 0x32c   :  { %7600 = vmatprep.subr.bf16.mxu0 %v8942_v1  ;;  %v5690_v21 = vpop.f32.mrf.mxu1  ;;  %v5729_v9 = vpop.f32.mrf.mxu0 }
 0x32e   :  { %7621 = vmatpush3.bf16.msra.mxu1 %v8957_v53  ;;  %v5692_v22 = vpop.f32.mrf.mxu1  ;;  %v5731_v30 = vpop.f32.mrf.mxu0 }
 0x32f   :  { %7601 = vmatpush3.bf16.msra.mxu0 %v8943_v44  ;;  %7622 = vmatprep.subr.bf16.mxu1 %v8958_v50 }
 0x330   :  { %7602 = vmatprep.subr.bf16.mxu0 %v8944_v46  ;;  %v5772_v14 = vpop.f32.mrf.mxu1  ;;  %v5733_v1 = vpop.f32.mrf.mxu0 }
 0x332   :  { %7623 = vmatpush3.bf16.msra.mxu1 %v8959_v51  ;;  %v5774_v31 = vpop.f32.mrf.mxu1  ;;  %v5735_v44 = vpop.f32.mrf.mxu0 }
 0x333   :  { %7603 = vmatpush3.bf16.msra.mxu0 %v8945_v43  ;;  %7624 = vmatprep.subr.bf16.mxu1 %v8960_v45 }
 0x334   :  { %7604 = vmatprep.subr.bf16.mxu0 %v8946_v16  ;;  %v5776_v57 = vpop.f32.mrf.mxu1  ;;  %v5815_v6 = vpop.f32.mrf.mxu0 }
 0x336   :  { %7625 = vmatpush3.bf16.msra.mxu1 %v8961_v20  ;;  %v5778_v2 = vpop.f32.mrf.mxu1  ;;  %v5817_v24 = vpop.f32.mrf.mxu0 }
 0x337   :  { %7605 = vmatpush3.bf16.msra.mxu0 %v8947_v19  ;;  %7626 = vmatprep.subr.bf16.mxu1 %v8962_v58 }
 0x338   :  { %7606 = vmatprep.subr.bf16.mxu0 %v8948_v27  ;;  %v5819_v26 = vpop.f32.mrf.mxu0  ;;  %v875_v27 = vsub.s32 3, %v11506_v7 }
 0x33a   :  { %7627 = vmatpush3.bf16.msra.mxu1 %v8963_v36  ;;  %v5821_v47 = vpop.f32.mrf.mxu0  ;;  %v876_v28 = vrot.slane %v11538_v25, %v875_v27 }
 0x33b   :  { %7607 = vmatpush3.bf16.msra.mxu0 %v8949_v3  ;;  %7628 = vmatprep.subr.bf16.mxu1 %v8964_v54 }
 0x33c   :  { %7608 = vmatprep.subr.bf16.mxu0 %v8950_v17  ;;  %v872_v17 = vrot.slane %v11538_v25, %v871_v35  ;;  %v5603_v37 = vadd.f32 %v5602_v55, %v876_v28  ;;  %v5607_v49 = vadd.f32 %v5606_v63, %v876_v28 }
 0x33e   :  { %7629 = vmatpush3.bf16.msra.mxu1 %v8965_v10  ;;  %v5601_v38 = vadd.f32 %v5600_v62, %v872_v17  ;;  %v5646_v13 = vadd.f32 %v5645_v4, %v5603_v37  ;;  %v5650_v20 = vadd.f32 %v5649_v34, %v5607_v49 }
 0x33f   :  { %7609 = vmatpush3.bf16.msra.mxu0 %v8951_v40  ;;  %7630 = vmatprep.subr.bf16.mxu1 %v8966_v52 }
 0x340   :  { %7656 = vmatprep.subr.bf16.mxu0 %v9010_v59  ;;  %v5644_v23 = vadd.f32 %v5643_v5, %v5601_v38  ;;  %v5689_v50 = vadd.f32 %v5688_v33, %v5646_v13  ;;  %v5693_v25 = vadd.f32 %v5692_v22, %v5650_v20  ;;  %v8972_v20 = vld [vmem:[%s11945_s5 + $0x18] sm:$0xff]  }
 0x342   :  { %6433 = vmatmul.mubr.bf16.vlgmr.msra.gmra.mxu0 %v6133_v39  ;;  %7631 = vmatpush3.bf16.msra.mxu1 %v8967_v11  ;;  %v5605_v39 = vadd.f32 %v5604_v61, %v872_v17  ;;  %v5687_v51 = vadd.f32 %v5686_v18, %v5644_v23  ;;  %v5732_v36 = vadd.f32 %v5731_v30, %v5689_v50 }
 0x343   :  { %7676 = vmatprep.subr.bf16.mxu1 %v9010_v59  ;;  %7657 = vmatpush3.bf16.msra.mxu0 %v8968_v60  ;;  %v5858_v46 = vpop.f32.mrf.mxu1 }
 0x344   :  { %7658 = vmatprep.subr.bf16.mxu0 %v9010_v59  ;;  %v5648_v53 = vadd.f32 %v5647_v8, %v5605_v39  ;;  %v5730_v54 = vadd.f32 %v5729_v9, %v5687_v51  ;;  %v5775_v52 = vadd.f32 %v5774_v31, %v5732_v36  ;;  %v8974_v36 = vld [vmem:[%s11945_s5 + $0x8] sm:$0xff]   ;;  %7672 = vmatprep.mubr.msk.bf16.mxu0 %vm9011_vm0, %v9010_v59 }
 0x345   :  { %v5860_v43 = vpop.f32.mrf.mxu1 }
 0x346   :  { %v5691_v58 = vadd.f32 %v5690_v21, %v5648_v53  ;;  %v5773_v11 = vadd.f32 %v5772_v14, %v5730_v54  ;;  %v8975_v54 = vld [vmem:[%s11945_s5] sm:$0xff]  }
 0x347   :  { %7659 = vmatpush3.bf16.msra.mxu0 %v8969_v12  ;;  %v5862_v16 = vpop.f32.mrf.mxu1  ;;  %v5736_v12 = vadd.f32 %v5735_v44, %v5693_v25  ;;  %v8976_v25 = vld [vmem:[%s11946_s7 + $0x38] sm:$0xff]  }
 0x348   :  { %7660 = vmatprep.subr.bf16.mxu0 %v9010_v59  ;;  %v5734_v10 = vadd.f32 %v5733_v1, %v5691_v58  ;;  %v5816_v61 = vadd.f32 %v5815_v6, %v5773_v11  ;;  %v8973_v58 = vld [vmem:[%s11945_s5 + $0x10] sm:$0xff]   ;;  %v8979_v11 = vld [vmem:[%s11946_s7 + $0x20] sm:$0xff]  }
 0x349   :  { %v5864_v29 = vpop.f32.mrf.mxu1 }
 0x34a   :  { %v5777_v55 = vadd.f32 %v5776_v57, %v5734_v10  ;;  %v5859_v18 = vadd.f32 %v5858_v46, %v5816_v61  ;;  %v8977_v10 = vld [vmem:[%s11946_s7 + $0x30] sm:$0xff]  }
 0x34b   :  { %7661 = vmatpush3.bf16.msra.mxu0 %v8970_v56  ;;  %v5818_v56 = vadd.f32 %v5817_v24, %v5775_v52  ;;  %v8978_v52 = vld [vmem:[%s11946_s7 + $0x28] sm:$0xff]  }
 0x34c   :  { %7662 = vmatprep.subr.bf16.mxu0 %v9010_v59  ;;  %v5820_v63 = vadd.f32 %v5819_v26, %v5777_v55 }
 0x34d   :  { %v5861_v5 = vadd.f32 %v5860_v43, %v5818_v56 }
 0x34e   :  { %v5863_v21 = vadd.f32 %v5862_v16, %v5820_v63  ;;  %v7543_v63 = vld [vmem:[%s11947_s4] ss:$0 sm:$0xff] }
 0x34f   :  { %7663 = vmatpush3.bf16.msra.mxu0 %v8971_v0  ;;  %v5779_v0 = vadd.f32 %v5778_v2, %v5736_v12 }
 0x350   :  { %7664 = vmatprep.subr.bf16.mxu0 %v9010_v59 }
 0x351   :  { %v5822_v8 = vadd.f32 %v5821_v47, %v5779_v0 }
 0x353   :  { %v5865_v22 = vadd.f32 %v5864_v29, %v5822_v8  ;;  %7665 = vmatpush3.bf16.msra.mxu0 %v8972_v20 }
 0x354   :  { %7666 = vmatprep.subr.bf16.mxu0 %v9010_v59 }
 0x357   :  { %7667 = vmatpush3.bf16.msra.mxu0 %v8973_v58 }
 0x358   :  { %7668 = vmatprep.subr.bf16.mxu0 %v9010_v59 }
 0x35b   :  { %7669 = vmatpush3.bf16.msra.mxu0 %v8974_v36 }
 0x35c   :  { %7670 = vmatprep.subr.bf16.mxu0 %v9010_v59 }
 0x35f   :  { %7671 = vmatpush3.bf16.msra.mxu0 %v8975_v54 }
 0x362   :  { %v5901_v19 = vpop.f32.mrf.mxu0 }
 0x363   :  { %v5902_v9 = vadd.f32 %v5901_v19, %v5859_v18 }
 0x364   :  { %v5903_v3 = vpop.f32.mrf.mxu0 }
 0x365   :  { %v5904_v34 = vadd.f32 %v5903_v3, %v5861_v5 }
 0x366   :  { %v5905_v15 = vpop.f32.mrf.mxu0 }
 0x367   :  { %v5906_v30 = vadd.f32 %v5905_v15, %v5863_v21 }
 0x368   :  { %v5907_v48 = vpop.f32.mrf.mxu0 }
 0x369   :  { %v5908_v44 = vadd.f32 %v5907_v48, %v5865_v22 }
 0x383   :  { %v5944_v32 = vpop.f32.mrf.mxu1 }
 0x384   :  { %v5945_v14 = vadd.f32 %v5944_v32, %v5902_v9 }
 0x385   :  { %v5946_v41 = vpop.f32.mrf.mxu1 }
 0x386   :  { %v5947_v31 = vadd.f32 %v5946_v41, %v5904_v34 }
 0x387   :  { %v5948_v40 = vpop.f32.mrf.mxu1 }
 0x388   :  { %v5949_v57 = vadd.f32 %v5948_v40, %v5906_v30 }
 0x389   :  { %v5950_v42 = vpop.f32.mrf.mxu1 }
 0x38a   :  { %v5951_v43 = vadd.f32 %v5950_v42, %v5908_v44  ;;  %v8982_v44 = vld [vmem:[%s11946_s7 + $0x8] sm:$0xff]  }
 0x3a2   :  { %v5987_v7 = vpop.f32.mrf.mxu0 }
 0x3a3   :  { %v5988_v6 = vadd.f32 %v5987_v7, %v5945_v14 }
 0x3a4   :  { %v5989_v60 = vpop.f32.mrf.mxu0 }
 0x3a5   :  { %v5990_v24 = vadd.f32 %v5989_v60, %v5947_v31  ;;  %v8980_v60 = vld [vmem:[%s11946_s7 + $0x18] sm:$0xff]  }
 0x3a6   :  { %v5991_v4 = vpop.f32.mrf.mxu0 }
 0x3a7   :  { %v5992_v46 = vadd.f32 %v5991_v4, %v5949_v57  ;;  %v8983_v57 = vld [vmem:[%s11946_s7] sm:$0xff]  }
 0x3a8   :  { %v5993_v1 = vpop.f32.mrf.mxu0 }
 0x3a9   :  { %v5994_v3 = vadd.f32 %v5993_v1, %v5951_v43 }
 0x3c3   :  { %v6030_v45 = vpop.f32.mrf.mxu1 }
 0x3c4   :  { %v6031_v28 = vadd.f32 %v6030_v45, %v5988_v6 }
 0x3c5   :  { %v6032_v62 = vpop.f32.mrf.mxu1 }
 0x3c6   :  { %v6033_v35 = vadd.f32 %v6032_v62, %v5990_v24  ;;  %v7576_v24 = vld [vmem:[%s11948_s6] ss:$0 sm:$0xff] }
 0x3c7   :  { %v6034_v33 = vpop.f32.mrf.mxu1 }
 0x3c8   :  { %v6035_v19 = vadd.f32 %v6034_v33, %v5992_v46 }
 0x3c9   :  { %v6036_v27 = vpop.f32.mrf.mxu1 }
 0x3ca   :  { %v6037_v15 = vadd.f32 %v6036_v27, %v5994_v3  ;;  %v8981_v27 = vld [vmem:[%s11946_s7 + $0x10] sm:$0xff]  }
 0x3e2   :  { %v6073_v2 = vpop.f32.mrf.mxu0 }
 0x3e3   :  { %v6116_v26 = vpop.f32.mrf.mxu1  ;;  %v6074_v17 = vadd.f32 %v6073_v2, %v6031_v28 }
 0x3e4   :  { %v6075_v47 = vpop.f32.mrf.mxu0 }
 0x3e5   :  { %v6118_v16 = vpop.f32.mrf.mxu1  ;;  %v6076_v29 = vadd.f32 %v6075_v47, %v6033_v35  ;;  %v6117_v23 = vadd.f32 %v6116_v26, %v6074_v17 }
 0x3e6   :  { %v6077_v41 = vpop.f32.mrf.mxu0 }
 0x3e7   :  { %v6120_v32 = vpop.f32.mrf.mxu1  ;;  %v6078_v37 = vadd.f32 %v6077_v41, %v6035_v19  ;;  %v6119_v40 = vadd.f32 %v6118_v16, %v6076_v29  ;;  %v6127_v51 = vmax.f32 %v6117_v23, 0.0 }
 0x3e8   :  { %v6079_v38 = vpop.f32.mrf.mxu0 }
 0x3e9   :  { %v6121_v39 = vadd.f32 %v6120_v32, %v6078_v37  ;;  %v6080_v13 = vadd.f32 %v6079_v38, %v6037_v15  ;;  %v6122_v48 = vpop.f32.mrf.mxu1  ;;  %v6128_v53 = vmax.f32 %v6119_v40, 0.0 }
 0x3eb   :  { %v6123_v42 = vadd.f32 %v6122_v48, %v6080_v13  ;;  %v6131_v49 = vmax.f32 %v6121_v39, 0.0 }
 0x3ed   :  { %v6132_v50 = vmax.f32 %v6123_v42, 0.0  ;;  %v6135_v45 = vpack.c.bf16 %v6131_v49, %v6127_v51 }
 0x3ef   :  { %v6136_v7 = vpack.c.bf16 %v6132_v50, %v6128_v53 }
 0x3f1   :  { %6473 = vmatprep.mubr.bf16.mxu1 %v6136_v7 }
 0x3f2   :  { %6474 = vmatmul.mubr.bf16.vlgmr.msra.gmra.mxu1 %v6135_v45 }
 0x3f3   :  { %7692 = vmatprep.mubr.msk.bf16.mxu1 %vm9011_vm0, %v9010_v59  ;;  %7677 = vmatpush3.bf16.msra.mxu1 %v8976_v25 }
 0x3f4   :  { %7678 = vmatprep.subr.bf16.mxu1 %v9010_v59 }
 0x3f7   :  { %7679 = vmatpush3.bf16.msra.mxu1 %v8977_v10 }
 0x3f8   :  { %7680 = vmatprep.subr.bf16.mxu1 %v9010_v59 }
 0x3fb   :  { %7681 = vmatpush3.bf16.msra.mxu1 %v8978_v52 }
 0x3fc   :  { %7682 = vmatprep.subr.bf16.mxu1 %v9010_v59 }
 0x3ff   :  { %7683 = vmatpush3.bf16.msra.mxu1 %v8979_v11 }
 0x400   :  { %7684 = vmatprep.subr.bf16.mxu1 %v9010_v59 }
 0x402   :  { %v7610_v62 = vpop.f32.mrf.mxu0 }
 0x403   :  { %7685 = vmatpush3.bf16.msra.mxu1 %v8980_v60 }
 0x404   :  { %7686 = vmatprep.subr.bf16.mxu1 %v9010_v59  ;;  %v7611_v12 = vpop.f32.mrf.mxu0 }
 0x405   :  { %v7612_v0 = vadd.f32 %v7611_v12, %v7610_v62 }
 0x406   :  { %v7613_v55 = vpop.f32.mrf.mxu0 }
 0x407   :  { %v6435_v8 = vadd.f32 %v7612_v0, %v7543_v63  ;;  %7687 = vmatpush3.bf16.msra.mxu1 %v8981_v27 }
 0x408   :  { %v7614_v56 = vpop.f32.mrf.mxu0  ;;  %7688 = vmatprep.subr.bf16.mxu1 %v9010_v59 }
 0x409   :  { %v7615_v18 = vadd.f32 %v7614_v56, %v7613_v55 }
 0x40b   :  { %v6438_v34 = vadd.f32 %v7615_v18, %v7543_v63  ;;  %7689 = vmatpush3.bf16.msra.mxu1 %v8982_v44 }
 0x40c   :  { %7690 = vmatprep.subr.bf16.mxu1 %v9010_v59  ;;  %v7585_v59 = vld [vmem:[%s11949_s8] ss:$0 sm:$0xff] }
 0x40f   :  { %7691 = vmatpush3.bf16.msra.mxu1 %v8983_v57 }
 0x4b2   :  { %v7632_v61 = vpop.f32.mrf.mxu1 }
 0x4b4   :  { %v7633_v5 = vpop.f32.mrf.mxu1 }
 0x4b5   :  { %v7634_v4 = vadd.f32 %v7633_v5, %v7632_v61 }
 0x4b6   :  { %v7635_v33 = vpop.f32.mrf.mxu1 }
 0x4b7   :  { %v6476_v9 = vadd.f32 %v7634_v4, %v6435_v8 }
 0x4b8   :  { %v7636_v21 = vpop.f32.mrf.mxu1 }
 0x4b9   :  { %v7637_v22 = vadd.f32 %v7636_v21, %v7635_v33  ;;  %v6482_v31 = vmax.f32 %v6476_v9, 0.0 }
 0x4bb   :  { %v6479_v30 = vadd.f32 %v7637_v22, %v6438_v34 }
 0x4bd   :  { %v6483_v14 = vmax.f32 %v6479_v30, 0.0 }
 0x4bf   :  { %v6484_v1 = vpack.c.bf16 %v6483_v14, %v6482_v31 }
 0x4c1   :  { %7673 = vmatmul.mubr.bf16.vlgmr.msra.gmra.mxu0 %v6484_v1 }
 0x581   :  { %v6590_v6 = vpop.f32.mrf.mxu0 }
 0x582   :  { %v6591_v26 = vadd.f32 %v7576_v24, %v6590_v6 }
 0x583   :  { %v7674_v2 = vpop.f32.mrf.mxu0 }
 0x584   :  { %v6597_v28 = vmax.f32 %v6591_v26, 0.0 }
 0x585   :  { %v6593_v43 = vpop.f32.mrf.mxu0 }
 0x586   :  { %v6594_v46 = vadd.f32 %v7576_v24, %v6593_v43 }
 0x587   :  { %v7675_v35 = vpop.f32.mrf.mxu0 }
 0x588   :  { %v6598_v47 = vmax.f32 %v6594_v46, 0.0 }
 0x58a   :  { %v6599_v16 = vpack.c.bf16 %v6598_v47, %v6597_v28 }
 0x58c   :  { %7693 = vmatmul.mubr.bf16.vlgmr.msra.gmra.mxu1 %v6599_v16 }
 0x64c   :  { %v6705_v3 = vpop.f32.mrf.mxu1 }
 0x64d   :  { %v6706_v19 = vadd.f32 %v7585_v59, %v6705_v3 }
 0x64e   :  { %v7694_v29 = vpop.f32.mrf.mxu1 }
 0x64f   :  { %6712 = vst [vmem:[%s11950_s9] sm:$0xff] %v6706_v19 }
 0x650   :  { %v6708_v17 = vpop.f32.mrf.mxu1 }
 0x651   :  { %v6709_v41 = vadd.f32 %v7585_v59, %v6708_v17 }
 0x652   :  { %v7695_v32 = vpop.f32.mrf.mxu1 }
 0x653   :  { %6713 = vst [vmem:[%s11950_s9 + $0x8] sm:$0xff] %v6709_v41 }

</bundles_post_ra>
